<compile_context>
chip_gen: v7x
topology: tpu7x:2x2x1
jax: 0.10.0
libtpu: 0.0.40
codegen_flags: <defaults>
</compile_context>

<pallas_src>
import jax
import jax.numpy as jnp
from jax.experimental import pallas as pl
from jax.experimental.pallas import tpu as pltpu


def _spatial_attention_kernel(xpad_ref, w1_ref, b1_ref, w2_ref, b2_ref,
                              w3_ref, b3_ref, o_ref, upad_ref, c2pad_ref):
    # xpad_ref : (H+2, W+2)  one batch element, zero-padded by 1 in the wrapper
    # w1_ref   : (9,)   SMEM  conv1 weight, flat  (1,1,3,3)
    # b1_ref   : (1,)   SMEM
    # w2_ref   : (50,)  SMEM  conv2 weight, flat  (2,1,5,5)
    # b2_ref   : (2,)   SMEM
    # w3_ref   : (98,)  SMEM  conv3 weight, flat  (1,2,7,7)
    # b3_ref   : (1,)   SMEM
    # o_ref    : (H, W)
    # upad_ref : VMEM (H+4, W+4)     conv1 output zero-padded by 2
    # c2pad_ref: VMEM (2, H+6, W+6)  conv2 output zero-padded by 3
    H, W = o_ref.shape

    # ---- conv1: 1 -> 1, 3x3, padding 1 (input already padded) ----
    acc1 = jnp.zeros((H, W), jnp.float32)
    for dy in range(3):
        for dx in range(3):
            acc1 = acc1 + w1_ref[dy * 3 + dx] * xpad_ref[dy:dy + H, dx:dx + W]
    acc1 = acc1 + b1_ref[0]                      # u = conv1(x)

    # Stage u into a zero-padded scratch so conv2 taps are plain window loads.
    upad_ref[...] = jnp.zeros_like(upad_ref)
    upad_ref[2:2 + H, 2:2 + W] = acc1

    # ---- conv2: 1 -> 2, 5x5, padding 2 ----
    c2pad_ref[...] = jnp.zeros_like(c2pad_ref)
    for oc in range(2):
        acc2 = jnp.zeros((H, W), jnp.float32)
        for dy in range(5):
            for dx in range(5):
                acc2 = acc2 + (w2_ref[oc * 25 + dy * 5 + dx]
                               * upad_ref[dy:dy + H, dx:dx + W])
        acc2 = acc2 + b2_ref[oc]
        c2pad_ref[oc, 3:3 + H, 3:3 + W] = acc2

    # ---- conv3: 2 -> 1, 7x7, padding 3 ----
    acc3 = jnp.zeros((H, W), jnp.float32)
    for ic in range(2):
        for dy in range(7):
            for dx in range(7):
                acc3 = acc3 + (w3_ref[ic * 49 + dy * 7 + dx]
                               * c2pad_ref[ic, dy:dy + H, dx:dx + W])
    acc3 = acc3 + b3_ref[0]

    # y = u * conv3(conv2(u));  out = y + shortcut (interior of padded input)
    shortcut = xpad_ref[1:1 + H, 1:1 + W]
    o_ref[...] = (acc1 * acc3 + shortcut).astype(o_ref.dtype)


def spatial_attention(x, w1, b1, w2, b2, w3, b3):
    """x: (B, 1, H, W) f32; weights in PyTorch OIHW layout -> (B, 1, H, W)."""
    B, C, H, W = x.shape
    assert C == 1, "SpatialAttention.conv1 expects a single input channel"
    # Free XLA-side pad: gives the 3x3 halo and lets the kernel read the
    # residual shortcut from the same block (one input DMA per batch element).
    xpad = jnp.pad(x[:, 0], ((0, 0), (1, 1), (1, 1)))

    smem_spec = pl.BlockSpec(memory_space=pltpu.MemorySpace.SMEM)

    out = pl.pallas_call(
        _spatial_attention_kernel,
        out_shape=jax.ShapeDtypeStruct((B, H, W), x.dtype),
        grid_spec=pltpu.PrefetchScalarGridSpec(
            num_scalar_prefetch=0,
            grid=(B,),
            in_specs=[
                pl.BlockSpec((None, H + 2, W + 2), lambda i: (i, 0, 0)),
                smem_spec,   # w1 flat (9,)
                smem_spec,   # b1 (1,)
                smem_spec,   # w2 flat (50,)
                smem_spec,   # b2 (2,)
                smem_spec,   # w3 flat (98,)
                smem_spec,   # b3 (1,)
            ],
            out_specs=pl.BlockSpec((None, H, W), lambda i: (i, 0, 0)),
            scratch_shapes=[
                pltpu.VMEM((H + 4, W + 4), jnp.float32),
                pltpu.VMEM((2, H + 6, W + 6), jnp.float32),
            ],
        ),
        compiler_params=pltpu.CompilerParams(
            dimension_semantics=("parallel",)),
    )(
        xpad,
        w1.reshape(-1).astype(jnp.float32),
        b1.astype(jnp.float32),
        w2.reshape(-1).astype(jnp.float32),
        b2.astype(jnp.float32),
        w3.reshape(-1).astype(jnp.float32),
        b3.astype(jnp.float32),
    )
    return out[:, None, :, :]


def spatial_attention_ref(x, w1, b1, w2, b2, w3, b3):
    """Pure-JAX reference mirroring the PyTorch forward."""
    dn = ('NCHW', 'OIHW', 'NCHW')

    def conv(inp, w, b, p):
        out = jax.lax.conv_general_dilated(
            inp, w, window_strides=(1, 1), padding=[(p, p), (p, p)],
            dimension_numbers=dn, precision=jax.lax.Precision.HIGHEST)
        return out + b.reshape(1, -1, 1, 1)

    u = conv(x, w1, b1, 1)
    c2 = conv(u, w2, b2, 2)
    c3 = conv(c2, w3, b3, 3)
    return u * c3 + x


if __name__ == "__main__":
    B, C, H, W = 2, 1, 16, 16

    key = jax.random.PRNGKey(0)
    kx, k1, kb1, k2, kb2, k3, kb3 = jax.random.split(key, 7)
    x = jax.random.normal(kx, (B, C, H, W), dtype=jnp.float32)
    # Conv2d(1,1,3,p=1) / Conv2d(1,2,5,p=2) / Conv2d(2,1,7,p=3), PyTorch OIHW.
    w1 = jax.random.normal(k1, (1, 1, 3, 3), dtype=jnp.float32) * 0.2
    b1 = jax.random.normal(kb1, (1,), dtype=jnp.float32) * 0.1
    w2 = jax.random.normal(k2, (2, 1, 5, 5), dtype=jnp.float32) * 0.1
    b2 = jax.random.normal(kb2, (2,), dtype=jnp.float32) * 0.1
    w3 = jax.random.normal(k3, (1, 2, 7, 7), dtype=jnp.float32) * 0.05
    b3 = jax.random.normal(kb3, (1,), dtype=jnp.float32) * 0.1

    out = spatial_attention(x, w1, b1, w2, b2, w3, b3)
    out = jax.block_until_ready(out)

    ref = spatial_attention_ref(x, w1, b1, w2, b2, w3, b3)
    assert out.shape == (B, 1, H, W)
    assert jnp.allclose(out, ref, atol=1e-4, rtol=1e-4)
    print("KERNEL_OK")
</pallas_src>

<mosaic_0001>
module attributes {stable_mosaic.version = 11 : i64} {
  func.func @_spatial_attention_kernel(%arg0: i32, %arg1: memref<1x18x18xf32, #tpu.memory_space<vmem>>, %arg2: memref<9xf32, #tpu.memory_space<smem>>, %arg3: memref<1xf32, #tpu.memory_space<smem>>, %arg4: memref<50xf32, #tpu.memory_space<smem>>, %arg5: memref<2xf32, #tpu.memory_space<smem>>, %arg6: memref<98xf32, #tpu.memory_space<smem>>, %arg7: memref<1xf32, #tpu.memory_space<smem>>, %arg8: memref<1x16x16xf32, #tpu.memory_space<vmem>>, %arg9: memref<20x20xf32, #tpu.memory_space<vmem>>, %arg10: memref<2x22x22xf32, #tpu.memory_space<vmem>>) attributes {dimension_semantics = [#tpu.dimension_semantics<parallel>], iteration_bounds = array<i64: 2>, scalar_prefetch = 0 : i64, scratch_operands = 2 : i64, tpu.core_type = #tpu.core_type<tc>, window_params = [{transform_indices = @transform_0, window_bounds = array<i64: 1, 18, 18>}, {transform_indices = @transform_1, window_bounds = array<i64: 9>}, {transform_indices = @transform_2, window_bounds = array<i64: 1>}, {transform_indices = @transform_3, window_bounds = array<i64: 50>}, {transform_indices = @transform_4, window_bounds = array<i64: 2>}, {transform_indices = @transform_5, window_bounds = array<i64: 98>}, {transform_indices = @transform_6, window_bounds = array<i64: 1>}, {transform_indices = @transform_7, window_bounds = array<i64: 1, 16, 16>}]} {
    %cst = arith.constant 0.000000e+00 : f32
    %0 = vector.broadcast %cst : f32 to vector<16x16xf32>
    %c0 = arith.constant 0 : index
    %1 = memref.load %arg2[%c0] : memref<9xf32, #tpu.memory_space<smem>>
    %c0_0 = arith.constant 0 : index
    %c0_1 = arith.constant 0 : index
    %c0_2 = arith.constant 0 : index
    %2 = vector.load %arg1[%c0_0, %c0_1, %c0_2] : memref<1x18x18xf32, #tpu.memory_space<vmem>>, vector<1x16x16xf32>
    %3 = vector.shape_cast %2 : vector<1x16x16xf32> to vector<16x16xf32>
    %4 = vector.broadcast %1 : f32 to vector<16x16xf32>
    %5 = arith.mulf %4, %3 : vector<16x16xf32>
    %6 = arith.addf %0, %5 : vector<16x16xf32>
    %c1 = arith.constant 1 : index
    %7 = memref.load %arg2[%c1] : memref<9xf32, #tpu.memory_space<smem>>
    %c0_3 = arith.constant 0 : index
    %c0_4 = arith.constant 0 : index
    %c1_5 = arith.constant 1 : index
    %8 = vector.load %arg1[%c0_3, %c0_4, %c1_5] : memref<1x18x18xf32, #tpu.memory_space<vmem>>, vector<1x16x16xf32>
    %9 = vector.shape_cast %8 : vector<1x16x16xf32> to vector<16x16xf32>
    %10 = vector.broadcast %7 : f32 to vector<16x16xf32>
    %11 = arith.mulf %10, %9 : vector<16x16xf32>
    %12 = arith.addf %6, %11 : vector<16x16xf32>
    %c2 = arith.constant 2 : index
    %13 = memref.load %arg2[%c2] : memref<9xf32, #tpu.memory_space<smem>>
    %c0_6 = arith.constant 0 : index
    %c0_7 = arith.constant 0 : index
    %c2_8 = arith.constant 2 : index
    %14 = vector.load %arg1[%c0_6, %c0_7, %c2_8] : memref<1x18x18xf32, #tpu.memory_space<vmem>>, vector<1x16x16xf32>
    %15 = vector.shape_cast %14 : vector<1x16x16xf32> to vector<16x16xf32>
    %16 = vector.broadcast %13 : f32 to vector<16x16xf32>
    %17 = arith.mulf %16, %15 : vector<16x16xf32>
    %18 = arith.addf %12, %17 : vector<16x16xf32>
    %c3 = arith.constant 3 : index
    %19 = memref.load %arg2[%c3] : memref<9xf32, #tpu.memory_space<smem>>
    %c0_9 = arith.constant 0 : index
    %c1_10 = arith.constant 1 : index
    %c0_11 = arith.constant 0 : index
    %20 = vector.load %arg1[%c0_9, %c1_10, %c0_11] : memref<1x18x18xf32, #tpu.memory_space<vmem>>, vector<1x16x16xf32>
    %21 = vector.shape_cast %20 : vector<1x16x16xf32> to vector<16x16xf32>
    %22 = vector.broadcast %19 : f32 to vector<16x16xf32>
    %23 = arith.mulf %22, %21 : vector<16x16xf32>
    %24 = arith.addf %18, %23 : vector<16x16xf32>
    %c4 = arith.constant 4 : index
    %25 = memref.load %arg2[%c4] : memref<9xf32, #tpu.memory_space<smem>>
    %c0_12 = arith.constant 0 : index
    %c1_13 = arith.constant 1 : index
    %c1_14 = arith.constant 1 : index
    %26 = vector.load %arg1[%c0_12, %c1_13, %c1_14] : memref<1x18x18xf32, #tpu.memory_space<vmem>>, vector<1x16x16xf32>
    %27 = vector.shape_cast %26 : vector<1x16x16xf32> to vector<16x16xf32>
    %28 = vector.broadcast %25 : f32 to vector<16x16xf32>
    %29 = arith.mulf %28, %27 : vector<16x16xf32>
    %30 = arith.addf %24, %29 : vector<16x16xf32>
    %c5 = arith.constant 5 : index
    %31 = memref.load %arg2[%c5] : memref<9xf32, #tpu.memory_space<smem>>
    %c0_15 = arith.constant 0 : index
    %c1_16 = arith.constant 1 : index
    %c2_17 = arith.constant 2 : index
    %32 = vector.load %arg1[%c0_15, %c1_16, %c2_17] : memref<1x18x18xf32, #tpu.memory_space<vmem>>, vector<1x16x16xf32>
    %33 = vector.shape_cast %32 : vector<1x16x16xf32> to vector<16x16xf32>
    %34 = vector.broadcast %31 : f32 to vector<16x16xf32>
    %35 = arith.mulf %34, %33 : vector<16x16xf32>
    %36 = arith.addf %30, %35 : vector<16x16xf32>
    %c6 = arith.constant 6 : index
    %37 = memref.load %arg2[%c6] : memref<9xf32, #tpu.memory_space<smem>>
    %c0_18 = arith.constant 0 : index
    %c2_19 = arith.constant 2 : index
    %c0_20 = arith.constant 0 : index
    %38 = vector.load %arg1[%c0_18, %c2_19, %c0_20] : memref<1x18x18xf32, #tpu.memory_space<vmem>>, vector<1x16x16xf32>
    %39 = vector.shape_cast %38 : vector<1x16x16xf32> to vector<16x16xf32>
    %40 = vector.broadcast %37 : f32 to vector<16x16xf32>
    %41 = arith.mulf %40, %39 : vector<16x16xf32>
    %42 = arith.addf %36, %41 : vector<16x16xf32>
    %c7 = arith.constant 7 : index
    %43 = memref.load %arg2[%c7] : memref<9xf32, #tpu.memory_space<smem>>
    %c0_21 = arith.constant 0 : index
    %c2_22 = arith.constant 2 : index
    %c1_23 = arith.constant 1 : index
    %44 = vector.load %arg1[%c0_21, %c2_22, %c1_23] : memref<1x18x18xf32, #tpu.memory_space<vmem>>, vector<1x16x16xf32>
    %45 = vector.shape_cast %44 : vector<1x16x16xf32> to vector<16x16xf32>
    %46 = vector.broadcast %43 : f32 to vector<16x16xf32>
    %47 = arith.mulf %46, %45 : vector<16x16xf32>
    %48 = arith.addf %42, %47 : vector<16x16xf32>
    %c8 = arith.constant 8 : index
    %49 = memref.load %arg2[%c8] : memref<9xf32, #tpu.memory_space<smem>>
    %c0_24 = arith.constant 0 : index
    %c2_25 = arith.constant 2 : index
    %c2_26 = arith.constant 2 : index
    %50 = vector.load %arg1[%c0_24, %c2_25, %c2_26] : memref<1x18x18xf32, #tpu.memory_space<vmem>>, vector<1x16x16xf32>
    %51 = vector.shape_cast %50 : vector<1x16x16xf32> to vector<16x16xf32>
    %52 = vector.broadcast %49 : f32 to vector<16x16xf32>
    %53 = arith.mulf %52, %51 : vector<16x16xf32>
    %54 = arith.addf %48, %53 : vector<16x16xf32>
    %c0_27 = arith.constant 0 : index
    %55 = memref.load %arg3[%c0_27] : memref<1xf32, #tpu.memory_space<smem>>
    %56 = vector.broadcast %55 : f32 to vector<16x16xf32>
    %57 = arith.addf %54, %56 : vector<16x16xf32>
    %cst_28 = arith.constant 0.000000e+00 : f32
    %58 = vector.broadcast %cst_28 : f32 to vector<20x20xf32>
    %c0_29 = arith.constant 0 : index
    %c0_30 = arith.constant 0 : index
    %59 = vector.load %arg9[%c0_29, %c0_30] : memref<20x20xf32, #tpu.memory_space<vmem>>, vector<20x20xf32>
    tpu.vector_store %arg9[%c0_29, %c0_30], %58 {strides = array<i32>} : memref<20x20xf32, #tpu.memory_space<vmem>>, vector<20x20xf32>,
    %c2_31 = arith.constant 2 : index
    %c2_32 = arith.constant 2 : index
    %60 = vector.load %arg9[%c2_31, %c2_32] : memref<20x20xf32, #tpu.memory_space<vmem>>, vector<16x16xf32>
    tpu.vector_store %arg9[%c2_31, %c2_32], %57 {strides = array<i32>} : memref<20x20xf32, #tpu.memory_space<vmem>>, vector<16x16xf32>,
    %cst_33 = arith.constant 0.000000e+00 : f32
    %61 = vector.broadcast %cst_33 : f32 to vector<2x22x22xf32>
    %c0_34 = arith.constant 0 : index
    %c0_35 = arith.constant 0 : index
    %c0_36 = arith.constant 0 : index
    %62 = vector.load %arg10[%c0_34, %c0_35, %c0_36] : memref<2x22x22xf32, #tpu.memory_space<vmem>>, vector<2x22x22xf32>
    tpu.vector_store %arg10[%c0_34, %c0_35, %c0_36], %61 {strides = array<i32>} : memref<2x22x22xf32, #tpu.memory_space<vmem>>, vector<2x22x22xf32>,
    %cst_37 = arith.constant 0.000000e+00 : f32
    %63 = vector.broadcast %cst_37 : f32 to vector<16x16xf32>
    %c0_38 = arith.constant 0 : index
    %64 = memref.load %arg4[%c0_38] : memref<50xf32, #tpu.memory_space<smem>>
    %c0_39 = arith.constant 0 : index
    %c0_40 = arith.constant 0 : index
    %65 = vector.load %arg9[%c0_39, %c0_40] : memref<20x20xf32, #tpu.memory_space<vmem>>, vector<16x16xf32>
    %66 = vector.broadcast %64 : f32 to vector<16x16xf32>
    %67 = arith.mulf %66, %65 : vector<16x16xf32>
    %68 = arith.addf %63, %67 : vector<16x16xf32>
    %c1_41 = arith.constant 1 : index
    %69 = memref.load %arg4[%c1_41] : memref<50xf32, #tpu.memory_space<smem>>
    %c0_42 = arith.constant 0 : index
    %c1_43 = arith.constant 1 : index
    %70 = vector.load %arg9[%c0_42, %c1_43] : memref<20x20xf32, #tpu.memory_space<vmem>>, vector<16x16xf32>
    %71 = vector.broadcast %69 : f32 to vector<16x16xf32>
    %72 = arith.mulf %71, %70 : vector<16x16xf32>
    %73 = arith.addf %68, %72 : vector<16x16xf32>
    %c2_44 = arith.constant 2 : index
    %74 = memref.load %arg4[%c2_44] : memref<50xf32, #tpu.memory_space<smem>>
    %c0_45 = arith.constant 0 : index
    %c2_46 = arith.constant 2 : index
    %75 = vector.load %arg9[%c0_45, %c2_46] : memref<20x20xf32, #tpu.memory_space<vmem>>, vector<16x16xf32>
    %76 = vector.broadcast %74 : f32 to vector<16x16xf32>
    %77 = arith.mulf %76, %75 : vector<16x16xf32>
    %78 = arith.addf %73, %77 : vector<16x16xf32>
    %c3_47 = arith.constant 3 : index
    %79 = memref.load %arg4[%c3_47] : memref<50xf32, #tpu.memory_space<smem>>
    %c0_48 = arith.constant 0 : index
    %c3_49 = arith.constant 3 : index
    %80 = vector.load %arg9[%c0_48, %c3_49] : memref<20x20xf32, #tpu.memory_space<vmem>>, vector<16x16xf32>
    %81 = vector.broadcast %79 : f32 to vector<16x16xf32>
    %82 = arith.mulf %81, %80 : vector<16x16xf32>
    %83 = arith.addf %78, %82 : vector<16x16xf32>
    %c4_50 = arith.constant 4 : index
    %84 = memref.load %arg4[%c4_50] : memref<50xf32, #tpu.memory_space<smem>>
    %c0_51 = arith.constant 0 : index
    %c4_52 = arith.constant 4 : index
    %85 = vector.load %arg9[%c0_51, %c4_52] : memref<20x20xf32, #tpu.memory_space<vmem>>, vector<16x16xf32>
    %86 = vector.broadcast %84 : f32 to vector<16x16xf32>
    %87 = arith.mulf %86, %85 : vector<16x16xf32>
    %88 = arith.addf %83, %87 : vector<16x16xf32>
    %c5_53 = arith.constant 5 : index
    %89 = memref.load %arg4[%c5_53] : memref<50xf32, #tpu.memory_space<smem>>
    %c1_54 = arith.constant 1 : index
    %c0_55 = arith.constant 0 : index
    %90 = vector.load %arg9[%c1_54, %c0_55] : memref<20x20xf32, #tpu.memory_space<vmem>>, vector<16x16xf32>
    %91 = vector.broadcast %89 : f32 to vector<16x16xf32>
    %92 = arith.mulf %91, %90 : vector<16x16xf32>
    %93 = arith.addf %88, %92 : vector<16x16xf32>
    %c6_56 = arith.constant 6 : index
    %94 = memref.load %arg4[%c6_56] : memref<50xf32, #tpu.memory_space<smem>>
    %c1_57 = arith.constant 1 : index
    %c1_58 = arith.constant 1 : index
    %95 = vector.load %arg9[%c1_57, %c1_58] : memref<20x20xf32, #tpu.memory_space<vmem>>, vector<16x16xf32>
    %96 = vector.broadcast %94 : f32 to vector<16x16xf32>
    %97 = arith.mulf %96, %95 : vector<16x16xf32>
    %98 = arith.addf %93, %97 : vector<16x16xf32>
    %c7_59 = arith.constant 7 : index
    %99 = memref.load %arg4[%c7_59] : memref<50xf32, #tpu.memory_space<smem>>
    %c1_60 = arith.constant 1 : index
    %c2_61 = arith.constant 2 : index
    %100 = vector.load %arg9[%c1_60, %c2_61] : memref<20x20xf32, #tpu.memory_space<vmem>>, vector<16x16xf32>
    %101 = vector.broadcast %99 : f32 to vector<16x16xf32>
    %102 = arith.mulf %101, %100 : vector<16x16xf32>
    %103 = arith.addf %98, %102 : vector<16x16xf32>
    %c8_62 = arith.constant 8 : index
    %104 = memref.load %arg4[%c8_62] : memref<50xf32, #tpu.memory_space<smem>>
    %c1_63 = arith.constant 1 : index
    %c3_64 = arith.constant 3 : index
    %105 = vector.load %arg9[%c1_63, %c3_64] : memref<20x20xf32, #tpu.memory_space<vmem>>, vector<16x16xf32>
    %106 = vector.broadcast %104 : f32 to vector<16x16xf32>
    %107 = arith.mulf %106, %105 : vector<16x16xf32>
    %108 = arith.addf %103, %107 : vector<16x16xf32>
    %c9 = arith.constant 9 : index
    %109 = memref.load %arg4[%c9] : memref<50xf32, #tpu.memory_space<smem>>
    %c1_65 = arith.constant 1 : index
    %c4_66 = arith.constant 4 : index
    %110 = vector.load %arg9[%c1_65, %c4_66] : memref<20x20xf32, #tpu.memory_space<vmem>>, vector<16x16xf32>
    %111 = vector.broadcast %109 : f32 to vector<16x16xf32>
    %112 = arith.mulf %111, %110 : vector<16x16xf32>
    %113 = arith.addf %108, %112 : vector<16x16xf32>
    %c10 = arith.constant 10 : index
    %114 = memref.load %arg4[%c10] : memref<50xf32, #tpu.memory_space<smem>>
    %c2_67 = arith.constant 2 : index
    %c0_68 = arith.constant 0 : index
    %115 = vector.load %arg9[%c2_67, %c0_68] : memref<20x20xf32, #tpu.memory_space<vmem>>, vector<16x16xf32>
    %116 = vector.broadcast %114 : f32 to vector<16x16xf32>
    %117 = arith.mulf %116, %115 : vector<16x16xf32>
    %118 = arith.addf %113, %117 : vector<16x16xf32>
    %c11 = arith.constant 11 : index
    %119 = memref.load %arg4[%c11] : memref<50xf32, #tpu.memory_space<smem>>
    %c2_69 = arith.constant 2 : index
    %c1_70 = arith.constant 1 : index
    %120 = vector.load %arg9[%c2_69, %c1_70] : memref<20x20xf32, #tpu.memory_space<vmem>>, vector<16x16xf32>
    %121 = vector.broadcast %119 : f32 to vector<16x16xf32>
    %122 = arith.mulf %121, %120 : vector<16x16xf32>
    %123 = arith.addf %118, %122 : vector<16x16xf32>
    %c12 = arith.constant 12 : index
    %124 = memref.load %arg4[%c12] : memref<50xf32, #tpu.memory_space<smem>>
    %c2_71 = arith.constant 2 : index
    %c2_72 = arith.constant 2 : index
    %125 = vector.load %arg9[%c2_71, %c2_72] : memref<20x20xf32, #tpu.memory_space<vmem>>, vector<16x16xf32>
    %126 = vector.broadcast %124 : f32 to vector<16x16xf32>
    %127 = arith.mulf %126, %125 : vector<16x16xf32>
    %128 = arith.addf %123, %127 : vector<16x16xf32>
    %c13 = arith.constant 13 : index
    %129 = memref.load %arg4[%c13] : memref<50xf32, #tpu.memory_space<smem>>
    %c2_73 = arith.constant 2 : index
    %c3_74 = arith.constant 3 : index
    %130 = vector.load %arg9[%c2_73, %c3_74] : memref<20x20xf32, #tpu.memory_space<vmem>>, vector<16x16xf32>
    %131 = vector.broadcast %129 : f32 to vector<16x16xf32>
    %132 = arith.mulf %131, %130 : vector<16x16xf32>
    %133 = arith.addf %128, %132 : vector<16x16xf32>
    %c14 = arith.constant 14 : index
    %134 = memref.load %arg4[%c14] : memref<50xf32, #tpu.memory_space<smem>>
    %c2_75 = arith.constant 2 : index
    %c4_76 = arith.constant 4 : index
    %135 = vector.load %arg9[%c2_75, %c4_76] : memref<20x20xf32, #tpu.memory_space<vmem>>, vector<16x16xf32>
    %136 = vector.broadcast %134 : f32 to vector<16x16xf32>
    %137 = arith.mulf %136, %135 : vector<16x16xf32>
    %138 = arith.addf %133, %137 : vector<16x16xf32>
    %c15 = arith.constant 15 : index
    %139 = memref.load %arg4[%c15] : memref<50xf32, #tpu.memory_space<smem>>
    %c3_77 = arith.constant 3 : index
    %c0_78 = arith.constant 0 : index
    %140 = vector.load %arg9[%c3_77, %c0_78] : memref<20x20xf32, #tpu.memory_space<vmem>>, vector<16x16xf32>
    %141 = vector.broadcast %139 : f32 to vector<16x16xf32>
    %142 = arith.mulf %141, %140 : vector<16x16xf32>
    %143 = arith.addf %138, %142 : vector<16x16xf32>
    %c16 = arith.constant 16 : index
    %144 = memref.load %arg4[%c16] : memref<50xf32, #tpu.memory_space<smem>>
    %c3_79 = arith.constant 3 : index
    %c1_80 = arith.constant 1 : index
    %145 = vector.load %arg9[%c3_79, %c1_80] : memref<20x20xf32, #tpu.memory_space<vmem>>, vector<16x16xf32>
    %146 = vector.broadcast %144 : f32 to vector<16x16xf32>
    %147 = arith.mulf %146, %145 : vector<16x16xf32>
    %148 = arith.addf %143, %147 : vector<16x16xf32>
    %c17 = arith.constant 17 : index
    %149 = memref.load %arg4[%c17] : memref<50xf32, #tpu.memory_space<smem>>
    %c3_81 = arith.constant 3 : index
    %c2_82 = arith.constant 2 : index
    %150 = vector.load %arg9[%c3_81, %c2_82] : memref<20x20xf32, #tpu.memory_space<vmem>>, vector<16x16xf32>
    %151 = vector.broadcast %149 : f32 to vector<16x16xf32>
    %152 = arith.mulf %151, %150 : vector<16x16xf32>
    %153 = arith.addf %148, %152 : vector<16x16xf32>
    %c18 = arith.constant 18 : index
    %154 = memref.load %arg4[%c18] : memref<50xf32, #tpu.memory_space<smem>>
    %c3_83 = arith.constant 3 : index
    %c3_84 = arith.constant 3 : index
    %155 = vector.load %arg9[%c3_83, %c3_84] : memref<20x20xf32, #tpu.memory_space<vmem>>, vector<16x16xf32>
    %156 = vector.broadcast %154 : f32 to vector<16x16xf32>
    %157 = arith.mulf %156, %155 : vector<16x16xf32>
    %158 = arith.addf %153, %157 : vector<16x16xf32>
    %c19 = arith.constant 19 : index
    %159 = memref.load %arg4[%c19] : memref<50xf32, #tpu.memory_space<smem>>
    %c3_85 = arith.constant 3 : index
    %c4_86 = arith.constant 4 : index
    %160 = vector.load %arg9[%c3_85, %c4_86] : memref<20x20xf32, #tpu.memory_space<vmem>>, vector<16x16xf32>
    %161 = vector.broadcast %159 : f32 to vector<16x16xf32>
    %162 = arith.mulf %161, %160 : vector<16x16xf32>
    %163 = arith.addf %158, %162 : vector<16x16xf32>
    %c20 = arith.constant 20 : index
    %164 = memref.load %arg4[%c20] : memref<50xf32, #tpu.memory_space<smem>>
    %c4_87 = arith.constant 4 : index
    %c0_88 = arith.constant 0 : index
    %165 = vector.load %arg9[%c4_87, %c0_88] : memref<20x20xf32, #tpu.memory_space<vmem>>, vector<16x16xf32>
    %166 = vector.broadcast %164 : f32 to vector<16x16xf32>
    %167 = arith.mulf %166, %165 : vector<16x16xf32>
    %168 = arith.addf %163, %167 : vector<16x16xf32>
    %c21 = arith.constant 21 : index
    %169 = memref.load %arg4[%c21] : memref<50xf32, #tpu.memory_space<smem>>
    %c4_89 = arith.constant 4 : index
    %c1_90 = arith.constant 1 : index
    %170 = vector.load %arg9[%c4_89, %c1_90] : memref<20x20xf32, #tpu.memory_space<vmem>>, vector<16x16xf32>
    %171 = vector.broadcast %169 : f32 to vector<16x16xf32>
    %172 = arith.mulf %171, %170 : vector<16x16xf32>
    %173 = arith.addf %168, %172 : vector<16x16xf32>
    %c22 = arith.constant 22 : index
    %174 = memref.load %arg4[%c22] : memref<50xf32, #tpu.memory_space<smem>>
    %c4_91 = arith.constant 4 : index
    %c2_92 = arith.constant 2 : index
    %175 = vector.load %arg9[%c4_91, %c2_92] : memref<20x20xf32, #tpu.memory_space<vmem>>, vector<16x16xf32>
    %176 = vector.broadcast %174 : f32 to vector<16x16xf32>
    %177 = arith.mulf %176, %175 : vector<16x16xf32>
    %178 = arith.addf %173, %177 : vector<16x16xf32>
    %c23 = arith.constant 23 : index
    %179 = memref.load %arg4[%c23] : memref<50xf32, #tpu.memory_space<smem>>
    %c4_93 = arith.constant 4 : index
    %c3_94 = arith.constant 3 : index
    %180 = vector.load %arg9[%c4_93, %c3_94] : memref<20x20xf32, #tpu.memory_space<vmem>>, vector<16x16xf32>
    %181 = vector.broadcast %179 : f32 to vector<16x16xf32>
    %182 = arith.mulf %181, %180 : vector<16x16xf32>
    %183 = arith.addf %178, %182 : vector<16x16xf32>
    %c24 = arith.constant 24 : index
    %184 = memref.load %arg4[%c24] : memref<50xf32, #tpu.memory_space<smem>>
    %c4_95 = arith.constant 4 : index
    %c4_96 = arith.constant 4 : index
    %185 = vector.load %arg9[%c4_95, %c4_96] : memref<20x20xf32, #tpu.memory_space<vmem>>, vector<16x16xf32>
    %186 = vector.broadcast %184 : f32 to vector<16x16xf32>
    %187 = arith.mulf %186, %185 : vector<16x16xf32>
    %188 = arith.addf %183, %187 : vector<16x16xf32>
    %c0_97 = arith.constant 0 : index
    %189 = memref.load %arg5[%c0_97] : memref<2xf32, #tpu.memory_space<smem>>
    %190 = vector.broadcast %189 : f32 to vector<16x16xf32>
    %191 = arith.addf %188, %190 : vector<16x16xf32>
    %c0_98 = arith.constant 0 : index
    %c3_99 = arith.constant 3 : index
    %c3_100 = arith.constant 3 : index
    %192 = vector.load %arg10[%c0_98, %c3_99, %c3_100] : memref<2x22x22xf32, #tpu.memory_space<vmem>>, vector<1x16x16xf32>
    %193 = vector.shape_cast %192 : vector<1x16x16xf32> to vector<16x16xf32>
    %194 = vector.shape_cast %191 : vector<16x16xf32> to vector<1x16x16xf32>
    tpu.vector_store %arg10[%c0_98, %c3_99, %c3_100], %194 {strides = array<i32>} : memref<2x22x22xf32, #tpu.memory_space<vmem>>, vector<1x16x16xf32>,
    %cst_101 = arith.constant 0.000000e+00 : f32
    %195 = vector.broadcast %cst_101 : f32 to vector<16x16xf32>
    %c25 = arith.constant 25 : index
    %196 = memref.load %arg4[%c25] : memref<50xf32, #tpu.memory_space<smem>>
    %c0_102 = arith.constant 0 : index
    %c0_103 = arith.constant 0 : index
    %197 = vector.load %arg9[%c0_102, %c0_103] : memref<20x20xf32, #tpu.memory_space<vmem>>, vector<16x16xf32>
    %198 = vector.broadcast %196 : f32 to vector<16x16xf32>
    %199 = arith.mulf %198, %197 : vector<16x16xf32>
    %200 = arith.addf %195, %199 : vector<16x16xf32>
    %c26 = arith.constant 26 : index
    %201 = memref.load %arg4[%c26] : memref<50xf32, #tpu.memory_space<smem>>
    %c0_104 = arith.constant 0 : index
    %c1_105 = arith.constant 1 : index
    %202 = vector.load %arg9[%c0_104, %c1_105] : memref<20x20xf32, #tpu.memory_space<vmem>>, vector<16x16xf32>
    %203 = vector.broadcast %201 : f32 to vector<16x16xf32>
    %204 = arith.mulf %203, %202 : vector<16x16xf32>
    %205 = arith.addf %200, %204 : vector<16x16xf32>
    %c27 = arith.constant 27 : index
    %206 = memref.load %arg4[%c27] : memref<50xf32, #tpu.memory_space<smem>>
    %c0_106 = arith.constant 0 : index
    %c2_107 = arith.constant 2 : index
    %207 = vector.load %arg9[%c0_106, %c2_107] : memref<20x20xf32, #tpu.memory_space<vmem>>, vector<16x16xf32>
    %208 = vector.broadcast %206 : f32 to vector<16x16xf32>
    %209 = arith.mulf %208, %207 : vector<16x16xf32>
    %210 = arith.addf %205, %209 : vector<16x16xf32>
    %c28 = arith.constant 28 : index
    %211 = memref.load %arg4[%c28] : memref<50xf32, #tpu.memory_space<smem>>
    %c0_108 = arith.constant 0 : index
    %c3_109 = arith.constant 3 : index
    %212 = vector.load %arg9[%c0_108, %c3_109] : memref<20x20xf32, #tpu.memory_space<vmem>>, vector<16x16xf32>
    %213 = vector.broadcast %211 : f32 to vector<16x16xf32>
    %214 = arith.mulf %213, %212 : vector<16x16xf32>
    %215 = arith.addf %210, %214 : vector<16x16xf32>
    %c29 = arith.constant 29 : index
    %216 = memref.load %arg4[%c29] : memref<50xf32, #tpu.memory_space<smem>>
    %c0_110 = arith.constant 0 : index
    %c4_111 = arith.constant 4 : index
    %217 = vector.load %arg9[%c0_110, %c4_111] : memref<20x20xf32, #tpu.memory_space<vmem>>, vector<16x16xf32>
    %218 = vector.broadcast %216 : f32 to vector<16x16xf32>
    %219 = arith.mulf %218, %217 : vector<16x16xf32>
    %220 = arith.addf %215, %219 : vector<16x16xf32>
    %c30 = arith.constant 30 : index
    %221 = memref.load %arg4[%c30] : memref<50xf32, #tpu.memory_space<smem>>
    %c1_112 = arith.constant 1 : index
    %c0_113 = arith.constant 0 : index
    %222 = vector.load %arg9[%c1_112, %c0_113] : memref<20x20xf32, #tpu.memory_space<vmem>>, vector<16x16xf32>
    %223 = vector.broadcast %221 : f32 to vector<16x16xf32>
    %224 = arith.mulf %223, %222 : vector<16x16xf32>
    %225 = arith.addf %220, %224 : vector<16x16xf32>
    %c31 = arith.constant 31 : index
    %226 = memref.load %arg4[%c31] : memref<50xf32, #tpu.memory_space<smem>>
    %c1_114 = arith.constant 1 : index
    %c1_115 = arith.constant 1 : index
    %227 = vector.load %arg9[%c1_114, %c1_115] : memref<20x20xf32, #tpu.memory_space<vmem>>, vector<16x16xf32>
    %228 = vector.broadcast %226 : f32 to vector<16x16xf32>
    %229 = arith.mulf %228, %227 : vector<16x16xf32>
    %230 = arith.addf %225, %229 : vector<16x16xf32>
    %c32 = arith.constant 32 : index
    %231 = memref.load %arg4[%c32] : memref<50xf32, #tpu.memory_space<smem>>
    %c1_116 = arith.constant 1 : index
    %c2_117 = arith.constant 2 : index
    %232 = vector.load %arg9[%c1_116, %c2_117] : memref<20x20xf32, #tpu.memory_space<vmem>>, vector<16x16xf32>
    %233 = vector.broadcast %231 : f32 to vector<16x16xf32>
    %234 = arith.mulf %233, %232 : vector<16x16xf32>
    %235 = arith.addf %230, %234 : vector<16x16xf32>
    %c33 = arith.constant 33 : index
    %236 = memref.load %arg4[%c33] : memref<50xf32, #tpu.memory_space<smem>>
    %c1_118 = arith.constant 1 : index
    %c3_119 = arith.constant 3 : index
    %237 = vector.load %arg9[%c1_118, %c3_119] : memref<20x20xf32, #tpu.memory_space<vmem>>, vector<16x16xf32>
    %238 = vector.broadcast %236 : f32 to vector<16x16xf32>
    %239 = arith.mulf %238, %237 : vector<16x16xf32>
    %240 = arith.addf %235, %239 : vector<16x16xf32>
    %c34 = arith.constant 34 : index
    %241 = memref.load %arg4[%c34] : memref<50xf32, #tpu.memory_space<smem>>
    %c1_120 = arith.constant 1 : index
    %c4_121 = arith.constant 4 : index
    %242 = vector.load %arg9[%c1_120, %c4_121] : memref<20x20xf32, #tpu.memory_space<vmem>>, vector<16x16xf32>
    %243 = vector.broadcast %241 : f32 to vector<16x16xf32>
    %244 = arith.mulf %243, %242 : vector<16x16xf32>
    %245 = arith.addf %240, %244 : vector<16x16xf32>
    %c35 = arith.constant 35 : index
    %246 = memref.load %arg4[%c35] : memref<50xf32, #tpu.memory_space<smem>>
    %c2_122 = arith.constant 2 : index
    %c0_123 = arith.constant 0 : index
    %247 = vector.load %arg9[%c2_122, %c0_123] : memref<20x20xf32, #tpu.memory_space<vmem>>, vector<16x16xf32>
    %248 = vector.broadcast %246 : f32 to vector<16x16xf32>
    %249 = arith.mulf %248, %247 : vector<16x16xf32>
    %250 = arith.addf %245, %249 : vector<16x16xf32>
    %c36 = arith.constant 36 : index
    %251 = memref.load %arg4[%c36] : memref<50xf32, #tpu.memory_space<smem>>
    %c2_124 = arith.constant 2 : index
    %c1_125 = arith.constant 1 : index
    %252 = vector.load %arg9[%c2_124, %c1_125] : memref<20x20xf32, #tpu.memory_space<vmem>>, vector<16x16xf32>
    %253 = vector.broadcast %251 : f32 to vector<16x16xf32>
    %254 = arith.mulf %253, %252 : vector<16x16xf32>
    %255 = arith.addf %250, %254 : vector<16x16xf32>
    %c37 = arith.constant 37 : index
    %256 = memref.load %arg4[%c37] : memref<50xf32, #tpu.memory_space<smem>>
    %c2_126 = arith.constant 2 : index
    %c2_127 = arith.constant 2 : index
    %257 = vector.load %arg9[%c2_126, %c2_127] : memref<20x20xf32, #tpu.memory_space<vmem>>, vector<16x16xf32>
    %258 = vector.broadcast %256 : f32 to vector<16x16xf32>
    %259 = arith.mulf %258, %257 : vector<16x16xf32>
    %260 = arith.addf %255, %259 : vector<16x16xf32>
    %c38 = arith.constant 38 : index
    %261 = memref.load %arg4[%c38] : memref<50xf32, #tpu.memory_space<smem>>
    %c2_128 = arith.constant 2 : index
    %c3_129 = arith.constant 3 : index
    %262 = vector.load %arg9[%c2_128, %c3_129] : memref<20x20xf32, #tpu.memory_space<vmem>>, vector<16x16xf32>
    %263 = vector.broadcast %261 : f32 to vector<16x16xf32>
    %264 = arith.mulf %263, %262 : vector<16x16xf32>
    %265 = arith.addf %260, %264 : vector<16x16xf32>
    %c39 = arith.constant 39 : index
    %266 = memref.load %arg4[%c39] : memref<50xf32, #tpu.memory_space<smem>>
    %c2_130 = arith.constant 2 : index
    %c4_131 = arith.constant 4 : index
    %267 = vector.load %arg9[%c2_130, %c4_131] : memref<20x20xf32, #tpu.memory_space<vmem>>, vector<16x16xf32>
    %268 = vector.broadcast %266 : f32 to vector<16x16xf32>
    %269 = arith.mulf %268, %267 : vector<16x16xf32>
    %270 = arith.addf %265, %269 : vector<16x16xf32>
    %c40 = arith.constant 40 : index
    %271 = memref.load %arg4[%c40] : memref<50xf32, #tpu.memory_space<smem>>
    %c3_132 = arith.constant 3 : index
    %c0_133 = arith.constant 0 : index
    %272 = vector.load %arg9[%c3_132, %c0_133] : memref<20x20xf32, #tpu.memory_space<vmem>>, vector<16x16xf32>
    %273 = vector.broadcast %271 : f32 to vector<16x16xf32>
    %274 = arith.mulf %273, %272 : vector<16x16xf32>
    %275 = arith.addf %270, %274 : vector<16x16xf32>
    %c41 = arith.constant 41 : index
    %276 = memref.load %arg4[%c41] : memref<50xf32, #tpu.memory_space<smem>>
    %c3_134 = arith.constant 3 : index
    %c1_135 = arith.constant 1 : index
    %277 = vector.load %arg9[%c3_134, %c1_135] : memref<20x20xf32, #tpu.memory_space<vmem>>, vector<16x16xf32>
    %278 = vector.broadcast %276 : f32 to vector<16x16xf32>
    %279 = arith.mulf %278, %277 : vector<16x16xf32>
    %280 = arith.addf %275, %279 : vector<16x16xf32>
    %c42 = arith.constant 42 : index
    %281 = memref.load %arg4[%c42] : memref<50xf32, #tpu.memory_space<smem>>
    %c3_136 = arith.constant 3 : index
    %c2_137 = arith.constant 2 : index
    %282 = vector.load %arg9[%c3_136, %c2_137] : memref<20x20xf32, #tpu.memory_space<vmem>>, vector<16x16xf32>
    %283 = vector.broadcast %281 : f32 to vector<16x16xf32>
    %284 = arith.mulf %283, %282 : vector<16x16xf32>
    %285 = arith.addf %280, %284 : vector<16x16xf32>
    %c43 = arith.constant 43 : index
    %286 = memref.load %arg4[%c43] : memref<50xf32, #tpu.memory_space<smem>>
    %c3_138 = arith.constant 3 : index
    %c3_139 = arith.constant 3 : index
    %287 = vector.load %arg9[%c3_138, %c3_139] : memref<20x20xf32, #tpu.memory_space<vmem>>, vector<16x16xf32>
    %288 = vector.broadcast %286 : f32 to vector<16x16xf32>
    %289 = arith.mulf %288, %287 : vector<16x16xf32>
    %290 = arith.addf %285, %289 : vector<16x16xf32>
    %c44 = arith.constant 44 : index
    %291 = memref.load %arg4[%c44] : memref<50xf32, #tpu.memory_space<smem>>
    %c3_140 = arith.constant 3 : index
    %c4_141 = arith.constant 4 : index
    %292 = vector.load %arg9[%c3_140, %c4_141] : memref<20x20xf32, #tpu.memory_space<vmem>>, vector<16x16xf32>
    %293 = vector.broadcast %291 : f32 to vector<16x16xf32>
    %294 = arith.mulf %293, %292 : vector<16x16xf32>
    %295 = arith.addf %290, %294 : vector<16x16xf32>
    %c45 = arith.constant 45 : index
    %296 = memref.load %arg4[%c45] : memref<50xf32, #tpu.memory_space<smem>>
    %c4_142 = arith.constant 4 : index
    %c0_143 = arith.constant 0 : index
    %297 = vector.load %arg9[%c4_142, %c0_143] : memref<20x20xf32, #tpu.memory_space<vmem>>, vector<16x16xf32>
    %298 = vector.broadcast %296 : f32 to vector<16x16xf32>
    %299 = arith.mulf %298, %297 : vector<16x16xf32>
    %300 = arith.addf %295, %299 : vector<16x16xf32>
    %c46 = arith.constant 46 : index
    %301 = memref.load %arg4[%c46] : memref<50xf32, #tpu.memory_space<smem>>
    %c4_144 = arith.constant 4 : index
    %c1_145 = arith.constant 1 : index
    %302 = vector.load %arg9[%c4_144, %c1_145] : memref<20x20xf32, #tpu.memory_space<vmem>>, vector<16x16xf32>
    %303 = vector.broadcast %301 : f32 to vector<16x16xf32>
    %304 = arith.mulf %303, %302 : vector<16x16xf32>
    %305 = arith.addf %300, %304 : vector<16x16xf32>
    %c47 = arith.constant 47 : index
    %306 = memref.load %arg4[%c47] : memref<50xf32, #tpu.memory_space<smem>>
    %c4_146 = arith.constant 4 : index
    %c2_147 = arith.constant 2 : index
    %307 = vector.load %arg9[%c4_146, %c2_147] : memref<20x20xf32, #tpu.memory_space<vmem>>, vector<16x16xf32>
    %308 = vector.broadcast %306 : f32 to vector<16x16xf32>
    %309 = arith.mulf %308, %307 : vector<16x16xf32>
    %310 = arith.addf %305, %309 : vector<16x16xf32>
    %c48 = arith.constant 48 : index
    %311 = memref.load %arg4[%c48] : memref<50xf32, #tpu.memory_space<smem>>
    %c4_148 = arith.constant 4 : index
    %c3_149 = arith.constant 3 : index
    %312 = vector.load %arg9[%c4_148, %c3_149] : memref<20x20xf32, #tpu.memory_space<vmem>>, vector<16x16xf32>
    %313 = vector.broadcast %311 : f32 to vector<16x16xf32>
    %314 = arith.mulf %313, %312 : vector<16x16xf32>
    %315 = arith.addf %310, %314 : vector<16x16xf32>
    %c49 = arith.constant 49 : index
    %316 = memref.load %arg4[%c49] : memref<50xf32, #tpu.memory_space<smem>>
    %c4_150 = arith.constant 4 : index
    %c4_151 = arith.constant 4 : index
    %317 = vector.load %arg9[%c4_150, %c4_151] : memref<20x20xf32, #tpu.memory_space<vmem>>, vector<16x16xf32>
    %318 = vector.broadcast %316 : f32 to vector<16x16xf32>
    %319 = arith.mulf %318, %317 : vector<16x16xf32>
    %320 = arith.addf %315, %319 : vector<16x16xf32>
    %c1_152 = arith.constant 1 : index
    %321 = memref.load %arg5[%c1_152] : memref<2xf32, #tpu.memory_space<smem>>
    %322 = vector.broadcast %321 : f32 to vector<16x16xf32>
    %323 = arith.addf %320, %322 : vector<16x16xf32>
    %c1_153 = arith.constant 1 : index
    %c3_154 = arith.constant 3 : index
    %c3_155 = arith.constant 3 : index
    %324 = vector.load %arg10[%c1_153, %c3_154, %c3_155] : memref<2x22x22xf32, #tpu.memory_space<vmem>>, vector<1x16x16xf32>
    %325 = vector.shape_cast %324 : vector<1x16x16xf32> to vector<16x16xf32>
    %326 = vector.shape_cast %323 : vector<16x16xf32> to vector<1x16x16xf32>
    tpu.vector_store %arg10[%c1_153, %c3_154, %c3_155], %326 {strides = array<i32>} : memref<2x22x22xf32, #tpu.memory_space<vmem>>, vector<1x16x16xf32>,
    %cst_156 = arith.constant 0.000000e+00 : f32
    %327 = vector.broadcast %cst_156 : f32 to vector<16x16xf32>
    %c0_157 = arith.constant 0 : index
    %328 = memref.load %arg6[%c0_157] : memref<98xf32, #tpu.memory_space<smem>>
    %c0_158 = arith.constant 0 : index
    %c0_159 = arith.constant 0 : index
    %c0_160 = arith.constant 0 : index
    %329 = vector.load %arg10[%c0_158, %c0_159, %c0_160] : memref<2x22x22xf32, #tpu.memory_space<vmem>>, vector<1x16x16xf32>
    %330 = vector.shape_cast %329 : vector<1x16x16xf32> to vector<16x16xf32>
    %331 = vector.broadcast %328 : f32 to vector<16x16xf32>
    %332 = arith.mulf %331, %330 : vector<16x16xf32>
    %333 = arith.addf %327, %332 : vector<16x16xf32>
    %c1_161 = arith.constant 1 : index
    %334 = memref.load %arg6[%c1_161] : memref<98xf32, #tpu.memory_space<smem>>
    %c0_162 = arith.constant 0 : index
    %c0_163 = arith.constant 0 : index
    %c1_164 = arith.constant 1 : index
    %335 = vector.load %arg10[%c0_162, %c0_163, %c1_164] : memref<2x22x22xf32, #tpu.memory_space<vmem>>, vector<1x16x16xf32>
    %336 = vector.shape_cast %335 : vector<1x16x16xf32> to vector<16x16xf32>
    %337 = vector.broadcast %334 : f32 to vector<16x16xf32>
    %338 = arith.mulf %337, %336 : vector<16x16xf32>
    %339 = arith.addf %333, %338 : vector<16x16xf32>
    %c2_165 = arith.constant 2 : index
    %340 = memref.load %arg6[%c2_165] : memref<98xf32, #tpu.memory_space<smem>>
    %c0_166 = arith.constant 0 : index
    %c0_167 = arith.constant 0 : index
    %c2_168 = arith.constant 2 : index
    %341 = vector.load %arg10[%c0_166, %c0_167, %c2_168] : memref<2x22x22xf32, #tpu.memory_space<vmem>>, vector<1x16x16xf32>
    %342 = vector.shape_cast %341 : vector<1x16x16xf32> to vector<16x16xf32>
    %343 = vector.broadcast %340 : f32 to vector<16x16xf32>
    %344 = arith.mulf %343, %342 : vector<16x16xf32>
    %345 = arith.addf %339, %344 : vector<16x16xf32>
    %c3_169 = arith.constant 3 : index
    %346 = memref.load %arg6[%c3_169] : memref<98xf32, #tpu.memory_space<smem>>
    %c0_170 = arith.constant 0 : index
    %c0_171 = arith.constant 0 : index
    %c3_172 = arith.constant 3 : index
    %347 = vector.load %arg10[%c0_170, %c0_171, %c3_172] : memref<2x22x22xf32, #tpu.memory_space<vmem>>, vector<1x16x16xf32>
    %348 = vector.shape_cast %347 : vector<1x16x16xf32> to vector<16x16xf32>
    %349 = vector.broadcast %346 : f32 to vector<16x16xf32>
    %350 = arith.mulf %349, %348 : vector<16x16xf32>
    %351 = arith.addf %345, %350 : vector<16x16xf32>
    %c4_173 = arith.constant 4 : index
    %352 = memref.load %arg6[%c4_173] : memref<98xf32, #tpu.memory_space<smem>>
    %c0_174 = arith.constant 0 : index
    %c0_175 = arith.constant 0 : index
    %c4_176 = arith.constant 4 : index
    %353 = vector.load %arg10[%c0_174, %c0_175, %c4_176] : memref<2x22x22xf32, #tpu.memory_space<vmem>>, vector<1x16x16xf32>
    %354 = vector.shape_cast %353 : vector<1x16x16xf32> to vector<16x16xf32>
    %355 = vector.broadcast %352 : f32 to vector<16x16xf32>
    %356 = arith.mulf %355, %354 : vector<16x16xf32>
    %357 = arith.addf %351, %356 : vector<16x16xf32>
    %c5_177 = arith.constant 5 : index
    %358 = memref.load %arg6[%c5_177] : memref<98xf32, #tpu.memory_space<smem>>
    %c0_178 = arith.constant 0 : index
    %c0_179 = arith.constant 0 : index
    %c5_180 = arith.constant 5 : index
    %359 = vector.load %arg10[%c0_178, %c0_179, %c5_180] : memref<2x22x22xf32, #tpu.memory_space<vmem>>, vector<1x16x16xf32>
    %360 = vector.shape_cast %359 : vector<1x16x16xf32> to vector<16x16xf32>
    %361 = vector.broadcast %358 : f32 to vector<16x16xf32>
    %362 = arith.mulf %361, %360 : vector<16x16xf32>
    %363 = arith.addf %357, %362 : vector<16x16xf32>
    %c6_181 = arith.constant 6 : index
    %364 = memref.load %arg6[%c6_181] : memref<98xf32, #tpu.memory_space<smem>>
    %c0_182 = arith.constant 0 : index
    %c0_183 = arith.constant 0 : index
    %c6_184 = arith.constant 6 : index
    %365 = vector.load %arg10[%c0_182, %c0_183, %c6_184] : memref<2x22x22xf32, #tpu.memory_space<vmem>>, vector<1x16x16xf32>
    %366 = vector.shape_cast %365 : vector<1x16x16xf32> to vector<16x16xf32>
    %367 = vector.broadcast %364 : f32 to vector<16x16xf32>
    %368 = arith.mulf %367, %366 : vector<16x16xf32>
    %369 = arith.addf %363, %368 : vector<16x16xf32>
    %c7_185 = arith.constant 7 : index
    %370 = memref.load %arg6[%c7_185] : memref<98xf32, #tpu.memory_space<smem>>
    %c0_186 = arith.constant 0 : index
    %c1_187 = arith.constant 1 : index
    %c0_188 = arith.constant 0 : index
    %371 = vector.load %arg10[%c0_186, %c1_187, %c0_188] : memref<2x22x22xf32, #tpu.memory_space<vmem>>, vector<1x16x16xf32>
    %372 = vector.shape_cast %371 : vector<1x16x16xf32> to vector<16x16xf32>
    %373 = vector.broadcast %370 : f32 to vector<16x16xf32>
    %374 = arith.mulf %373, %372 : vector<16x16xf32>
    %375 = arith.addf %369, %374 : vector<16x16xf32>
    %c8_189 = arith.constant 8 : index
    %376 = memref.load %arg6[%c8_189] : memref<98xf32, #tpu.memory_space<smem>>
    %c0_190 = arith.constant 0 : index
    %c1_191 = arith.constant 1 : index
    %c1_192 = arith.constant 1 : index
    %377 = vector.load %arg10[%c0_190, %c1_191, %c1_192] : memref<2x22x22xf32, #tpu.memory_space<vmem>>, vector<1x16x16xf32>
    %378 = vector.shape_cast %377 : vector<1x16x16xf32> to vector<16x16xf32>
    %379 = vector.broadcast %376 : f32 to vector<16x16xf32>
    %380 = arith.mulf %379, %378 : vector<16x16xf32>
    %381 = arith.addf %375, %380 : vector<16x16xf32>
    %c9_193 = arith.constant 9 : index
    %382 = memref.load %arg6[%c9_193] : memref<98xf32, #tpu.memory_space<smem>>
    %c0_194 = arith.constant 0 : index
    %c1_195 = arith.constant 1 : index
    %c2_196 = arith.constant 2 : index
    %383 = vector.load %arg10[%c0_194, %c1_195, %c2_196] : memref<2x22x22xf32, #tpu.memory_space<vmem>>, vector<1x16x16xf32>
    %384 = vector.shape_cast %383 : vector<1x16x16xf32> to vector<16x16xf32>
    %385 = vector.broadcast %382 : f32 to vector<16x16xf32>
    %386 = arith.mulf %385, %384 : vector<16x16xf32>
    %387 = arith.addf %381, %386 : vector<16x16xf32>
    %c10_197 = arith.constant 10 : index
    %388 = memref.load %arg6[%c10_197] : memref<98xf32, #tpu.memory_space<smem>>
    %c0_198 = arith.constant 0 : index
    %c1_199 = arith.constant 1 : index
    %c3_200 = arith.constant 3 : index
    %389 = vector.load %arg10[%c0_198, %c1_199, %c3_200] : memref<2x22x22xf32, #tpu.memory_space<vmem>>, vector<1x16x16xf32>
    %390 = vector.shape_cast %389 : vector<1x16x16xf32> to vector<16x16xf32>
    %391 = vector.broadcast %388 : f32 to vector<16x16xf32>
    %392 = arith.mulf %391, %390 : vector<16x16xf32>
    %393 = arith.addf %387, %392 : vector<16x16xf32>
    %c11_201 = arith.constant 11 : index
    %394 = memref.load %arg6[%c11_201] : memref<98xf32, #tpu.memory_space<smem>>
    %c0_202 = arith.constant 0 : index
    %c1_203 = arith.constant 1 : index
    %c4_204 = arith.constant 4 : index
    %395 = vector.load %arg10[%c0_202, %c1_203, %c4_204] : memref<2x22x22xf32, #tpu.memory_space<vmem>>, vector<1x16x16xf32>
    %396 = vector.shape_cast %395 : vector<1x16x16xf32> to vector<16x16xf32>
    %397 = vector.broadcast %394 : f32 to vector<16x16xf32>
    %398 = arith.mulf %397, %396 : vector<16x16xf32>
    %399 = arith.addf %393, %398 : vector<16x16xf32>
    %c12_205 = arith.constant 12 : index
    %400 = memref.load %arg6[%c12_205] : memref<98xf32, #tpu.memory_space<smem>>
    %c0_206 = arith.constant 0 : index
    %c1_207 = arith.constant 1 : index
    %c5_208 = arith.constant 5 : index
    %401 = vector.load %arg10[%c0_206, %c1_207, %c5_208] : memref<2x22x22xf32, #tpu.memory_space<vmem>>, vector<1x16x16xf32>
    %402 = vector.shape_cast %401 : vector<1x16x16xf32> to vector<16x16xf32>
    %403 = vector.broadcast %400 : f32 to vector<16x16xf32>
    %404 = arith.mulf %403, %402 : vector<16x16xf32>
    %405 = arith.addf %399, %404 : vector<16x16xf32>
    %c13_209 = arith.constant 13 : index
    %406 = memref.load %arg6[%c13_209] : memref<98xf32, #tpu.memory_space<smem>>
    %c0_210 = arith.constant 0 : index
    %c1_211 = arith.constant 1 : index
    %c6_212 = arith.constant 6 : index
    %407 = vector.load %arg10[%c0_210, %c1_211, %c6_212] : memref<2x22x22xf32, #tpu.memory_space<vmem>>, vector<1x16x16xf32>
    %408 = vector.shape_cast %407 : vector<1x16x16xf32> to vector<16x16xf32>
    %409 = vector.broadcast %406 : f32 to vector<16x16xf32>
    %410 = arith.mulf %409, %408 : vector<16x16xf32>
    %411 = arith.addf %405, %410 : vector<16x16xf32>
    %c14_213 = arith.constant 14 : index
    %412 = memref.load %arg6[%c14_213] : memref<98xf32, #tpu.memory_space<smem>>
    %c0_214 = arith.constant 0 : index
    %c2_215 = arith.constant 2 : index
    %c0_216 = arith.constant 0 : index
    %413 = vector.load %arg10[%c0_214, %c2_215, %c0_216] : memref<2x22x22xf32, #tpu.memory_space<vmem>>, vector<1x16x16xf32>
    %414 = vector.shape_cast %413 : vector<1x16x16xf32> to vector<16x16xf32>
    %415 = vector.broadcast %412 : f32 to vector<16x16xf32>
    %416 = arith.mulf %415, %414 : vector<16x16xf32>
    %417 = arith.addf %411, %416 : vector<16x16xf32>
    %c15_217 = arith.constant 15 : index
    %418 = memref.load %arg6[%c15_217] : memref<98xf32, #tpu.memory_space<smem>>
    %c0_218 = arith.constant 0 : index
    %c2_219 = arith.constant 2 : index
    %c1_220 = arith.constant 1 : index
    %419 = vector.load %arg10[%c0_218, %c2_219, %c1_220] : memref<2x22x22xf32, #tpu.memory_space<vmem>>, vector<1x16x16xf32>
    %420 = vector.shape_cast %419 : vector<1x16x16xf32> to vector<16x16xf32>
    %421 = vector.broadcast %418 : f32 to vector<16x16xf32>
    %422 = arith.mulf %421, %420 : vector<16x16xf32>
    %423 = arith.addf %417, %422 : vector<16x16xf32>
    %c16_221 = arith.constant 16 : index
    %424 = memref.load %arg6[%c16_221] : memref<98xf32, #tpu.memory_space<smem>>
    %c0_222 = arith.constant 0 : index
    %c2_223 = arith.constant 2 : index
    %c2_224 = arith.constant 2 : index
    %425 = vector.load %arg10[%c0_222, %c2_223, %c2_224] : memref<2x22x22xf32, #tpu.memory_space<vmem>>, vector<1x16x16xf32>
    %426 = vector.shape_cast %425 : vector<1x16x16xf32> to vector<16x16xf32>
    %427 = vector.broadcast %424 : f32 to vector<16x16xf32>
    %428 = arith.mulf %427, %426 : vector<16x16xf32>
    %429 = arith.addf %423, %428 : vector<16x16xf32>
    %c17_225 = arith.constant 17 : index
    %430 = memref.load %arg6[%c17_225] : memref<98xf32, #tpu.memory_space<smem>>
    %c0_226 = arith.constant 0 : index
    %c2_227 = arith.constant 2 : index
    %c3_228 = arith.constant 3 : index
    %431 = vector.load %arg10[%c0_226, %c2_227, %c3_228] : memref<2x22x22xf32, #tpu.memory_space<vmem>>, vector<1x16x16xf32>
    %432 = vector.shape_cast %431 : vector<1x16x16xf32> to vector<16x16xf32>
    %433 = vector.broadcast %430 : f32 to vector<16x16xf32>
    %434 = arith.mulf %433, %432 : vector<16x16xf32>
    %435 = arith.addf %429, %434 : vector<16x16xf32>
    %c18_229 = arith.constant 18 : index
    %436 = memref.load %arg6[%c18_229] : memref<98xf32, #tpu.memory_space<smem>>
    %c0_230 = arith.constant 0 : index
    %c2_231 = arith.constant 2 : index
    %c4_232 = arith.constant 4 : index
    %437 = vector.load %arg10[%c0_230, %c2_231, %c4_232] : memref<2x22x22xf32, #tpu.memory_space<vmem>>, vector<1x16x16xf32>
    %438 = vector.shape_cast %437 : vector<1x16x16xf32> to vector<16x16xf32>
    %439 = vector.broadcast %436 : f32 to vector<16x16xf32>
    %440 = arith.mulf %439, %438 : vector<16x16xf32>
    %441 = arith.addf %435, %440 : vector<16x16xf32>
    %c19_233 = arith.constant 19 : index
    %442 = memref.load %arg6[%c19_233] : memref<98xf32, #tpu.memory_space<smem>>
    %c0_234 = arith.constant 0 : index
    %c2_235 = arith.constant 2 : index
    %c5_236 = arith.constant 5 : index
    %443 = vector.load %arg10[%c0_234, %c2_235, %c5_236] : memref<2x22x22xf32, #tpu.memory_space<vmem>>, vector<1x16x16xf32>
    %444 = vector.shape_cast %443 : vector<1x16x16xf32> to vector<16x16xf32>
    %445 = vector.broadcast %442 : f32 to vector<16x16xf32>
    %446 = arith.mulf %445, %444 : vector<16x16xf32>
    %447 = arith.addf %441, %446 : vector<16x16xf32>
    %c20_237 = arith.constant 20 : index
    %448 = memref.load %arg6[%c20_237] : memref<98xf32, #tpu.memory_space<smem>>
    %c0_238 = arith.constant 0 : index
    %c2_239 = arith.constant 2 : index
    %c6_240 = arith.constant 6 : index
    %449 = vector.load %arg10[%c0_238, %c2_239, %c6_240] : memref<2x22x22xf32, #tpu.memory_space<vmem>>, vector<1x16x16xf32>
    %450 = vector.shape_cast %449 : vector<1x16x16xf32> to vector<16x16xf32>
    %451 = vector.broadcast %448 : f32 to vector<16x16xf32>
    %452 = arith.mulf %451, %450 : vector<16x16xf32>
    %453 = arith.addf %447, %452 : vector<16x16xf32>
    %c21_241 = arith.constant 21 : index
    %454 = memref.load %arg6[%c21_241] : memref<98xf32, #tpu.memory_space<smem>>
    %c0_242 = arith.constant 0 : index
    %c3_243 = arith.constant 3 : index
    %c0_244 = arith.constant 0 : index
    %455 = vector.load %arg10[%c0_242, %c3_243, %c0_244] : memref<2x22x22xf32, #tpu.memory_space<vmem>>, vector<1x16x16xf32>
    %456 = vector.shape_cast %455 : vector<1x16x16xf32> to vector<16x16xf32>
    %457 = vector.broadcast %454 : f32 to vector<16x16xf32>
    %458 = arith.mulf %457, %456 : vector<16x16xf32>
    %459 = arith.addf %453, %458 : vector<16x16xf32>
    %c22_245 = arith.constant 22 : index
    %460 = memref.load %arg6[%c22_245] : memref<98xf32, #tpu.memory_space<smem>>
    %c0_246 = arith.constant 0 : index
    %c3_247 = arith.constant 3 : index
    %c1_248 = arith.constant 1 : index
    %461 = vector.load %arg10[%c0_246, %c3_247, %c1_248] : memref<2x22x22xf32, #tpu.memory_space<vmem>>, vector<1x16x16xf32>
    %462 = vector.shape_cast %461 : vector<1x16x16xf32> to vector<16x16xf32>
    %463 = vector.broadcast %460 : f32 to vector<16x16xf32>
    %464 = arith.mulf %463, %462 : vector<16x16xf32>
    %465 = arith.addf %459, %464 : vector<16x16xf32>
    %c23_249 = arith.constant 23 : index
    %466 = memref.load %arg6[%c23_249] : memref<98xf32, #tpu.memory_space<smem>>
    %c0_250 = arith.constant 0 : index
    %c3_251 = arith.constant 3 : index
    %c2_252 = arith.constant 2 : index
    %467 = vector.load %arg10[%c0_250, %c3_251, %c2_252] : memref<2x22x22xf32, #tpu.memory_space<vmem>>, vector<1x16x16xf32>
    %468 = vector.shape_cast %467 : vector<1x16x16xf32> to vector<16x16xf32>
    %469 = vector.broadcast %466 : f32 to vector<16x16xf32>
    %470 = arith.mulf %469, %468 : vector<16x16xf32>
    %471 = arith.addf %465, %470 : vector<16x16xf32>
    %c24_253 = arith.constant 24 : index
    %472 = memref.load %arg6[%c24_253] : memref<98xf32, #tpu.memory_space<smem>>
    %c0_254 = arith.constant 0 : index
    %c3_255 = arith.constant 3 : index
    %c3_256 = arith.constant 3 : index
    %473 = vector.load %arg10[%c0_254, %c3_255, %c3_256] : memref<2x22x22xf32, #tpu.memory_space<vmem>>, vector<1x16x16xf32>
    %474 = vector.shape_cast %473 : vector<1x16x16xf32> to vector<16x16xf32>
    %475 = vector.broadcast %472 : f32 to vector<16x16xf32>
    %476 = arith.mulf %475, %474 : vector<16x16xf32>
    %477 = arith.addf %471, %476 : vector<16x16xf32>
    %c25_257 = arith.constant 25 : index
    %478 = memref.load %arg6[%c25_257] : memref<98xf32, #tpu.memory_space<smem>>
    %c0_258 = arith.constant 0 : index
    %c3_259 = arith.constant 3 : index
    %c4_260 = arith.constant 4 : index
    %479 = vector.load %arg10[%c0_258, %c3_259, %c4_260] : memref<2x22x22xf32, #tpu.memory_space<vmem>>, vector<1x16x16xf32>
    %480 = vector.shape_cast %479 : vector<1x16x16xf32> to vector<16x16xf32>
    %481 = vector.broadcast %478 : f32 to vector<16x16xf32>
    %482 = arith.mulf %481, %480 : vector<16x16xf32>
    %483 = arith.addf %477, %482 : vector<16x16xf32>
    %c26_261 = arith.constant 26 : index
    %484 = memref.load %arg6[%c26_261] : memref<98xf32, #tpu.memory_space<smem>>
    %c0_262 = arith.constant 0 : index
    %c3_263 = arith.constant 3 : index
    %c5_264 = arith.constant 5 : index
    %485 = vector.load %arg10[%c0_262, %c3_263, %c5_264] : memref<2x22x22xf32, #tpu.memory_space<vmem>>, vector<1x16x16xf32>
    %486 = vector.shape_cast %485 : vector<1x16x16xf32> to vector<16x16xf32>
    %487 = vector.broadcast %484 : f32 to vector<16x16xf32>
    %488 = arith.mulf %487, %486 : vector<16x16xf32>
    %489 = arith.addf %483, %488 : vector<16x16xf32>
    %c27_265 = arith.constant 27 : index
    %490 = memref.load %arg6[%c27_265] : memref<98xf32, #tpu.memory_space<smem>>
    %c0_266 = arith.constant 0 : index
    %c3_267 = arith.constant 3 : index
    %c6_268 = arith.constant 6 : index
    %491 = vector.load %arg10[%c0_266, %c3_267, %c6_268] : memref<2x22x22xf32, #tpu.memory_space<vmem>>, vector<1x16x16xf32>
    %492 = vector.shape_cast %491 : vector<1x16x16xf32> to vector<16x16xf32>
    %493 = vector.broadcast %490 : f32 to vector<16x16xf32>
    %494 = arith.mulf %493, %492 : vector<16x16xf32>
    %495 = arith.addf %489, %494 : vector<16x16xf32>
    %c28_269 = arith.constant 28 : index
    %496 = memref.load %arg6[%c28_269] : memref<98xf32, #tpu.memory_space<smem>>
    %c0_270 = arith.constant 0 : index
    %c4_271 = arith.constant 4 : index
    %c0_272 = arith.constant 0 : index
    %497 = vector.load %arg10[%c0_270, %c4_271, %c0_272] : memref<2x22x22xf32, #tpu.memory_space<vmem>>, vector<1x16x16xf32>
    %498 = vector.shape_cast %497 : vector<1x16x16xf32> to vector<16x16xf32>
    %499 = vector.broadcast %496 : f32 to vector<16x16xf32>
    %500 = arith.mulf %499, %498 : vector<16x16xf32>
    %501 = arith.addf %495, %500 : vector<16x16xf32>
    %c29_273 = arith.constant 29 : index
    %502 = memref.load %arg6[%c29_273] : memref<98xf32, #tpu.memory_space<smem>>
    %c0_274 = arith.constant 0 : index
    %c4_275 = arith.constant 4 : index
    %c1_276 = arith.constant 1 : index
    %503 = vector.load %arg10[%c0_274, %c4_275, %c1_276] : memref<2x22x22xf32, #tpu.memory_space<vmem>>, vector<1x16x16xf32>
    %504 = vector.shape_cast %503 : vector<1x16x16xf32> to vector<16x16xf32>
    %505 = vector.broadcast %502 : f32 to vector<16x16xf32>
    %506 = arith.mulf %505, %504 : vector<16x16xf32>
    %507 = arith.addf %501, %506 : vector<16x16xf32>
    %c30_277 = arith.constant 30 : index
    %508 = memref.load %arg6[%c30_277] : memref<98xf32, #tpu.memory_space<smem>>
    %c0_278 = arith.constant 0 : index
    %c4_279 = arith.constant 4 : index
    %c2_280 = arith.constant 2 : index
    %509 = vector.load %arg10[%c0_278, %c4_279, %c2_280] : memref<2x22x22xf32, #tpu.memory_space<vmem>>, vector<1x16x16xf32>
    %510 = vector.shape_cast %509 : vector<1x16x16xf32> to vector<16x16xf32>
    %511 = vector.broadcast %508 : f32 to vector<16x16xf32>
    %512 = arith.mulf %511, %510 : vector<16x16xf32>
    %513 = arith.addf %507, %512 : vector<16x16xf32>
    %c31_281 = arith.constant 31 : index
    %514 = memref.load %arg6[%c31_281] : memref<98xf32, #tpu.memory_space<smem>>
    %c0_282 = arith.constant 0 : index
    %c4_283 = arith.constant 4 : index
    %c3_284 = arith.constant 3 : index
    %515 = vector.load %arg10[%c0_282, %c4_283, %c3_284] : memref<2x22x22xf32, #tpu.memory_space<vmem>>, vector<1x16x16xf32>
    %516 = vector.shape_cast %515 : vector<1x16x16xf32> to vector<16x16xf32>
    %517 = vector.broadcast %514 : f32 to vector<16x16xf32>
    %518 = arith.mulf %517, %516 : vector<16x16xf32>
    %519 = arith.addf %513, %518 : vector<16x16xf32>
    %c32_285 = arith.constant 32 : index
    %520 = memref.load %arg6[%c32_285] : memref<98xf32, #tpu.memory_space<smem>>
    %c0_286 = arith.constant 0 : index
    %c4_287 = arith.constant 4 : index
    %c4_288 = arith.constant 4 : index
    %521 = vector.load %arg10[%c0_286, %c4_287, %c4_288] : memref<2x22x22xf32, #tpu.memory_space<vmem>>, vector<1x16x16xf32>
    %522 = vector.shape_cast %521 : vector<1x16x16xf32> to vector<16x16xf32>
    %523 = vector.broadcast %520 : f32 to vector<16x16xf32>
    %524 = arith.mulf %523, %522 : vector<16x16xf32>
    %525 = arith.addf %519, %524 : vector<16x16xf32>
    %c33_289 = arith.constant 33 : index
    %526 = memref.load %arg6[%c33_289] : memref<98xf32, #tpu.memory_space<smem>>
    %c0_290 = arith.constant 0 : index
    %c4_291 = arith.constant 4 : index
    %c5_292 = arith.constant 5 : index
    %527 = vector.load %arg10[%c0_290, %c4_291, %c5_292] : memref<2x22x22xf32, #tpu.memory_space<vmem>>, vector<1x16x16xf32>
    %528 = vector.shape_cast %527 : vector<1x16x16xf32> to vector<16x16xf32>
    %529 = vector.broadcast %526 : f32 to vector<16x16xf32>
    %530 = arith.mulf %529, %528 : vector<16x16xf32>
    %531 = arith.addf %525, %530 : vector<16x16xf32>
    %c34_293 = arith.constant 34 : index
    %532 = memref.load %arg6[%c34_293] : memref<98xf32, #tpu.memory_space<smem>>
    %c0_294 = arith.constant 0 : index
    %c4_295 = arith.constant 4 : index
    %c6_296 = arith.constant 6 : index
    %533 = vector.load %arg10[%c0_294, %c4_295, %c6_296] : memref<2x22x22xf32, #tpu.memory_space<vmem>>, vector<1x16x16xf32>
    %534 = vector.shape_cast %533 : vector<1x16x16xf32> to vector<16x16xf32>
    %535 = vector.broadcast %532 : f32 to vector<16x16xf32>
    %536 = arith.mulf %535, %534 : vector<16x16xf32>
    %537 = arith.addf %531, %536 : vector<16x16xf32>
    %c35_297 = arith.constant 35 : index
    %538 = memref.load %arg6[%c35_297] : memref<98xf32, #tpu.memory_space<smem>>
    %c0_298 = arith.constant 0 : index
    %c5_299 = arith.constant 5 : index
    %c0_300 = arith.constant 0 : index
    %539 = vector.load %arg10[%c0_298, %c5_299, %c0_300] : memref<2x22x22xf32, #tpu.memory_space<vmem>>, vector<1x16x16xf32>
    %540 = vector.shape_cast %539 : vector<1x16x16xf32> to vector<16x16xf32>
    %541 = vector.broadcast %538 : f32 to vector<16x16xf32>
    %542 = arith.mulf %541, %540 : vector<16x16xf32>
    %543 = arith.addf %537, %542 : vector<16x16xf32>
    %c36_301 = arith.constant 36 : index
    %544 = memref.load %arg6[%c36_301] : memref<98xf32, #tpu.memory_space<smem>>
    %c0_302 = arith.constant 0 : index
    %c5_303 = arith.constant 5 : index
    %c1_304 = arith.constant 1 : index
    %545 = vector.load %arg10[%c0_302, %c5_303, %c1_304] : memref<2x22x22xf32, #tpu.memory_space<vmem>>, vector<1x16x16xf32>
    %546 = vector.shape_cast %545 : vector<1x16x16xf32> to vector<16x16xf32>
    %547 = vector.broadcast %544 : f32 to vector<16x16xf32>
    %548 = arith.mulf %547, %546 : vector<16x16xf32>
    %549 = arith.addf %543, %548 : vector<16x16xf32>
    %c37_305 = arith.constant 37 : index
    %550 = memref.load %arg6[%c37_305] : memref<98xf32, #tpu.memory_space<smem>>
    %c0_306 = arith.constant 0 : index
    %c5_307 = arith.constant 5 : index
    %c2_308 = arith.constant 2 : index
    %551 = vector.load %arg10[%c0_306, %c5_307, %c2_308] : memref<2x22x22xf32, #tpu.memory_space<vmem>>, vector<1x16x16xf32>
    %552 = vector.shape_cast %551 : vector<1x16x16xf32> to vector<16x16xf32>
    %553 = vector.broadcast %550 : f32 to vector<16x16xf32>
    %554 = arith.mulf %553, %552 : vector<16x16xf32>
    %555 = arith.addf %549, %554 : vector<16x16xf32>
    %c38_309 = arith.constant 38 : index
    %556 = memref.load %arg6[%c38_309] : memref<98xf32, #tpu.memory_space<smem>>
    %c0_310 = arith.constant 0 : index
    %c5_311 = arith.constant 5 : index
    %c3_312 = arith.constant 3 : index
    %557 = vector.load %arg10[%c0_310, %c5_311, %c3_312] : memref<2x22x22xf32, #tpu.memory_space<vmem>>, vector<1x16x16xf32>
    %558 = vector.shape_cast %557 : vector<1x16x16xf32> to vector<16x16xf32>
    %559 = vector.broadcast %556 : f32 to vector<16x16xf32>
    %560 = arith.mulf %559, %558 : vector<16x16xf32>
    %561 = arith.addf %555, %560 : vector<16x16xf32>
    %c39_313 = arith.constant 39 : index
    %562 = memref.load %arg6[%c39_313] : memref<98xf32, #tpu.memory_space<smem>>
    %c0_314 = arith.constant 0 : index
    %c5_315 = arith.constant 5 : index
    %c4_316 = arith.constant 4 : index
    %563 = vector.load %arg10[%c0_314, %c5_315, %c4_316] : memref<2x22x22xf32, #tpu.memory_space<vmem>>, vector<1x16x16xf32>
    %564 = vector.shape_cast %563 : vector<1x16x16xf32> to vector<16x16xf32>
    %565 = vector.broadcast %562 : f32 to vector<16x16xf32>
    %566 = arith.mulf %565, %564 : vector<16x16xf32>
    %567 = arith.addf %561, %566 : vector<16x16xf32>
    %c40_317 = arith.constant 40 : index
    %568 = memref.load %arg6[%c40_317] : memref<98xf32, #tpu.memory_space<smem>>
    %c0_318 = arith.constant 0 : index
    %c5_319 = arith.constant 5 : index
    %c5_320 = arith.constant 5 : index
    %569 = vector.load %arg10[%c0_318, %c5_319, %c5_320] : memref<2x22x22xf32, #tpu.memory_space<vmem>>, vector<1x16x16xf32>
    %570 = vector.shape_cast %569 : vector<1x16x16xf32> to vector<16x16xf32>
    %571 = vector.broadcast %568 : f32 to vector<16x16xf32>
    %572 = arith.mulf %571, %570 : vector<16x16xf32>
    %573 = arith.addf %567, %572 : vector<16x16xf32>
    %c41_321 = arith.constant 41 : index
    %574 = memref.load %arg6[%c41_321] : memref<98xf32, #tpu.memory_space<smem>>
    %c0_322 = arith.constant 0 : index
    %c5_323 = arith.constant 5 : index
    %c6_324 = arith.constant 6 : index
    %575 = vector.load %arg10[%c0_322, %c5_323, %c6_324] : memref<2x22x22xf32, #tpu.memory_space<vmem>>, vector<1x16x16xf32>
    %576 = vector.shape_cast %575 : vector<1x16x16xf32> to vector<16x16xf32>
    %577 = vector.broadcast %574 : f32 to vector<16x16xf32>
    %578 = arith.mulf %577, %576 : vector<16x16xf32>
    %579 = arith.addf %573, %578 : vector<16x16xf32>
    %c42_325 = arith.constant 42 : index
    %580 = memref.load %arg6[%c42_325] : memref<98xf32, #tpu.memory_space<smem>>
    %c0_326 = arith.constant 0 : index
    %c6_327 = arith.constant 6 : index
    %c0_328 = arith.constant 0 : index
    %581 = vector.load %arg10[%c0_326, %c6_327, %c0_328] : memref<2x22x22xf32, #tpu.memory_space<vmem>>, vector<1x16x16xf32>
    %582 = vector.shape_cast %581 : vector<1x16x16xf32> to vector<16x16xf32>
    %583 = vector.broadcast %580 : f32 to vector<16x16xf32>
    %584 = arith.mulf %583, %582 : vector<16x16xf32>
    %585 = arith.addf %579, %584 : vector<16x16xf32>
    %c43_329 = arith.constant 43 : index
    %586 = memref.load %arg6[%c43_329] : memref<98xf32, #tpu.memory_space<smem>>
    %c0_330 = arith.constant 0 : index
    %c6_331 = arith.constant 6 : index
    %c1_332 = arith.constant 1 : index
    %587 = vector.load %arg10[%c0_330, %c6_331, %c1_332] : memref<2x22x22xf32, #tpu.memory_space<vmem>>, vector<1x16x16xf32>
    %588 = vector.shape_cast %587 : vector<1x16x16xf32> to vector<16x16xf32>
    %589 = vector.broadcast %586 : f32 to vector<16x16xf32>
    %590 = arith.mulf %589, %588 : vector<16x16xf32>
    %591 = arith.addf %585, %590 : vector<16x16xf32>
    %c44_333 = arith.constant 44 : index
    %592 = memref.load %arg6[%c44_333] : memref<98xf32, #tpu.memory_space<smem>>
    %c0_334 = arith.constant 0 : index
    %c6_335 = arith.constant 6 : index
    %c2_336 = arith.constant 2 : index
    %593 = vector.load %arg10[%c0_334, %c6_335, %c2_336] : memref<2x22x22xf32, #tpu.memory_space<vmem>>, vector<1x16x16xf32>
    %594 = vector.shape_cast %593 : vector<1x16x16xf32> to vector<16x16xf32>
    %595 = vector.broadcast %592 : f32 to vector<16x16xf32>
    %596 = arith.mulf %595, %594 : vector<16x16xf32>
    %597 = arith.addf %591, %596 : vector<16x16xf32>
    %c45_337 = arith.constant 45 : index
    %598 = memref.load %arg6[%c45_337] : memref<98xf32, #tpu.memory_space<smem>>
    %c0_338 = arith.constant 0 : index
    %c6_339 = arith.constant 6 : index
    %c3_340 = arith.constant 3 : index
    %599 = vector.load %arg10[%c0_338, %c6_339, %c3_340] : memref<2x22x22xf32, #tpu.memory_space<vmem>>, vector<1x16x16xf32>
    %600 = vector.shape_cast %599 : vector<1x16x16xf32> to vector<16x16xf32>
    %601 = vector.broadcast %598 : f32 to vector<16x16xf32>
    %602 = arith.mulf %601, %600 : vector<16x16xf32>
    %603 = arith.addf %597, %602 : vector<16x16xf32>
    %c46_341 = arith.constant 46 : index
    %604 = memref.load %arg6[%c46_341] : memref<98xf32, #tpu.memory_space<smem>>
    %c0_342 = arith.constant 0 : index
    %c6_343 = arith.constant 6 : index
    %c4_344 = arith.constant 4 : index
    %605 = vector.load %arg10[%c0_342, %c6_343, %c4_344] : memref<2x22x22xf32, #tpu.memory_space<vmem>>, vector<1x16x16xf32>
    %606 = vector.shape_cast %605 : vector<1x16x16xf32> to vector<16x16xf32>
    %607 = vector.broadcast %604 : f32 to vector<16x16xf32>
    %608 = arith.mulf %607, %606 : vector<16x16xf32>
    %609 = arith.addf %603, %608 : vector<16x16xf32>
    %c47_345 = arith.constant 47 : index
    %610 = memref.load %arg6[%c47_345] : memref<98xf32, #tpu.memory_space<smem>>
    %c0_346 = arith.constant 0 : index
    %c6_347 = arith.constant 6 : index
    %c5_348 = arith.constant 5 : index
    %611 = vector.load %arg10[%c0_346, %c6_347, %c5_348] : memref<2x22x22xf32, #tpu.memory_space<vmem>>, vector<1x16x16xf32>
    %612 = vector.shape_cast %611 : vector<1x16x16xf32> to vector<16x16xf32>
    %613 = vector.broadcast %610 : f32 to vector<16x16xf32>
    %614 = arith.mulf %613, %612 : vector<16x16xf32>
    %615 = arith.addf %609, %614 : vector<16x16xf32>
    %c48_349 = arith.constant 48 : index
    %616 = memref.load %arg6[%c48_349] : memref<98xf32, #tpu.memory_space<smem>>
    %c0_350 = arith.constant 0 : index
    %c6_351 = arith.constant 6 : index
    %c6_352 = arith.constant 6 : index
    %617 = vector.load %arg10[%c0_350, %c6_351, %c6_352] : memref<2x22x22xf32, #tpu.memory_space<vmem>>, vector<1x16x16xf32>
    %618 = vector.shape_cast %617 : vector<1x16x16xf32> to vector<16x16xf32>
    %619 = vector.broadcast %616 : f32 to vector<16x16xf32>
    %620 = arith.mulf %619, %618 : vector<16x16xf32>
    %621 = arith.addf %615, %620 : vector<16x16xf32>
    %c49_353 = arith.constant 49 : index
    %622 = memref.load %arg6[%c49_353] : memref<98xf32, #tpu.memory_space<smem>>
    %c1_354 = arith.constant 1 : index
    %c0_355 = arith.constant 0 : index
    %c0_356 = arith.constant 0 : index
    %623 = vector.load %arg10[%c1_354, %c0_355, %c0_356] : memref<2x22x22xf32, #tpu.memory_space<vmem>>, vector<1x16x16xf32>
    %624 = vector.shape_cast %623 : vector<1x16x16xf32> to vector<16x16xf32>
    %625 = vector.broadcast %622 : f32 to vector<16x16xf32>
    %626 = arith.mulf %625, %624 : vector<16x16xf32>
    %627 = arith.addf %621, %626 : vector<16x16xf32>
    %c50 = arith.constant 50 : index
    %628 = memref.load %arg6[%c50] : memref<98xf32, #tpu.memory_space<smem>>
    %c1_357 = arith.constant 1 : index
    %c0_358 = arith.constant 0 : index
    %c1_359 = arith.constant 1 : index
    %629 = vector.load %arg10[%c1_357, %c0_358, %c1_359] : memref<2x22x22xf32, #tpu.memory_space<vmem>>, vector<1x16x16xf32>
    %630 = vector.shape_cast %629 : vector<1x16x16xf32> to vector<16x16xf32>
    %631 = vector.broadcast %628 : f32 to vector<16x16xf32>
    %632 = arith.mulf %631, %630 : vector<16x16xf32>
    %633 = arith.addf %627, %632 : vector<16x16xf32>
    %c51 = arith.constant 51 : index
    %634 = memref.load %arg6[%c51] : memref<98xf32, #tpu.memory_space<smem>>
    %c1_360 = arith.constant 1 : index
    %c0_361 = arith.constant 0 : index
    %c2_362 = arith.constant 2 : index
    %635 = vector.load %arg10[%c1_360, %c0_361, %c2_362] : memref<2x22x22xf32, #tpu.memory_space<vmem>>, vector<1x16x16xf32>
    %636 = vector.shape_cast %635 : vector<1x16x16xf32> to vector<16x16xf32>
    %637 = vector.broadcast %634 : f32 to vector<16x16xf32>
    %638 = arith.mulf %637, %636 : vector<16x16xf32>
    %639 = arith.addf %633, %638 : vector<16x16xf32>
    %c52 = arith.constant 52 : index
    %640 = memref.load %arg6[%c52] : memref<98xf32, #tpu.memory_space<smem>>
    %c1_363 = arith.constant 1 : index
    %c0_364 = arith.constant 0 : index
    %c3_365 = arith.constant 3 : index
    %641 = vector.load %arg10[%c1_363, %c0_364, %c3_365] : memref<2x22x22xf32, #tpu.memory_space<vmem>>, vector<1x16x16xf32>
    %642 = vector.shape_cast %641 : vector<1x16x16xf32> to vector<16x16xf32>
    %643 = vector.broadcast %640 : f32 to vector<16x16xf32>
    %644 = arith.mulf %643, %642 : vector<16x16xf32>
    %645 = arith.addf %639, %644 : vector<16x16xf32>
    %c53 = arith.constant 53 : index
    %646 = memref.load %arg6[%c53] : memref<98xf32, #tpu.memory_space<smem>>
    %c1_366 = arith.constant 1 : index
    %c0_367 = arith.constant 0 : index
    %c4_368 = arith.constant 4 : index
    %647 = vector.load %arg10[%c1_366, %c0_367, %c4_368] : memref<2x22x22xf32, #tpu.memory_space<vmem>>, vector<1x16x16xf32>
    %648 = vector.shape_cast %647 : vector<1x16x16xf32> to vector<16x16xf32>
    %649 = vector.broadcast %646 : f32 to vector<16x16xf32>
    %650 = arith.mulf %649, %648 : vector<16x16xf32>
    %651 = arith.addf %645, %650 : vector<16x16xf32>
    %c54 = arith.constant 54 : index
    %652 = memref.load %arg6[%c54] : memref<98xf32, #tpu.memory_space<smem>>
    %c1_369 = arith.constant 1 : index
    %c0_370 = arith.constant 0 : index
    %c5_371 = arith.constant 5 : index
    %653 = vector.load %arg10[%c1_369, %c0_370, %c5_371] : memref<2x22x22xf32, #tpu.memory_space<vmem>>, vector<1x16x16xf32>
    %654 = vector.shape_cast %653 : vector<1x16x16xf32> to vector<16x16xf32>
    %655 = vector.broadcast %652 : f32 to vector<16x16xf32>
    %656 = arith.mulf %655, %654 : vector<16x16xf32>
    %657 = arith.addf %651, %656 : vector<16x16xf32>
    %c55 = arith.constant 55 : index
    %658 = memref.load %arg6[%c55] : memref<98xf32, #tpu.memory_space<smem>>
    %c1_372 = arith.constant 1 : index
    %c0_373 = arith.constant 0 : index
    %c6_374 = arith.constant 6 : index
    %659 = vector.load %arg10[%c1_372, %c0_373, %c6_374] : memref<2x22x22xf32, #tpu.memory_space<vmem>>, vector<1x16x16xf32>
    %660 = vector.shape_cast %659 : vector<1x16x16xf32> to vector<16x16xf32>
    %661 = vector.broadcast %658 : f32 to vector<16x16xf32>
    %662 = arith.mulf %661, %660 : vector<16x16xf32>
    %663 = arith.addf %657, %662 : vector<16x16xf32>
    %c56 = arith.constant 56 : index
    %664 = memref.load %arg6[%c56] : memref<98xf32, #tpu.memory_space<smem>>
    %c1_375 = arith.constant 1 : index
    %c1_376 = arith.constant 1 : index
    %c0_377 = arith.constant 0 : index
    %665 = vector.load %arg10[%c1_375, %c1_376, %c0_377] : memref<2x22x22xf32, #tpu.memory_space<vmem>>, vector<1x16x16xf32>
    %666 = vector.shape_cast %665 : vector<1x16x16xf32> to vector<16x16xf32>
    %667 = vector.broadcast %664 : f32 to vector<16x16xf32>
    %668 = arith.mulf %667, %666 : vector<16x16xf32>
    %669 = arith.addf %663, %668 : vector<16x16xf32>
    %c57 = arith.constant 57 : index
    %670 = memref.load %arg6[%c57] : memref<98xf32, #tpu.memory_space<smem>>
    %c1_378 = arith.constant 1 : index
    %c1_379 = arith.constant 1 : index
    %c1_380 = arith.constant 1 : index
    %671 = vector.load %arg10[%c1_378, %c1_379, %c1_380] : memref<2x22x22xf32, #tpu.memory_space<vmem>>, vector<1x16x16xf32>
    %672 = vector.shape_cast %671 : vector<1x16x16xf32> to vector<16x16xf32>
    %673 = vector.broadcast %670 : f32 to vector<16x16xf32>
    %674 = arith.mulf %673, %672 : vector<16x16xf32>
    %675 = arith.addf %669, %674 : vector<16x16xf32>
    %c58 = arith.constant 58 : index
    %676 = memref.load %arg6[%c58] : memref<98xf32, #tpu.memory_space<smem>>
    %c1_381 = arith.constant 1 : index
    %c1_382 = arith.constant 1 : index
    %c2_383 = arith.constant 2 : index
    %677 = vector.load %arg10[%c1_381, %c1_382, %c2_383] : memref<2x22x22xf32, #tpu.memory_space<vmem>>, vector<1x16x16xf32>
    %678 = vector.shape_cast %677 : vector<1x16x16xf32> to vector<16x16xf32>
    %679 = vector.broadcast %676 : f32 to vector<16x16xf32>
    %680 = arith.mulf %679, %678 : vector<16x16xf32>
    %681 = arith.addf %675, %680 : vector<16x16xf32>
    %c59 = arith.constant 59 : index
    %682 = memref.load %arg6[%c59] : memref<98xf32, #tpu.memory_space<smem>>
    %c1_384 = arith.constant 1 : index
    %c1_385 = arith.constant 1 : index
    %c3_386 = arith.constant 3 : index
    %683 = vector.load %arg10[%c1_384, %c1_385, %c3_386] : memref<2x22x22xf32, #tpu.memory_space<vmem>>, vector<1x16x16xf32>
    %684 = vector.shape_cast %683 : vector<1x16x16xf32> to vector<16x16xf32>
    %685 = vector.broadcast %682 : f32 to vector<16x16xf32>
    %686 = arith.mulf %685, %684 : vector<16x16xf32>
    %687 = arith.addf %681, %686 : vector<16x16xf32>
    %c60 = arith.constant 60 : index
    %688 = memref.load %arg6[%c60] : memref<98xf32, #tpu.memory_space<smem>>
    %c1_387 = arith.constant 1 : index
    %c1_388 = arith.constant 1 : index
    %c4_389 = arith.constant 4 : index
    %689 = vector.load %arg10[%c1_387, %c1_388, %c4_389] : memref<2x22x22xf32, #tpu.memory_space<vmem>>, vector<1x16x16xf32>
    %690 = vector.shape_cast %689 : vector<1x16x16xf32> to vector<16x16xf32>
    %691 = vector.broadcast %688 : f32 to vector<16x16xf32>
    %692 = arith.mulf %691, %690 : vector<16x16xf32>
    %693 = arith.addf %687, %692 : vector<16x16xf32>
    %c61 = arith.constant 61 : index
    %694 = memref.load %arg6[%c61] : memref<98xf32, #tpu.memory_space<smem>>
    %c1_390 = arith.constant 1 : index
    %c1_391 = arith.constant 1 : index
    %c5_392 = arith.constant 5 : index
    %695 = vector.load %arg10[%c1_390, %c1_391, %c5_392] : memref<2x22x22xf32, #tpu.memory_space<vmem>>, vector<1x16x16xf32>
    %696 = vector.shape_cast %695 : vector<1x16x16xf32> to vector<16x16xf32>
    %697 = vector.broadcast %694 : f32 to vector<16x16xf32>
    %698 = arith.mulf %697, %696 : vector<16x16xf32>
    %699 = arith.addf %693, %698 : vector<16x16xf32>
    %c62 = arith.constant 62 : index
    %700 = memref.load %arg6[%c62] : memref<98xf32, #tpu.memory_space<smem>>
    %c1_393 = arith.constant 1 : index
    %c1_394 = arith.constant 1 : index
    %c6_395 = arith.constant 6 : index
    %701 = vector.load %arg10[%c1_393, %c1_394, %c6_395] : memref<2x22x22xf32, #tpu.memory_space<vmem>>, vector<1x16x16xf32>
    %702 = vector.shape_cast %701 : vector<1x16x16xf32> to vector<16x16xf32>
    %703 = vector.broadcast %700 : f32 to vector<16x16xf32>
    %704 = arith.mulf %703, %702 : vector<16x16xf32>
    %705 = arith.addf %699, %704 : vector<16x16xf32>
    %c63 = arith.constant 63 : index
    %706 = memref.load %arg6[%c63] : memref<98xf32, #tpu.memory_space<smem>>
    %c1_396 = arith.constant 1 : index
    %c2_397 = arith.constant 2 : index
    %c0_398 = arith.constant 0 : index
    %707 = vector.load %arg10[%c1_396, %c2_397, %c0_398] : memref<2x22x22xf32, #tpu.memory_space<vmem>>, vector<1x16x16xf32>
    %708 = vector.shape_cast %707 : vector<1x16x16xf32> to vector<16x16xf32>
    %709 = vector.broadcast %706 : f32 to vector<16x16xf32>
    %710 = arith.mulf %709, %708 : vector<16x16xf32>
    %711 = arith.addf %705, %710 : vector<16x16xf32>
    %c64 = arith.constant 64 : index
    %712 = memref.load %arg6[%c64] : memref<98xf32, #tpu.memory_space<smem>>
    %c1_399 = arith.constant 1 : index
    %c2_400 = arith.constant 2 : index
    %c1_401 = arith.constant 1 : index
    %713 = vector.load %arg10[%c1_399, %c2_400, %c1_401] : memref<2x22x22xf32, #tpu.memory_space<vmem>>, vector<1x16x16xf32>
    %714 = vector.shape_cast %713 : vector<1x16x16xf32> to vector<16x16xf32>
    %715 = vector.broadcast %712 : f32 to vector<16x16xf32>
    %716 = arith.mulf %715, %714 : vector<16x16xf32>
    %717 = arith.addf %711, %716 : vector<16x16xf32>
    %c65 = arith.constant 65 : index
    %718 = memref.load %arg6[%c65] : memref<98xf32, #tpu.memory_space<smem>>
    %c1_402 = arith.constant 1 : index
    %c2_403 = arith.constant 2 : index
    %c2_404 = arith.constant 2 : index
    %719 = vector.load %arg10[%c1_402, %c2_403, %c2_404] : memref<2x22x22xf32, #tpu.memory_space<vmem>>, vector<1x16x16xf32>
    %720 = vector.shape_cast %719 : vector<1x16x16xf32> to vector<16x16xf32>
    %721 = vector.broadcast %718 : f32 to vector<16x16xf32>
    %722 = arith.mulf %721, %720 : vector<16x16xf32>
    %723 = arith.addf %717, %722 : vector<16x16xf32>
    %c66 = arith.constant 66 : index
    %724 = memref.load %arg6[%c66] : memref<98xf32, #tpu.memory_space<smem>>
    %c1_405 = arith.constant 1 : index
    %c2_406 = arith.constant 2 : index
    %c3_407 = arith.constant 3 : index
    %725 = vector.load %arg10[%c1_405, %c2_406, %c3_407] : memref<2x22x22xf32, #tpu.memory_space<vmem>>, vector<1x16x16xf32>
    %726 = vector.shape_cast %725 : vector<1x16x16xf32> to vector<16x16xf32>
    %727 = vector.broadcast %724 : f32 to vector<16x16xf32>
    %728 = arith.mulf %727, %726 : vector<16x16xf32>
    %729 = arith.addf %723, %728 : vector<16x16xf32>
    %c67 = arith.constant 67 : index
    %730 = memref.load %arg6[%c67] : memref<98xf32, #tpu.memory_space<smem>>
    %c1_408 = arith.constant 1 : index
    %c2_409 = arith.constant 2 : index
    %c4_410 = arith.constant 4 : index
    %731 = vector.load %arg10[%c1_408, %c2_409, %c4_410] : memref<2x22x22xf32, #tpu.memory_space<vmem>>, vector<1x16x16xf32>
    %732 = vector.shape_cast %731 : vector<1x16x16xf32> to vector<16x16xf32>
    %733 = vector.broadcast %730 : f32 to vector<16x16xf32>
    %734 = arith.mulf %733, %732 : vector<16x16xf32>
    %735 = arith.addf %729, %734 : vector<16x16xf32>
    %c68 = arith.constant 68 : index
    %736 = memref.load %arg6[%c68] : memref<98xf32, #tpu.memory_space<smem>>
    %c1_411 = arith.constant 1 : index
    %c2_412 = arith.constant 2 : index
    %c5_413 = arith.constant 5 : index
    %737 = vector.load %arg10[%c1_411, %c2_412, %c5_413] : memref<2x22x22xf32, #tpu.memory_space<vmem>>, vector<1x16x16xf32>
    %738 = vector.shape_cast %737 : vector<1x16x16xf32> to vector<16x16xf32>
    %739 = vector.broadcast %736 : f32 to vector<16x16xf32>
    %740 = arith.mulf %739, %738 : vector<16x16xf32>
    %741 = arith.addf %735, %740 : vector<16x16xf32>
    %c69 = arith.constant 69 : index
    %742 = memref.load %arg6[%c69] : memref<98xf32, #tpu.memory_space<smem>>
    %c1_414 = arith.constant 1 : index
    %c2_415 = arith.constant 2 : index
    %c6_416 = arith.constant 6 : index
    %743 = vector.load %arg10[%c1_414, %c2_415, %c6_416] : memref<2x22x22xf32, #tpu.memory_space<vmem>>, vector<1x16x16xf32>
    %744 = vector.shape_cast %743 : vector<1x16x16xf32> to vector<16x16xf32>
    %745 = vector.broadcast %742 : f32 to vector<16x16xf32>
    %746 = arith.mulf %745, %744 : vector<16x16xf32>
    %747 = arith.addf %741, %746 : vector<16x16xf32>
    %c70 = arith.constant 70 : index
    %748 = memref.load %arg6[%c70] : memref<98xf32, #tpu.memory_space<smem>>
    %c1_417 = arith.constant 1 : index
    %c3_418 = arith.constant 3 : index
    %c0_419 = arith.constant 0 : index
    %749 = vector.load %arg10[%c1_417, %c3_418, %c0_419] : memref<2x22x22xf32, #tpu.memory_space<vmem>>, vector<1x16x16xf32>
    %750 = vector.shape_cast %749 : vector<1x16x16xf32> to vector<16x16xf32>
    %751 = vector.broadcast %748 : f32 to vector<16x16xf32>
    %752 = arith.mulf %751, %750 : vector<16x16xf32>
    %753 = arith.addf %747, %752 : vector<16x16xf32>
    %c71 = arith.constant 71 : index
    %754 = memref.load %arg6[%c71] : memref<98xf32, #tpu.memory_space<smem>>
    %c1_420 = arith.constant 1 : index
    %c3_421 = arith.constant 3 : index
    %c1_422 = arith.constant 1 : index
    %755 = vector.load %arg10[%c1_420, %c3_421, %c1_422] : memref<2x22x22xf32, #tpu.memory_space<vmem>>, vector<1x16x16xf32>
    %756 = vector.shape_cast %755 : vector<1x16x16xf32> to vector<16x16xf32>
    %757 = vector.broadcast %754 : f32 to vector<16x16xf32>
    %758 = arith.mulf %757, %756 : vector<16x16xf32>
    %759 = arith.addf %753, %758 : vector<16x16xf32>
    %c72 = arith.constant 72 : index
    %760 = memref.load %arg6[%c72] : memref<98xf32, #tpu.memory_space<smem>>
    %c1_423 = arith.constant 1 : index
    %c3_424 = arith.constant 3 : index
    %c2_425 = arith.constant 2 : index
    %761 = vector.load %arg10[%c1_423, %c3_424, %c2_425] : memref<2x22x22xf32, #tpu.memory_space<vmem>>, vector<1x16x16xf32>
    %762 = vector.shape_cast %761 : vector<1x16x16xf32> to vector<16x16xf32>
    %763 = vector.broadcast %760 : f32 to vector<16x16xf32>
    %764 = arith.mulf %763, %762 : vector<16x16xf32>
    %765 = arith.addf %759, %764 : vector<16x16xf32>
    %c73 = arith.constant 73 : index
    %766 = memref.load %arg6[%c73] : memref<98xf32, #tpu.memory_space<smem>>
    %c1_426 = arith.constant 1 : index
    %c3_427 = arith.constant 3 : index
    %c3_428 = arith.constant 3 : index
    %767 = vector.load %arg10[%c1_426, %c3_427, %c3_428] : memref<2x22x22xf32, #tpu.memory_space<vmem>>, vector<1x16x16xf32>
    %768 = vector.shape_cast %767 : vector<1x16x16xf32> to vector<16x16xf32>
    %769 = vector.broadcast %766 : f32 to vector<16x16xf32>
    %770 = arith.mulf %769, %768 : vector<16x16xf32>
    %771 = arith.addf %765, %770 : vector<16x16xf32>
    %c74 = arith.constant 74 : index
    %772 = memref.load %arg6[%c74] : memref<98xf32, #tpu.memory_space<smem>>
    %c1_429 = arith.constant 1 : index
    %c3_430 = arith.constant 3 : index
    %c4_431 = arith.constant 4 : index
    %773 = vector.load %arg10[%c1_429, %c3_430, %c4_431] : memref<2x22x22xf32, #tpu.memory_space<vmem>>, vector<1x16x16xf32>
    %774 = vector.shape_cast %773 : vector<1x16x16xf32> to vector<16x16xf32>
    %775 = vector.broadcast %772 : f32 to vector<16x16xf32>
    %776 = arith.mulf %775, %774 : vector<16x16xf32>
    %777 = arith.addf %771, %776 : vector<16x16xf32>
    %c75 = arith.constant 75 : index
    %778 = memref.load %arg6[%c75] : memref<98xf32, #tpu.memory_space<smem>>
    %c1_432 = arith.constant 1 : index
    %c3_433 = arith.constant 3 : index
    %c5_434 = arith.constant 5 : index
    %779 = vector.load %arg10[%c1_432, %c3_433, %c5_434] : memref<2x22x22xf32, #tpu.memory_space<vmem>>, vector<1x16x16xf32>
    %780 = vector.shape_cast %779 : vector<1x16x16xf32> to vector<16x16xf32>
    %781 = vector.broadcast %778 : f32 to vector<16x16xf32>
    %782 = arith.mulf %781, %780 : vector<16x16xf32>
    %783 = arith.addf %777, %782 : vector<16x16xf32>
    %c76 = arith.constant 76 : index
    %784 = memref.load %arg6[%c76] : memref<98xf32, #tpu.memory_space<smem>>
    %c1_435 = arith.constant 1 : index
    %c3_436 = arith.constant 3 : index
    %c6_437 = arith.constant 6 : index
    %785 = vector.load %arg10[%c1_435, %c3_436, %c6_437] : memref<2x22x22xf32, #tpu.memory_space<vmem>>, vector<1x16x16xf32>
    %786 = vector.shape_cast %785 : vector<1x16x16xf32> to vector<16x16xf32>
    %787 = vector.broadcast %784 : f32 to vector<16x16xf32>
    %788 = arith.mulf %787, %786 : vector<16x16xf32>
    %789 = arith.addf %783, %788 : vector<16x16xf32>
    %c77 = arith.constant 77 : index
    %790 = memref.load %arg6[%c77] : memref<98xf32, #tpu.memory_space<smem>>
    %c1_438 = arith.constant 1 : index
    %c4_439 = arith.constant 4 : index
    %c0_440 = arith.constant 0 : index
    %791 = vector.load %arg10[%c1_438, %c4_439, %c0_440] : memref<2x22x22xf32, #tpu.memory_space<vmem>>, vector<1x16x16xf32>
    %792 = vector.shape_cast %791 : vector<1x16x16xf32> to vector<16x16xf32>
    %793 = vector.broadcast %790 : f32 to vector<16x16xf32>
    %794 = arith.mulf %793, %792 : vector<16x16xf32>
    %795 = arith.addf %789, %794 : vector<16x16xf32>
    %c78 = arith.constant 78 : index
    %796 = memref.load %arg6[%c78] : memref<98xf32, #tpu.memory_space<smem>>
    %c1_441 = arith.constant 1 : index
    %c4_442 = arith.constant 4 : index
    %c1_443 = arith.constant 1 : index
    %797 = vector.load %arg10[%c1_441, %c4_442, %c1_443] : memref<2x22x22xf32, #tpu.memory_space<vmem>>, vector<1x16x16xf32>
    %798 = vector.shape_cast %797 : vector<1x16x16xf32> to vector<16x16xf32>
    %799 = vector.broadcast %796 : f32 to vector<16x16xf32>
    %800 = arith.mulf %799, %798 : vector<16x16xf32>
    %801 = arith.addf %795, %800 : vector<16x16xf32>
    %c79 = arith.constant 79 : index
    %802 = memref.load %arg6[%c79] : memref<98xf32, #tpu.memory_space<smem>>
    %c1_444 = arith.constant 1 : index
    %c4_445 = arith.constant 4 : index
    %c2_446 = arith.constant 2 : index
    %803 = vector.load %arg10[%c1_444, %c4_445, %c2_446] : memref<2x22x22xf32, #tpu.memory_space<vmem>>, vector<1x16x16xf32>
    %804 = vector.shape_cast %803 : vector<1x16x16xf32> to vector<16x16xf32>
    %805 = vector.broadcast %802 : f32 to vector<16x16xf32>
    %806 = arith.mulf %805, %804 : vector<16x16xf32>
    %807 = arith.addf %801, %806 : vector<16x16xf32>
    %c80 = arith.constant 80 : index
    %808 = memref.load %arg6[%c80] : memref<98xf32, #tpu.memory_space<smem>>
    %c1_447 = arith.constant 1 : index
    %c4_448 = arith.constant 4 : index
    %c3_449 = arith.constant 3 : index
    %809 = vector.load %arg10[%c1_447, %c4_448, %c3_449] : memref<2x22x22xf32, #tpu.memory_space<vmem>>, vector<1x16x16xf32>
    %810 = vector.shape_cast %809 : vector<1x16x16xf32> to vector<16x16xf32>
    %811 = vector.broadcast %808 : f32 to vector<16x16xf32>
    %812 = arith.mulf %811, %810 : vector<16x16xf32>
    %813 = arith.addf %807, %812 : vector<16x16xf32>
    %c81 = arith.constant 81 : index
    %814 = memref.load %arg6[%c81] : memref<98xf32, #tpu.memory_space<smem>>
    %c1_450 = arith.constant 1 : index
    %c4_451 = arith.constant 4 : index
    %c4_452 = arith.constant 4 : index
    %815 = vector.load %arg10[%c1_450, %c4_451, %c4_452] : memref<2x22x22xf32, #tpu.memory_space<vmem>>, vector<1x16x16xf32>
    %816 = vector.shape_cast %815 : vector<1x16x16xf32> to vector<16x16xf32>
    %817 = vector.broadcast %814 : f32 to vector<16x16xf32>
    %818 = arith.mulf %817, %816 : vector<16x16xf32>
    %819 = arith.addf %813, %818 : vector<16x16xf32>
    %c82 = arith.constant 82 : index
    %820 = memref.load %arg6[%c82] : memref<98xf32, #tpu.memory_space<smem>>
    %c1_453 = arith.constant 1 : index
    %c4_454 = arith.constant 4 : index
    %c5_455 = arith.constant 5 : index
    %821 = vector.load %arg10[%c1_453, %c4_454, %c5_455] : memref<2x22x22xf32, #tpu.memory_space<vmem>>, vector<1x16x16xf32>
    %822 = vector.shape_cast %821 : vector<1x16x16xf32> to vector<16x16xf32>
    %823 = vector.broadcast %820 : f32 to vector<16x16xf32>
    %824 = arith.mulf %823, %822 : vector<16x16xf32>
    %825 = arith.addf %819, %824 : vector<16x16xf32>
    %c83 = arith.constant 83 : index
    %826 = memref.load %arg6[%c83] : memref<98xf32, #tpu.memory_space<smem>>
    %c1_456 = arith.constant 1 : index
    %c4_457 = arith.constant 4 : index
    %c6_458 = arith.constant 6 : index
    %827 = vector.load %arg10[%c1_456, %c4_457, %c6_458] : memref<2x22x22xf32, #tpu.memory_space<vmem>>, vector<1x16x16xf32>
    %828 = vector.shape_cast %827 : vector<1x16x16xf32> to vector<16x16xf32>
    %829 = vector.broadcast %826 : f32 to vector<16x16xf32>
    %830 = arith.mulf %829, %828 : vector<16x16xf32>
    %831 = arith.addf %825, %830 : vector<16x16xf32>
    %c84 = arith.constant 84 : index
    %832 = memref.load %arg6[%c84] : memref<98xf32, #tpu.memory_space<smem>>
    %c1_459 = arith.constant 1 : index
    %c5_460 = arith.constant 5 : index
    %c0_461 = arith.constant 0 : index
    %833 = vector.load %arg10[%c1_459, %c5_460, %c0_461] : memref<2x22x22xf32, #tpu.memory_space<vmem>>, vector<1x16x16xf32>
    %834 = vector.shape_cast %833 : vector<1x16x16xf32> to vector<16x16xf32>
    %835 = vector.broadcast %832 : f32 to vector<16x16xf32>
    %836 = arith.mulf %835, %834 : vector<16x16xf32>
    %837 = arith.addf %831, %836 : vector<16x16xf32>
    %c85 = arith.constant 85 : index
    %838 = memref.load %arg6[%c85] : memref<98xf32, #tpu.memory_space<smem>>
    %c1_462 = arith.constant 1 : index
    %c5_463 = arith.constant 5 : index
    %c1_464 = arith.constant 1 : index
    %839 = vector.load %arg10[%c1_462, %c5_463, %c1_464] : memref<2x22x22xf32, #tpu.memory_space<vmem>>, vector<1x16x16xf32>
    %840 = vector.shape_cast %839 : vector<1x16x16xf32> to vector<16x16xf32>
    %841 = vector.broadcast %838 : f32 to vector<16x16xf32>
    %842 = arith.mulf %841, %840 : vector<16x16xf32>
    %843 = arith.addf %837, %842 : vector<16x16xf32>
    %c86 = arith.constant 86 : index
    %844 = memref.load %arg6[%c86] : memref<98xf32, #tpu.memory_space<smem>>
    %c1_465 = arith.constant 1 : index
    %c5_466 = arith.constant 5 : index
    %c2_467 = arith.constant 2 : index
    %845 = vector.load %arg10[%c1_465, %c5_466, %c2_467] : memref<2x22x22xf32, #tpu.memory_space<vmem>>, vector<1x16x16xf32>
    %846 = vector.shape_cast %845 : vector<1x16x16xf32> to vector<16x16xf32>
    %847 = vector.broadcast %844 : f32 to vector<16x16xf32>
    %848 = arith.mulf %847, %846 : vector<16x16xf32>
    %849 = arith.addf %843, %848 : vector<16x16xf32>
    %c87 = arith.constant 87 : index
    %850 = memref.load %arg6[%c87] : memref<98xf32, #tpu.memory_space<smem>>
    %c1_468 = arith.constant 1 : index
    %c5_469 = arith.constant 5 : index
    %c3_470 = arith.constant 3 : index
    %851 = vector.load %arg10[%c1_468, %c5_469, %c3_470] : memref<2x22x22xf32, #tpu.memory_space<vmem>>, vector<1x16x16xf32>
    %852 = vector.shape_cast %851 : vector<1x16x16xf32> to vector<16x16xf32>
    %853 = vector.broadcast %850 : f32 to vector<16x16xf32>
    %854 = arith.mulf %853, %852 : vector<16x16xf32>
    %855 = arith.addf %849, %854 : vector<16x16xf32>
    %c88 = arith.constant 88 : index
    %856 = memref.load %arg6[%c88] : memref<98xf32, #tpu.memory_space<smem>>
    %c1_471 = arith.constant 1 : index
    %c5_472 = arith.constant 5 : index
    %c4_473 = arith.constant 4 : index
    %857 = vector.load %arg10[%c1_471, %c5_472, %c4_473] : memref<2x22x22xf32, #tpu.memory_space<vmem>>, vector<1x16x16xf32>
    %858 = vector.shape_cast %857 : vector<1x16x16xf32> to vector<16x16xf32>
    %859 = vector.broadcast %856 : f32 to vector<16x16xf32>
    %860 = arith.mulf %859, %858 : vector<16x16xf32>
    %861 = arith.addf %855, %860 : vector<16x16xf32>
    %c89 = arith.constant 89 : index
    %862 = memref.load %arg6[%c89] : memref<98xf32, #tpu.memory_space<smem>>
    %c1_474 = arith.constant 1 : index
    %c5_475 = arith.constant 5 : index
    %c5_476 = arith.constant 5 : index
    %863 = vector.load %arg10[%c1_474, %c5_475, %c5_476] : memref<2x22x22xf32, #tpu.memory_space<vmem>>, vector<1x16x16xf32>
    %864 = vector.shape_cast %863 : vector<1x16x16xf32> to vector<16x16xf32>
    %865 = vector.broadcast %862 : f32 to vector<16x16xf32>
    %866 = arith.mulf %865, %864 : vector<16x16xf32>
    %867 = arith.addf %861, %866 : vector<16x16xf32>
    %c90 = arith.constant 90 : index
    %868 = memref.load %arg6[%c90] : memref<98xf32, #tpu.memory_space<smem>>
    %c1_477 = arith.constant 1 : index
    %c5_478 = arith.constant 5 : index
    %c6_479 = arith.constant 6 : index
    %869 = vector.load %arg10[%c1_477, %c5_478, %c6_479] : memref<2x22x22xf32, #tpu.memory_space<vmem>>, vector<1x16x16xf32>
    %870 = vector.shape_cast %869 : vector<1x16x16xf32> to vector<16x16xf32>
    %871 = vector.broadcast %868 : f32 to vector<16x16xf32>
    %872 = arith.mulf %871, %870 : vector<16x16xf32>
    %873 = arith.addf %867, %872 : vector<16x16xf32>
    %c91 = arith.constant 91 : index
    %874 = memref.load %arg6[%c91] : memref<98xf32, #tpu.memory_space<smem>>
    %c1_480 = arith.constant 1 : index
    %c6_481 = arith.constant 6 : index
    %c0_482 = arith.constant 0 : index
    %875 = vector.load %arg10[%c1_480, %c6_481, %c0_482] : memref<2x22x22xf32, #tpu.memory_space<vmem>>, vector<1x16x16xf32>
    %876 = vector.shape_cast %875 : vector<1x16x16xf32> to vector<16x16xf32>
    %877 = vector.broadcast %874 : f32 to vector<16x16xf32>
    %878 = arith.mulf %877, %876 : vector<16x16xf32>
    %879 = arith.addf %873, %878 : vector<16x16xf32>
    %c92 = arith.constant 92 : index
    %880 = memref.load %arg6[%c92] : memref<98xf32, #tpu.memory_space<smem>>
    %c1_483 = arith.constant 1 : index
    %c6_484 = arith.constant 6 : index
    %c1_485 = arith.constant 1 : index
    %881 = vector.load %arg10[%c1_483, %c6_484, %c1_485] : memref<2x22x22xf32, #tpu.memory_space<vmem>>, vector<1x16x16xf32>
    %882 = vector.shape_cast %881 : vector<1x16x16xf32> to vector<16x16xf32>
    %883 = vector.broadcast %880 : f32 to vector<16x16xf32>
    %884 = arith.mulf %883, %882 : vector<16x16xf32>
    %885 = arith.addf %879, %884 : vector<16x16xf32>
    %c93 = arith.constant 93 : index
    %886 = memref.load %arg6[%c93] : memref<98xf32, #tpu.memory_space<smem>>
    %c1_486 = arith.constant 1 : index
    %c6_487 = arith.constant 6 : index
    %c2_488 = arith.constant 2 : index
    %887 = vector.load %arg10[%c1_486, %c6_487, %c2_488] : memref<2x22x22xf32, #tpu.memory_space<vmem>>, vector<1x16x16xf32>
    %888 = vector.shape_cast %887 : vector<1x16x16xf32> to vector<16x16xf32>
    %889 = vector.broadcast %886 : f32 to vector<16x16xf32>
    %890 = arith.mulf %889, %888 : vector<16x16xf32>
    %891 = arith.addf %885, %890 : vector<16x16xf32>
    %c94 = arith.constant 94 : index
    %892 = memref.load %arg6[%c94] : memref<98xf32, #tpu.memory_space<smem>>
    %c1_489 = arith.constant 1 : index
    %c6_490 = arith.constant 6 : index
    %c3_491 = arith.constant 3 : index
    %893 = vector.load %arg10[%c1_489, %c6_490, %c3_491] : memref<2x22x22xf32, #tpu.memory_space<vmem>>, vector<1x16x16xf32>
    %894 = vector.shape_cast %893 : vector<1x16x16xf32> to vector<16x16xf32>
    %895 = vector.broadcast %892 : f32 to vector<16x16xf32>
    %896 = arith.mulf %895, %894 : vector<16x16xf32>
    %897 = arith.addf %891, %896 : vector<16x16xf32>
    %c95 = arith.constant 95 : index
    %898 = memref.load %arg6[%c95] : memref<98xf32, #tpu.memory_space<smem>>
    %c1_492 = arith.constant 1 : index
    %c6_493 = arith.constant 6 : index
    %c4_494 = arith.constant 4 : index
    %899 = vector.load %arg10[%c1_492, %c6_493, %c4_494] : memref<2x22x22xf32, #tpu.memory_space<vmem>>, vector<1x16x16xf32>
    %900 = vector.shape_cast %899 : vector<1x16x16xf32> to vector<16x16xf32>
    %901 = vector.broadcast %898 : f32 to vector<16x16xf32>
    %902 = arith.mulf %901, %900 : vector<16x16xf32>
    %903 = arith.addf %897, %902 : vector<16x16xf32>
    %c96 = arith.constant 96 : index
    %904 = memref.load %arg6[%c96] : memref<98xf32, #tpu.memory_space<smem>>
    %c1_495 = arith.constant 1 : index
    %c6_496 = arith.constant 6 : index
    %c5_497 = arith.constant 5 : index
    %905 = vector.load %arg10[%c1_495, %c6_496, %c5_497] : memref<2x22x22xf32, #tpu.memory_space<vmem>>, vector<1x16x16xf32>
    %906 = vector.shape_cast %905 : vector<1x16x16xf32> to vector<16x16xf32>
    %907 = vector.broadcast %904 : f32 to vector<16x16xf32>
    %908 = arith.mulf %907, %906 : vector<16x16xf32>
    %909 = arith.addf %903, %908 : vector<16x16xf32>
    %c97 = arith.constant 97 : index
    %910 = memref.load %arg6[%c97] : memref<98xf32, #tpu.memory_space<smem>>
    %c1_498 = arith.constant 1 : index
    %c6_499 = arith.constant 6 : index
    %c6_500 = arith.constant 6 : index
    %911 = vector.load %arg10[%c1_498, %c6_499, %c6_500] : memref<2x22x22xf32, #tpu.memory_space<vmem>>, vector<1x16x16xf32>
    %912 = vector.shape_cast %911 : vector<1x16x16xf32> to vector<16x16xf32>
    %913 = vector.broadcast %910 : f32 to vector<16x16xf32>
    %914 = arith.mulf %913, %912 : vector<16x16xf32>
    %915 = arith.addf %909, %914 : vector<16x16xf32>
    %c0_501 = arith.constant 0 : index
    %916 = memref.load %arg7[%c0_501] : memref<1xf32, #tpu.memory_space<smem>>
    %917 = vector.broadcast %916 : f32 to vector<16x16xf32>
    %918 = arith.addf %915, %917 : vector<16x16xf32>
    %c0_502 = arith.constant 0 : index
    %c1_503 = arith.constant 1 : index
    %c1_504 = arith.constant 1 : index
    %919 = vector.load %arg1[%c0_502, %c1_503, %c1_504] : memref<1x18x18xf32, #tpu.memory_space<vmem>>, vector<1x16x16xf32>
    %920 = vector.shape_cast %919 : vector<1x16x16xf32> to vector<16x16xf32>
    %921 = arith.mulf %57, %918 : vector<16x16xf32>
    %922 = arith.addf %921, %920 : vector<16x16xf32>
    %c0_505 = arith.constant 0 : index
    %c0_506 = arith.constant 0 : index
    %c0_507 = arith.constant 0 : index
    %923 = vector.load %arg8[%c0_505, %c0_506, %c0_507] : memref<1x16x16xf32, #tpu.memory_space<vmem>>, vector<1x16x16xf32>
    %924 = vector.shape_cast %923 : vector<1x16x16xf32> to vector<16x16xf32>
    %925 = vector.shape_cast %922 : vector<16x16xf32> to vector<1x16x16xf32>
    tpu.vector_store %arg8[%c0_505, %c0_506, %c0_507], %925 {strides = array<i32>} : memref<1x16x16xf32, #tpu.memory_space<vmem>>, vector<1x16x16xf32>,
    return
  }
  func.func @transform_0(%arg0: i32) -> (i32, i32, i32) {
    %c0_i32 = arith.constant 0 : i32
    %c0_i32_0 = arith.constant 0 : i32
    %c0_i32_1 = arith.constant 0 : i32
    return %arg0, %c0_i32, %c0_i32_0 : i32, i32, i32
  }
  func.func @transform_1(%arg0: i32) -> i32 {
    %c0_i32 = arith.constant 0 : i32
    %c0_i32_0 = arith.constant 0 : i32
    return %c0_i32 : i32
  }
  func.func @transform_2(%arg0: i32) -> i32 {
    %c0_i32 = arith.constant 0 : i32
    %c0_i32_0 = arith.constant 0 : i32
    return %c0_i32 : i32
  }
  func.func @transform_3(%arg0: i32) -> i32 {
    %c0_i32 = arith.constant 0 : i32
    %c0_i32_0 = arith.constant 0 : i32
    return %c0_i32 : i32
  }
  func.func @transform_4(%arg0: i32) -> i32 {
    %c0_i32 = arith.constant 0 : i32
    %c0_i32_0 = arith.constant 0 : i32
    return %c0_i32 : i32
  }
  func.func @transform_5(%arg0: i32) -> i32 {
    %c0_i32 = arith.constant 0 : i32
    %c0_i32_0 = arith.constant 0 : i32
    return %c0_i32 : i32
  }
  func.func @transform_6(%arg0: i32) -> i32 {
    %c0_i32 = arith.constant 0 : i32
    %c0_i32_0 = arith.constant 0 : i32
    return %c0_i32 : i32
  }
  func.func @transform_7(%arg0: i32) -> (i32, i32, i32) {
    %c0_i32 = arith.constant 0 : i32
    %c0_i32_0 = arith.constant 0 : i32
    %c0_i32_1 = arith.constant 0 : i32
    return %arg0, %c0_i32, %c0_i32_0 : i32, i32, i32
  }
}

</mosaic_0001>

<bundles_post_ra>
// kernel: tpu_custom_call.1
= control target key start
LH: loop header
LB: loop body
LE: loop exit
PB: predicated region body
PF: predicated region fallthrough
CT: control target
= control target key end

     0   :  { %s4017_s0 = inlined_call_operand.vmem [shape: f32[2,18,18], index: 0, kind: input, shape index: {}]   ;;  %s4018_s1 = inlined_call_operand.vmem [shape: f32[9], index: 1, kind: input, shape index: {}]   ;;  %s4019_s2 = inlined_call_operand.<no memory space> [shape: f32[1], index: 2, kind: input, shape index: {}]   ;;  %s4020_s3 = inlined_call_operand.vmem [shape: f32[50], index: 3, kind: input, shape index: {}]   ;;  %s4021_s4 = inlined_call_operand.vmem [shape: f32[2], index: 4, kind: input, shape index: {}]   ;;  %s4022_s5 = inlined_call_operand.vmem [shape: f32[98], index: 5, kind: input, shape index: {}]   ;;  %s4023_s6 = inlined_call_operand.<no memory space> [shape: f32[1], index: 6, kind: input, shape index: {}]   ;;  %s4024_s7 = inlined_call_operand.hbm [shape: f32[2,16,16], index: 7, kind: output, shape index: {}]  }
   0x1   :  { %12 = sst [smem:[#allocation4]] %s4019_s2 }
   0x2   :  { %13 = sst [smem:[#allocation5]] %s4023_s6 }
   0x3   :  { %14 = vsyncpa [#allocation8], 0 }
   0x4   :  { %15 = vsyncpa [#allocation10], 0 }
   0x5   :  { %16 = vsyncpa [#allocation13], 0 }
   0x6   :  { %17 = vsyncpa [#allocation7], 0 }
   0x7   :  { %19 = vsyncpa [#allocation7 + $0x1], 0  ;;  %s3028_s28 = smov 0   ;;  %s3030_s29 = smov 0  }
   0x8   :  { %s3032_s30 = smov 0   ;;  %s3034_s8 = smov 0  }
   0x9 LB: > { %s3049_s2 = sadd.s32 4294967295, %s2964_s8   ;;  %s2563_s6 = sadd.s32 4294967294, %s2964_s8   ;;  %s2964_s8 = sphi %s3034_s8, %s4044_s8   ;;  %s2960_s30 = sphi %s3032_s30, %s4043_s30   ;;  %s2956_s29 = sphi %s3030_s29, %s4042_s29   ;;  %s2952_s28 = sphi %s3028_s28, %s4041_s28  }
   0xa   : > { %s3053_s9 = sadd.s32 1, %s2964_s8   ;;  %s184_s10 = sadd.s32 1, %s2960_s30 }
   0xb   : > { %s181_s11 = ssub.s32 %s2964_s8, %s3053_s9  ;;  %p194_p0 = scmp.ne.s32.totalorder %s2960_s30, %s2956_s29 }
   0xc   : > { %p182_p1 = scmp.eq.s32.totalorder %s181_s11, 0  ;;  %p195_p2 = scmp.eq.s32.totalorder %s3049_s2, 1 }
   0xd   : > { %p200_p3 = scmp.ne.s32.totalorder %s2956_s29, %s2952_s28  ;;  %p201_p4 = scmp.eq.s32.totalorder %s2563_s6, 1 }
   0xe   : > { %s3064_s12 = scalar_select %p182_p1, %s2960_s30, %s184_s10  }
   0xf   : > { %p3066_p5 = por %p195_p2, %p194_p0  ;;  %p3070_p6 = por %p201_p4, %p200_p3 }
  0x10   : > { %p2564_p7 = scmp.ge.s32.totalorder %s2964_s8, 1  ;;  %p208_p8 = scmp.lt.s32.totalorder %s2964_s8, 3 }
  0x11   : > { %s4028_s13 = scalar_select %p3066_p5, 1, 0 }
  0x12   : > { %s4029_s14 = scalar_select %p3070_p6, 1, 0 }
  0x13   : > { %p4025_p9 = scmp.eq.s32.totalorder %s3049_s2, 0  ;;  %p3077_p10 = pnand %p2564_p7, %p208_p8 }
  0x14   : > { %s235_s18 = sshll.u32 %s4020_s3, 4  ;;  %s221_s21 = sshll.u32 %s4018_s1, 4  ;;  %s236_s18 = int_to_ptr.vmem [resolvable:$true] %s235_s18  ;;  %s222_s21 = int_to_ptr.vmem [resolvable:$true] %s221_s21 }
  0x15   : > { %s4030_s15 = scalar_select %p3077_p10, 1, 0 }
  0x16   : > { %p2757_p11 = pneg %p3077_p10  ;;  %s246_s25 = sshll.u32 %s4021_s4, 4  ;;  %s3098_s25 = int_to_ptr.vmem [resolvable:$true] %s246_s25 }
  0x17   : > { %s257_s6 = sshll.u32 %s4022_s5, 4  ;;  %s2830_s10 = scalar_lea.vmem %s236_s18, 16  ;;  %s258_s6 = int_to_ptr.vmem [resolvable:$true] %s257_s6 }
  0x18   : > { %p3091_p12 = pnand %p4025_p9, %p2757_p11  ;;  %p2831_p13 = scmp.ne.s32.totalorder %s236_s18, %s2830_s10 }
  0x19   : > { %p2838_p3 = scmp.lt.s32.totalorder %s236_s18, %s236_s18  ;;  %p2839_p4 = scmp.lt.s32.totalorder %s2830_s10, %s2830_s10 }
  0x1a   : > { %p2832_p0 = pneg %p3091_p12 }
  0x1b   : > { %p2840_p7 = por %p2839_p4, %p2838_p3 }
  0x1c   : > { %p2833_p1 = pnand %p2832_p0, %p2831_p13 }
  0x1e   : > { %p2834_p2 = pneg %p2833_p1 }
  0x20   : > { %p2841_p8 = pnand %p2840_p7, %p2834_p2 }
  0x22   : > { %2844 = shalt.err (!%p2841_p8)
}
  0x23   : > { %s2966_s11 = smov [#allocation9]   ;;  %s2845_s16 = scalar_lea.vmem %s222_s21, 16 }
  0x24   : > { %2763 = dma.vmem_to_smem (!%p3091_p12), %s236_s18, 16, %s2966_s11, [#allocation10]  }
  0x25   : > { %p2846_p11 = scmp.ne.s32.totalorder %s222_s21, %s2845_s16  ;;  %p2853_p5 = scmp.lt.s32.totalorder %s222_s21, %s222_s21 }
  0x26   : > { %p2854_p10 = scmp.lt.s32.totalorder %s2845_s16, %s2845_s16 }
  0x27   : > { %p2848_p9 = pnand %p2846_p11, %p2832_p0 }
  0x28   : > { %p2855_p13 = por %p2854_p10, %p2853_p5 }
  0x29   : > { %p2849_p6 = pneg %p2848_p9 }
  0x2b   : > { %p2856_p1 = pnand %p2855_p13, %p2849_p6 }
  0x2d   : > { %2859 = shalt.err (!%p2856_p1)
}
  0x2e   : > { %s2967_s17 = smov [#allocation6]   ;;  %s2860_s18 = scalar_lea.vmem %s3098_s25, 16 }
  0x2f   : > { %2760 = dma.vmem_to_smem (!%p3091_p12), %s222_s21, 16, %s2967_s17, [#allocation8]  }
  0x30   : > { %p2861_p2 = scmp.ne.s32.totalorder %s3098_s25, %s2860_s18  ;;  %p2868_p9 = scmp.lt.s32.totalorder %s3098_s25, %s3098_s25 }
  0x31   : > { %p2869_p7 = scmp.lt.s32.totalorder %s2860_s18, %s2860_s18 }
  0x32   : > { %p2863_p3 = pnand %p2861_p2, %p2832_p0 }
  0x33   : > { %p2870_p5 = por %p2869_p7, %p2868_p9 }
  0x34   : > { %p2864_p4 = pneg %p2863_p3 }
  0x36   : > { %p2871_p6 = pnand %p2870_p5, %p2864_p4 }
  0x38   : > { %2874 = shalt.err (!%p2871_p6)
}
  0x39   : > { %s2968_s19 = smov [#allocation11]   ;;  %s2875_s23 = scalar_lea.vmem %s258_s6, 16 }
  0x3a   : > { %2766 = dma.vmem_to_smem (!%p3091_p12), %s3098_s25, 16, %s2968_s19, [#allocation10]  }
  0x3b   : > { %p2876_p10 = scmp.ne.s32.totalorder %s258_s6, %s2875_s23  ;;  %p2883_p13 = scmp.lt.s32.totalorder %s258_s6, %s258_s6 }
  0x3c   : > { %p2884_p1 = scmp.lt.s32.totalorder %s2875_s23, %s2875_s23 }
  0x3d   : > { %p2878_p8 = pnand %p2876_p10, %p2832_p0 }
  0x3e   : > { %p2885_p2 = por %p2884_p1, %p2883_p13 }
  0x3f   : > { %p2879_p11 = pneg %p2878_p8 }
  0x41   : > { %p2886_p3 = pnand %p2885_p2, %p2879_p11 }
  0x43   : > { %2889 = shalt.err (!%p2886_p3)
}
  0x44   : > { %s2969_s24 = smov [#allocation12]   ;;  %p4032_p4 = scmp.ne.s32.totalorder %s4030_s15, 0 }
  0x45   : > { %2769 = dma.vmem_to_smem (!%p3091_p12), %s258_s6, 16, %s2969_s24, [#allocation13]  }
  0x46   : > { %281 = sbr.rel (%p4032_p4) target bundleno = 1152 (0x480), region = 48  ;;  %p4033_p9 = scmp.eq.s32.totalorder (!%p4032_p4), %s3049_s2, 0 }
  0x4d   : > { %2935 = dma.done.wait (%p4033_p9), [#allocation8], 16   ;;  %p4034_p7 = pmov %p4033_p9 }
  0x4f   : > { %2937 = vsyncadd (%p4034_p7), [#allocation8], 4294967280  ;;  %p4035_p0 = pmov %p4034_p7 }
  0x51   : > { %2939 = dma.done.wait (%p4035_p0), [#allocation10], 32   ;;  %p4036_p5 = pmov %p4035_p0 }
  0x52   : > { %p4037_p6 = pmov %p4035_p0 }
  0x53   : > { %2941 = vsyncadd (%p4036_p5), [#allocation10], 4294967264 }
  0x54   : > { %2943 = dma.done.wait (%p4037_p6), [#allocation13], 16   ;;  %p4038_p12 = pmov %p4035_p0 }
  0x56   : > { %2945 = vsyncadd (%p4038_p12), [#allocation13], 4294967280 }
  0x57   : > { %299 = sfence }
  0x58   : > { %p326_p10 = scmp.lt.s32.totalorder %s3049_s2, 1  ;;  %s2578_s15 = sld [smem:[#allocation6 + $0x2]]  ;;  %vm443_vm0 = vcmask 162816   ;;  %vm446_vm1 = vcmask 158720   ;;  %v2972_v21 = vmov 0.0   ;;  %vm456_vm2 = vcmask 146448  }
  0x59   : > { %s2577_s22 = sld [smem:[#allocation6 + $0x1]]  ;;  %s2580_s26 = sld [smem:[#allocation6 + $0x4]]  ;;  %444 = vst.msk [vmem:[#allocation2] sm:$0xff] %vm443_vm0, %v2972_v21  ;;  %445 = vst.msk [vmem:[#allocation2 + $0x8] sm:$0xff] %vm443_vm0, %v2972_v21  ;;  %vm459_vm3 = vcmask 179200   ;;  %vm462_vm4 = vcmask 177152  }
  0x5a   : > { %s327_s25 = scalar_select %p326_p10, %s3049_s2, 1  ;;  %447 = vst.msk [vmem:[#allocation2 + $0x10] sm:$0xf] %vm446_vm1, %v2972_v21  ;;  %vm799_vm5 = vcmask 154648   ;;  %vm2443_vm6 = vcmask 130048  }
  0x5b   : > { %s2581_s16 = sld [smem:[#allocation6 + $0x5]]  ;;  %s2970_s17 = smov 126   ;;  %461 = vst.msk [vmem:[#allocation3 + $0x8] sm:$0xff] %vm459_vm3, %v2972_v21  ;;  %460 = vst.msk [vmem:[#allocation3] sm:$0xff] %vm459_vm3, %v2972_v21 }
  0x5c   : > { %s2738_s27 = smul.u32 24, %s327_s25  ;;  %s2971_s18 = smov 127   ;;  %463 = vst.msk [vmem:[#allocation3 + $0x10] sm:$0x3f] %vm462_vm4, %v2972_v21  ;;  %466 = vst.msk [vmem:[#allocation3 + $0x28] sm:$0x3f] %vm462_vm4, %v2972_v21 }
  0x5d   : > { %s2583_s19 = sld [smem:[#allocation6 + $0x7]]  ;;  %s2584_s20 = sld [smem:[#allocation6 + $0x8]]  ;;  %464 = vst.msk [vmem:[#allocation3 + $0x18] sm:$0xff] %vm459_vm3, %v2972_v21  ;;  %465 = vst.msk [vmem:[#allocation3 + $0x20] sm:$0xff] %vm459_vm3, %v2972_v21 }
  0x5e   : > { %s3153_s11 = scalar_lea.vmem %s4017_s0, %s2738_s27  ;;  %v354_v0 = vstv %s2578_s15  ;;  %s331_s21 = sld [smem:[#allocation6]] }
  0x5f   : > { %v332_v1 = vld [vmem:[%s3153_s11] sm:$0xff]  ;;  %v333_v2 = vld [vmem:[%s3153_s11 + $0x8] sm:$0xff]  ;;  %v340_v3 = vstv %s2577_s22  ;;  %v376_v9 = vstv %s2580_s26  ;;  %s2579_s23 = sld [smem:[#allocation6 + $0x3]]  ;;  %s2582_s24 = sld [smem:[#allocation6 + $0x6]] }
  0x60   : > { %v355_v4 = vmul.f32 %v354_v0, %v332_v1  ;;  %v341_v5 = vmul.f32 %v340_v3, %v332_v1  ;;  %v356_v6 = vmul.f32 %v354_v0, %v333_v2  ;;  %v342_v7 = vmul.f32 %v340_v3, %v333_v2  ;;  %v369_v8 = vld [vmem:[%s3153_s11 + $0x9] sm:$0xff]  ;;  %v368_v10 = vld [vmem:[%s3153_s11 + $0x1] sm:$0xff]  ;;  %s439_s15 = sld [smem:[#allocation4]]  ;;  %s2973_s22 = smov 2  }
  0x61   : > { %v378_v11 = vmul.f32 %v376_v9, %v369_v8  ;;  %v377_v12 = vmul.f32 %v376_v9, %v368_v10  ;;  %v390_v13 = vstv %s2581_s16  ;;  %v405_v16 = vld [vmem:[%s3153_s11 + $0xa] sm:$0xff]  ;;  %v404_v18 = vld [vmem:[%s3153_s11 + $0x2] sm:$0xff]  ;;  %s2585_s25 = sld [smem:[#allocation9 + $0x1]]  ;;  %s2586_s26 = sld [smem:[#allocation9 + $0x2]] }
  0x62   : > { %359 = vrot.lane.b32.xlu1 %v355_v4, %s2970_s17  ;;  %345 = vrot.lane.b32.xlu0 %v341_v5, %s2971_s18  ;;  %v392_v14 = vmul.f32 %v390_v13, %v369_v8  ;;  %v391_v15 = vmul.f32 %v390_v13, %v368_v10  ;;  %s2587_s27 = sld [smem:[#allocation9 + $0x3]]  ;;  %s2588_s6 = sld [smem:[#allocation9 + $0x4]] }
  0x63   : > { %v412_v17 = vstv %s2583_s19  ;;  %v426_v22 = vstv %s2584_s20  ;;  %s2590_s10 = sld [smem:[#allocation9 + $0x6]]  ;;  %s2591_s16 = sld [smem:[#allocation9 + $0x7]] }
  0x64   : > { %v414_v19 = vmul.f32 %v412_v17, %v405_v16  ;;  %v413_v20 = vmul.f32 %v412_v17, %v404_v18  ;;  %v428_v23 = vmul.f32 %v426_v22, %v405_v16  ;;  %v427_v24 = vmul.f32 %v426_v22, %v404_v18  ;;  %s2974_s19 = smov 125   ;;  %s2592_s20 = sld [smem:[#allocation9 + $0x8]] }
  0x65   : > { %v334_v25 = vstv %s331_s21  ;;  %v370_v27 = vstv %s2579_s23  ;;  %v406_v42 = vstv %s2582_s24  ;;  %s2975_s21 = smov 124   ;;  %s2593_s23 = sld [smem:[#allocation9 + $0x9]] }
  0x66   : > { %361 = vrot.lane.b32.xlu1 %v356_v6, %s2970_s17  ;;  %347 = vrot.lane.b32.xlu0 %v342_v7, %s2971_s18  ;;  %v335_v26 = vmul.f32 %v334_v25, %v332_v1  ;;  %v336_v31 = vmul.f32 %v334_v25, %v333_v2  ;;  %v371_v32 = vmul.f32 %v370_v27, %v368_v10  ;;  %v440_v58 = vstv %s439_s15  ;;  %s2595_s24 = sld [smem:[#allocation9 + $0xb]]  ;;  %s2596_s15 = sld [smem:[#allocation9 + $0xc]] }
  0x67   : > { %v372_v37 = vmul.f32 %v370_v27, %v369_v8  ;;  %v408_v46 = vmul.f32 %v406_v42, %v405_v16  ;;  %v407_v47 = vmul.f32 %v406_v42, %v404_v18  ;;  %v476_v3 = vstv %s2585_s25  ;;  %s2598_s25 = sld [smem:[#allocation9 + $0xe]]  ;;  %p4039_p11 = scmp.ne.s32.totalorder %s4028_s13, 0 }
  0x68   : > { %v490_v8 = vstv %s2586_s26  ;;  %s2600_s26 = sld [smem:[#allocation9 + $0x10]] }
  0x69   : > { %v540_v18 = vstv %s2590_s10  ;;  %s2603_s10 = sld [smem:[#allocation9 + $0x13]] }
  0x6a   : > { %383 = vrot.lane.b32.xlu1 %v378_v11, %s2971_s18  ;;  %381 = vrot.lane.b32.xlu0 %v377_v12, %s2971_s18  ;;  %v504_v11 = vstv %s2587_s27  ;;  %s2601_s27 = sld [smem:[#allocation9 + $0x11]] }
  0x6e   : > { %397 = vrot.lane.b32.xlu1 %v392_v14, %s2970_s17  ;;  %395 = vrot.lane.b32.xlu0 %v391_v15, %s2970_s17  ;;  %v518_v14 = vstv %s2588_s6  ;;  %s2602_s6 = sld [smem:[#allocation9 + $0x12]] }
  0x72   : > { %419 = vrot.lane.b32.xlu1 %v414_v19, %s2971_s18  ;;  %417 = vrot.lane.b32.xlu0 %v413_v20, %s2971_s18 }
  0x76   : > { %433 = vrot.lane.b32.xlu1 %v428_v23, %s2970_s17  ;;  %431 = vrot.lane.b32.xlu0 %v427_v24, %s2970_s17  ;;  %v554_v23 = vstv %s2591_s16  ;;  %s2605_s16 = sld [smem:[#allocation9 + $0x15]] }
  0xd4   : > { %v360_v28 = vpop.permute.xlu1 %359  ;;  %v346_v29 = vpop.permute.xlu0 %345 }
  0xd5   : > { %v351_v30 = vadd.f32 %v346_v29, %v335_v26  ;;  %v568_v26 = vstv %s2592_s20  ;;  %v582_v29 = vstv %s2593_s23  ;;  %s2606_s20 = sld [smem:[#allocation9 + $0x16]]  ;;  %s2607_s23 = sld [smem:[#allocation9 + $0x17]] }
  0xd7   : > { %v365_v33 = vadd.f32 %v360_v28, %v351_v30 }
  0xd8   : > { %v362_v34 = vpop.permute.xlu1 %361  ;;  %v348_v35 = vpop.permute.xlu0 %347 }
  0xd9   : > { %v352_v36 = vadd.f32 %v348_v35, %v336_v31  ;;  %v373_v38 = vadd.f32 %v371_v32, %v365_v33  ;;  %v604_v33 = vstv %s2595_s24  ;;  %s2608_s24 = sld [smem:[#allocation9 + $0x18]] }
  0xdb   : > { %v366_v39 = vadd.f32 %v362_v34, %v352_v36 }
  0xdc   : > { %v384_v40 = vpop.permute.xlu1 %383  ;;  %v382_v41 = vpop.permute.xlu0 %381 }
  0xdd   : > { %v374_v43 = vadd.f32 %v372_v37, %v366_v39  ;;  %v387_v45 = vadd.f32 %v382_v41, %v373_v38  ;;  %v618_v37 = vstv %s2596_s15  ;;  %s2610_s15 = sld [smem:[#allocation9 + $0x1a]] }
  0xdf   : > { %v388_v44 = vadd.f32 %v384_v40, %v374_v43  ;;  %v646_v43 = vstv %s2598_s25  ;;  %s2612_s25 = sld [smem:[#allocation9 + $0x1c]] }
  0xe0   : > { %v398_v48 = vpop.permute.xlu1 %397  ;;  %v396_v49 = vpop.permute.xlu0 %395 }
  0xe1   : > { %v402_v50 = vadd.f32 %v398_v48, %v388_v44  ;;  %v401_v51 = vadd.f32 %v396_v49, %v387_v45 }
  0xe3   : > { %v410_v52 = vadd.f32 %v408_v46, %v402_v50  ;;  %v409_v53 = vadd.f32 %v407_v47, %v401_v51  ;;  %v668_v47 = vstv %s2600_s26  ;;  %v682_v51 = vstv %s2601_s27  ;;  %s2613_s26 = sld [smem:[#allocation9 + $0x1d]]  ;;  %s2615_s27 = sld [smem:[#allocation9 + $0x1f]] }
  0xe4   : > { %v420_v54 = vpop.permute.xlu1 %419  ;;  %v418_v55 = vpop.permute.xlu0 %417 }
  0xe5   : > { %v424_v56 = vadd.f32 %v420_v54, %v410_v52  ;;  %v423_v57 = vadd.f32 %v418_v55, %v409_v53  ;;  %v696_v54 = vstv %s2602_s6  ;;  %s2616_s6 = sld [smem:[#allocation9 + $0x20]] }
  0xe8   : > { %v434_v59 = vpop.permute.xlu1 %433  ;;  %v432_v60 = vpop.permute.xlu0 %431 }
  0xe9   : > { %v438_v61 = vadd.f32 %v434_v59, %v424_v56  ;;  %v437_v62 = vadd.f32 %v432_v60, %v423_v57  ;;  %v710_v57 = vstv %s2603_s10  ;;  %s2617_s10 = sld [smem:[#allocation9 + $0x21]] }
  0xeb   : > { %v3176_v63 = vadd.f32 %v440_v58, %v438_v61  ;;  %v3178_v0 = vadd.f32 %v440_v58, %v437_v62  ;;  %v732_v61 = vstv %s2605_s16  ;;  %s2618_s16 = sld [smem:[#allocation9 + $0x22]] }
  0xed   : > { %452 = vrot.lane.b32.xlu1 %v3176_v63, %s2973_s22  ;;  %450 = vrot.lane.b32.xlu0 %v3178_v0, %s2973_s22  ;;  %s2597_s22 = sld [smem:[#allocation9 + $0xd]] }
  0xf3   : > { %v632_v40 = vstv %s2597_s22  ;;  %s2611_s22 = sld [smem:[#allocation9 + $0x1b]] }
 0x15f   : > { %v453_v1 = vpop.permute.xlu1 %452  ;;  %v451_v2 = vpop.permute.xlu0 %450 }
 0x160   : > { %458 = vst.msk [vmem:[#allocation2 + $0xa] sm:$0xff] %vm456_vm2, %v453_v1  ;;  %457 = vst.msk [vmem:[#allocation2 + $0x2] sm:$0xff] %vm456_vm2, %v451_v2 }
 0x167   : > { %v3182_v4 = vld [vmem:[#allocation2 + $0x8] sm:$0xff]  ;;  %v3184_v5 = vld [vmem:[#allocation2] sm:$0xff] }
 0x168   : > { %v478_v6 = vmul.f32 %v476_v3, %v3182_v4  ;;  %v477_v7 = vmul.f32 %v476_v3, %v3184_v5  ;;  %v492_v9 = vmul.f32 %v490_v8, %v3182_v4  ;;  %v491_v10 = vmul.f32 %v490_v8, %v3184_v5  ;;  %v3200_v17 = vld [vmem:[#allocation2 + $0x9] sm:$0xff]  ;;  %v3202_v19 = vld [vmem:[#allocation2 + $0x1] sm:$0xff] }
 0x169   : > { %v506_v12 = vmul.f32 %v504_v11, %v3182_v4  ;;  %v505_v13 = vmul.f32 %v504_v11, %v3184_v5  ;;  %v520_v15 = vmul.f32 %v518_v14, %v3182_v4  ;;  %v519_v16 = vmul.f32 %v518_v14, %v3184_v5  ;;  %v3220_v32 = vld [vmem:[#allocation2 + $0xa] sm:$0xff]  ;;  %v3222_v34 = vld [vmem:[#allocation2 + $0x2] sm:$0xff] }
 0x16a   : > { %483 = vrot.lane.b32.xlu1 %v478_v6, %s2971_s18  ;;  %481 = vrot.lane.b32.xlu0 %v477_v7, %s2971_s18  ;;  %v542_v20 = vmul.f32 %v540_v18, %v3200_v17  ;;  %v541_v22 = vmul.f32 %v540_v18, %v3202_v19  ;;  %v556_v24 = vmul.f32 %v554_v23, %v3200_v17  ;;  %v3240_v46 = vld [vmem:[#allocation2 + $0xb] sm:$0xff]  ;;  %v3242_v48 = vld [vmem:[#allocation2 + $0x3] sm:$0xff]  ;;  %v746_v3 = vstv %s2606_s20  ;;  %s2620_s20 = sld [smem:[#allocation9 + $0x24]] }
 0x16b   : > { %v555_v25 = vmul.f32 %v554_v23, %v3202_v19  ;;  %v570_v27 = vmul.f32 %v568_v26, %v3200_v17  ;;  %v569_v28 = vmul.f32 %v568_v26, %v3202_v19  ;;  %v584_v30 = vmul.f32 %v582_v29, %v3200_v17  ;;  %v3260_v60 = vld [vmem:[#allocation2 + $0xc] sm:$0xff]  ;;  %v3262_v62 = vld [vmem:[#allocation2 + $0x4] sm:$0xff] }
 0x16c   : > { %v583_v31 = vmul.f32 %v582_v29, %v3202_v19  ;;  %v606_v35 = vmul.f32 %v604_v33, %v3220_v32  ;;  %v605_v36 = vmul.f32 %v604_v33, %v3222_v34  ;;  %v620_v38 = vmul.f32 %v618_v37, %v3220_v32 }
 0x16d   : > { %v619_v39 = vmul.f32 %v618_v37, %v3222_v34  ;;  %v634_v41 = vmul.f32 %v632_v40, %v3220_v32  ;;  %v633_v42 = vmul.f32 %v632_v40, %v3222_v34  ;;  %v648_v44 = vmul.f32 %v646_v43, %v3220_v32 }
 0x16e   : > { %497 = vrot.lane.b32.xlu1 %v492_v9, %s2970_s17  ;;  %495 = vrot.lane.b32.xlu0 %v491_v10, %s2970_s17  ;;  %v647_v45 = vmul.f32 %v646_v43, %v3222_v34  ;;  %v670_v49 = vmul.f32 %v668_v47, %v3240_v46  ;;  %v669_v50 = vmul.f32 %v668_v47, %v3242_v48  ;;  %v760_v8 = vstv %s2607_s23  ;;  %s2621_s23 = sld [smem:[#allocation9 + $0x25]] }
 0x16f   : > { %v684_v52 = vmul.f32 %v682_v51, %v3240_v46  ;;  %v683_v53 = vmul.f32 %v682_v51, %v3242_v48  ;;  %v698_v55 = vmul.f32 %v696_v54, %v3240_v46  ;;  %v697_v56 = vmul.f32 %v696_v54, %v3242_v48 }
 0x170   : > { %v712_v58 = vmul.f32 %v710_v57, %v3240_v46  ;;  %v711_v59 = vmul.f32 %v710_v57, %v3242_v48  ;;  %v734_v1 = vmul.f32 %v732_v61, %v3260_v60  ;;  %v733_v2 = vmul.f32 %v732_v61, %v3262_v62 }
 0x171   : > { %v748_v6 = vmul.f32 %v746_v3, %v3260_v60  ;;  %v747_v7 = vmul.f32 %v746_v3, %v3262_v62  ;;  %v762_v9 = vmul.f32 %v760_v8, %v3260_v60  ;;  %v761_v10 = vmul.f32 %v760_v8, %v3262_v62 }
 0x172   : > { %511 = vrot.lane.b32.xlu1 %v506_v12, %s2974_s19  ;;  %509 = vrot.lane.b32.xlu0 %v505_v13, %s2974_s19  ;;  %v774_v11 = vstv %s2608_s24  ;;  %v811_v14 = vstv %s2610_s15  ;;  %s2622_s24 = sld [smem:[#allocation9 + $0x26]]  ;;  %s467_s15 = sld [smem:[#allocation9]] }
 0x173   : > { %v776_v12 = vmul.f32 %v774_v11, %v3260_v60  ;;  %v775_v13 = vmul.f32 %v774_v11, %v3262_v62  ;;  %v825_v18 = vstv %s2611_s22  ;;  %v839_v23 = vstv %s2612_s25  ;;  %s2623_s22 = sld [smem:[#allocation9 + $0x27]]  ;;  %s3320_s25 = sld [smem:[#allocation9 + $0x29]] }
 0x174   : > { %v853_v26 = vstv %s2613_s26  ;;  %v875_v29 = vstv %s2615_s27  ;;  %v889_v33 = vstv %s2616_s6  ;;  %v903_v37 = vstv %s2617_s10  ;;  %s3324_s26 = sld [smem:[#allocation9 + $0x5]]  ;;  %s3328_s27 = sld [smem:[#allocation9 + $0x2a]] }
 0x175   : > { %v917_v40 = vstv %s2618_s16  ;;  %v939_v43 = vstv %s2620_s20  ;;  %v953_v47 = vstv %s2621_s23  ;;  %s3337_s6 = sld [smem:[#allocation9 + $0x2b]]  ;;  %s2628_s10 = sld [smem:[#allocation9 + $0x2c]] }
 0x176   : > { %525 = vrot.lane.b32.xlu1 %v520_v15, %s2975_s21  ;;  %523 = vrot.lane.b32.xlu0 %v519_v16, %s2975_s21  ;;  %v813_v15 = vmul.f32 %v811_v14, %v3182_v4  ;;  %v812_v16 = vmul.f32 %v811_v14, %v3184_v5  ;;  %v955_v51 = vmul.f32 %v953_v47, %v3220_v32  ;;  %s2630_s16 = sld [smem:[#allocation9 + $0x2e]]  ;;  %s3354_s20 = sld [smem:[#allocation9 + $0xa]] }
 0x177   : > { %s3358_s23 = sld [smem:[#allocation9 + $0x2f]] }
 0x178   : > { %v470_v54 = vstv %s467_s15  ;;  %s3374_s15 = sld [smem:[#allocation9 + $0x31]] }
 0x179   : > { %v471_v61 = vmul.f32 %v470_v54, %v3184_v5 }
 0x17a   : > { %547 = vrot.lane.b32.xlu1 %v542_v20, %s2971_s18  ;;  %545 = vrot.lane.b32.xlu0 %v541_v22, %s2971_s18  ;;  %v827_v20 = vmul.f32 %v825_v18, %v3182_v4  ;;  %v826_v22 = vmul.f32 %v825_v18, %v3184_v5 }
 0x17e   : > { %561 = vrot.lane.b32.xlu1 %v556_v24, %s2970_s17  ;;  %559 = vrot.lane.b32.xlu0 %v555_v25, %s2970_s17  ;;  %v841_v24 = vmul.f32 %v839_v23, %v3182_v4  ;;  %v840_v25 = vmul.f32 %v839_v23, %v3184_v5  ;;  %v1017_v23 = vstv %s3328_s27  ;;  %s2609_s27 = sld [smem:[#allocation9 + $0x19]] }
 0x182   : > { %575 = vrot.lane.b32.xlu1 %v570_v27, %s2974_s19  ;;  %573 = vrot.lane.b32.xlu0 %v569_v28, %s2974_s19  ;;  %v855_v27 = vmul.f32 %v853_v26, %v3182_v4  ;;  %v854_v28 = vmul.f32 %v853_v26, %v3184_v5 }
 0x186   : > { %589 = vrot.lane.b32.xlu1 %v584_v30, %s2975_s21  ;;  %587 = vrot.lane.b32.xlu0 %v583_v31, %s2975_s21  ;;  %v877_v30 = vmul.f32 %v875_v29, %v3200_v17  ;;  %v876_v31 = vmul.f32 %v875_v29, %v3202_v19 }
 0x18a   : > { %611 = vrot.lane.b32.xlu1 %v606_v35, %s2971_s18  ;;  %609 = vrot.lane.b32.xlu0 %v605_v36, %s2971_s18  ;;  %v891_v35 = vmul.f32 %v889_v33, %v3200_v17  ;;  %v890_v36 = vmul.f32 %v889_v33, %v3202_v19  ;;  %v1019_v33 = vmul.f32 %v1017_v23, %v3240_v46 }
 0x18e   : > { %625 = vrot.lane.b32.xlu1 %v620_v38, %s2970_s17  ;;  %623 = vrot.lane.b32.xlu0 %v619_v39, %s2970_s17  ;;  %v905_v38 = vmul.f32 %v903_v37, %v3200_v17  ;;  %v904_v39 = vmul.f32 %v903_v37, %v3202_v19 }
 0x192   : > { %639 = vrot.lane.b32.xlu1 %v634_v41, %s2974_s19  ;;  %637 = vrot.lane.b32.xlu0 %v633_v42, %s2974_s19  ;;  %v919_v41 = vmul.f32 %v917_v40, %v3200_v17  ;;  %v918_v42 = vmul.f32 %v917_v40, %v3202_v19 }
 0x196   : > { %653 = vrot.lane.b32.xlu1 %v648_v44, %s2975_s21  ;;  %651 = vrot.lane.b32.xlu0 %v647_v45, %s2975_s21  ;;  %v941_v44 = vmul.f32 %v939_v43, %v3220_v32  ;;  %v940_v45 = vmul.f32 %v939_v43, %v3222_v34 }
 0x19a   : > { %675 = vrot.lane.b32.xlu1 %v670_v49, %s2971_s18  ;;  %673 = vrot.lane.b32.xlu0 %v669_v50, %s2971_s18 }
 0x19e   : > { %689 = vrot.lane.b32.xlu1 %v684_v52, %s2970_s17  ;;  %687 = vrot.lane.b32.xlu0 %v683_v53, %s2970_s17  ;;  %v954_v52 = vmul.f32 %v953_v47, %v3222_v34  ;;  %v967_v53 = vstv %s2622_s24  ;;  %s3364_s24 = sld [smem:[#allocation9 + $0x30]] }
 0x19f   : > { %v969_v57 = vmul.f32 %v967_v53, %v3220_v32 }
 0x1a2   : > { %703 = vrot.lane.b32.xlu1 %v698_v55, %s2974_s19  ;;  %701 = vrot.lane.b32.xlu0 %v697_v56, %s2974_s19 }
 0x1a6   : > { %717 = vrot.lane.b32.xlu1 %v712_v58, %s2975_s21  ;;  %715 = vrot.lane.b32.xlu0 %v711_v59, %s2975_s21  ;;  %v968_v58 = vmul.f32 %v967_v53, %v3222_v34  ;;  %v472_v59 = vmul.f32 %v470_v54, %v3182_v4  ;;  %v598_v53 = vstv %s3354_s20  ;;  %s2624_s20 = sld [smem:[#allocation9 + $0x28]] }
 0x1aa   : > { %739 = vrot.lane.b32.xlu1 %v734_v1, %s2971_s18  ;;  %737 = vrot.lane.b32.xlu0 %v733_v2, %s2971_s18  ;;  %v981_v1 = vstv %s2623_s22  ;;  %s3383_s22 = sld [smem:[#allocation9 + $0xf]] }
 0x1ab   : > { %v983_v8 = vmul.f32 %v981_v1, %v3220_v32 }
 0x1ae   : > { %753 = vrot.lane.b32.xlu1 %v748_v6, %s2970_s17  ;;  %751 = vrot.lane.b32.xlu0 %v747_v7, %s2970_s17 }
 0x1b2   : > { %767 = vrot.lane.b32.xlu1 %v762_v9, %s2974_s19  ;;  %765 = vrot.lane.b32.xlu0 %v761_v10, %s2974_s19  ;;  %v982_v9 = vmul.f32 %v981_v1, %v3222_v34 }
 0x1b6   : > { %781 = vrot.lane.b32.xlu1 %v776_v12, %s2975_s21  ;;  %779 = vrot.lane.b32.xlu0 %v775_v13, %s2975_s21  ;;  %v1003_v12 = vstv %s3320_s25  ;;  %v534_v13 = vstv %s3324_s26  ;;  %s2604_s25 = sld [smem:[#allocation9 + $0x14]]  ;;  %s787_s26 = sld [smem:[#allocation11]] }
 0x1b7   : > { %v536_v26 = vmul.f32 %v534_v13, %v3200_v17 }
 0x1ba   : > { %818 = vrot.lane.b32.xlu1 %v813_v15, %s2971_s18  ;;  %816 = vrot.lane.b32.xlu0 %v812_v16, %s2971_s18 }
 0x1be   : > { %832 = vrot.lane.b32.xlu1 %v827_v20, %s2970_s17  ;;  %830 = vrot.lane.b32.xlu0 %v826_v22, %s2970_s17  ;;  %v1005_v20 = vmul.f32 %v1003_v12, %v3240_v46  ;;  %v1004_v22 = vmul.f32 %v1003_v12, %v3242_v48 }
 0x1c2   : > { %846 = vrot.lane.b32.xlu1 %v841_v24, %s2974_s19  ;;  %844 = vrot.lane.b32.xlu0 %v840_v25, %s2974_s19 }
 0x1c6   : > { %860 = vrot.lane.b32.xlu1 %v855_v27, %s2975_s21  ;;  %858 = vrot.lane.b32.xlu0 %v854_v28, %s2975_s21  ;;  %v535_v27 = vmul.f32 %v534_v13, %v3202_v19  ;;  %v1095_v13 = vstv %s3364_s24  ;;  %s2634_s24 = sld [smem:[#allocation11 + $0x1]] }
 0x1ca   : > { %882 = vrot.lane.b32.xlu1 %v877_v30, %s2971_s18  ;;  %880 = vrot.lane.b32.xlu0 %v876_v31, %s2971_s18 }
 0x1ce   : > { %896 = vrot.lane.b32.xlu1 %v891_v35, %s2970_s17  ;;  %894 = vrot.lane.b32.xlu0 %v890_v36, %s2970_s17  ;;  %v1018_v35 = vmul.f32 %v1017_v23, %v3242_v48  ;;  %v1031_v36 = vstv %s3337_s6  ;;  %s2976_s6 = smov 3  }
 0x1cf   : > { %v1032_v40 = vmul.f32 %v1031_v36, %v3242_v48 }
 0x1d2   : > { %910 = vrot.lane.b32.xlu1 %v905_v38, %s2974_s19  ;;  %908 = vrot.lane.b32.xlu0 %v904_v39, %s2974_s19  ;;  %v1033_v39 = vmul.f32 %v1031_v36, %v3240_v46 }
 0x1d6   : > { %924 = vrot.lane.b32.xlu1 %v919_v41, %s2975_s21  ;;  %922 = vrot.lane.b32.xlu0 %v918_v42, %s2975_s21  ;;  %v1045_v41 = vstv %s2628_s10  ;;  %s2614_s10 = sld [smem:[#allocation9 + $0x1e]] }
 0x1d7   : > { %v1047_v47 = vmul.f32 %v1045_v41, %v3240_v46 }
 0x1da   : > { %946 = vrot.lane.b32.xlu1 %v941_v44, %s2971_s18  ;;  %944 = vrot.lane.b32.xlu0 %v940_v45, %s2971_s18 }
 0x1dc   : > { %v484_v49 = vpop.permute.xlu1 %483  ;;  %v482_v50 = vpop.permute.xlu0 %481 }
 0x1dd   : > { %v488_v2 = vadd.f32 %v484_v49, %v472_v59  ;;  %v487_v3 = vadd.f32 %v482_v50, %v471_v61  ;;  %v1046_v49 = vmul.f32 %v1045_v41, %v3242_v48  ;;  %v1081_v61 = vstv %s3358_s23  ;;  %s2629_s23 = sld [smem:[#allocation9 + $0x2d]] }
 0x1de   : > { %960 = vrot.lane.b32.xlu1 %v955_v51, %s2970_s17  ;;  %958 = vrot.lane.b32.xlu0 %v954_v52, %s2970_s17  ;;  %v1067_v52 = vstv %s2630_s16  ;;  %v1082_v12 = vmul.f32 %v1081_v61, %v3262_v62  ;;  %s2619_s16 = sld [smem:[#allocation9 + $0x23]] }
 0x1df   : > { %v1068_v59 = vmul.f32 %v1067_v52, %v3262_v62 }
 0x1e0   : > { %v498_v55 = vpop.permute.xlu1 %497  ;;  %v496_v56 = vpop.permute.xlu0 %495 }
 0x1e1   : > { %v502_v10 = vadd.f32 %v498_v55, %v488_v2  ;;  %v501_v11 = vadd.f32 %v496_v56, %v487_v3  ;;  %v600_v3 = vmul.f32 %v598_v53, %v3220_v32 }
 0x1e2   : > { %974 = vrot.lane.b32.xlu1 %v969_v57, %s2974_s19  ;;  %972 = vrot.lane.b32.xlu0 %v968_v58, %s2974_s19  ;;  %v1069_v58 = vmul.f32 %v1067_v52, %v3260_v60 }
 0x1e4   : > { %v512_v6 = vpop.permute.xlu1 %511  ;;  %v510_v7 = vpop.permute.xlu0 %509 }
 0x1e5   : > { %v516_v14 = vadd.f32 %v512_v6, %v502_v10  ;;  %v515_v15 = vadd.f32 %v510_v7, %v501_v11  ;;  %v599_v6 = vmul.f32 %v598_v53, %v3222_v34  ;;  %v1083_v11 = vmul.f32 %v1081_v61, %v3260_v60 }
 0x1e6   : > { %988 = vrot.lane.b32.xlu1 %v983_v8, %s2975_s21  ;;  %986 = vrot.lane.b32.xlu0 %v982_v9, %s2975_s21 }
 0x1e8   : > { %v526_v16 = vpop.permute.xlu1 %525  ;;  %v524_v18 = vpop.permute.xlu0 %523 }
 0x1e9   : > { %v530_v24 = vadd.f32 %v526_v16, %v516_v14  ;;  %v529_v25 = vadd.f32 %v524_v18, %v515_v15  ;;  %v1097_v16 = vmul.f32 %v1095_v13, %v3260_v60  ;;  %v1096_v18 = vmul.f32 %v1095_v13, %v3262_v62 }
 0x1ea   : > { %1010 = vrot.lane.b32.xlu1 %v1005_v20, %s2971_s18  ;;  %1008 = vrot.lane.b32.xlu0 %v1004_v22, %s2971_s18  ;;  %v1109_v20 = vstv %s3374_s15  ;;  %s2635_s15 = sld [smem:[#allocation12 + $0x1]] }
 0x1eb   : > { %v538_v28 = vadd.f32 %v536_v26, %v530_v24  ;;  %v537_v29 = vadd.f32 %v535_v27, %v529_v25  ;;  %v1111_v26 = vmul.f32 %v1109_v20, %v3260_v60  ;;  %v1110_v21 = vmul.f32 %v1109_v20, %v3262_v62 }
 0x1ec   : > { %v548_v30 = vpop.permute.xlu1 %547  ;;  %v546_v31 = vpop.permute.xlu0 %545 }
 0x1ed   : > { %v552_v42 = vadd.f32 %v548_v30, %v538_v28  ;;  %v551_v43 = vadd.f32 %v546_v31, %v537_v29  ;;  %v662_v29 = vstv %s3383_s22  ;;  %s2636_s22 = sld [smem:[#allocation12 + $0x2]] }
 0x1ee   : > { %1024 = vrot.lane.b32.xlu1 %v1019_v33, %s2970_s17  ;;  %1022 = vrot.lane.b32.xlu0 %v1018_v35, %s2970_s17 }
 0x1f0   : > { %v562_v37 = vpop.permute.xlu1 %561  ;;  %v560_v38 = vpop.permute.xlu0 %559 }
 0x1f1   : > { %v566_v50 = vadd.f32 %v562_v37, %v552_v42  ;;  %v565_v51 = vadd.f32 %v560_v38, %v551_v43  ;;  %v664_v38 = vmul.f32 %v662_v29, %v3240_v46 }
 0x1f2   : > { %1038 = vrot.lane.b32.xlu1 %v1033_v39, %s2974_s19  ;;  %1036 = vrot.lane.b32.xlu0 %v1032_v40, %s2974_s19  ;;  %v663_v39 = vmul.f32 %v662_v29, %v3242_v48 }
 0x1f4   : > { %v576_v44 = vpop.permute.xlu1 %575  ;;  %v574_v45 = vpop.permute.xlu0 %573 }
 0x1f5   : > { %v580_v54 = vadd.f32 %v576_v44, %v566_v50  ;;  %v579_v55 = vadd.f32 %v574_v45, %v565_v51 }
 0x1f6   : > { %1052 = vrot.lane.b32.xlu1 %v1047_v47, %s2975_s21  ;;  %1050 = vrot.lane.b32.xlu0 %v1046_v49, %s2975_s21 }
 0x1f8   : > { %v590_v56 = vpop.permute.xlu1 %589  ;;  %v588_v57 = vpop.permute.xlu0 %587 }
 0x1f9   : > { %v594_v1 = vadd.f32 %v590_v56, %v580_v54  ;;  %v593_v2 = vadd.f32 %v588_v57, %v579_v55  ;;  %v726_v54 = vstv %s2604_s25  ;;  %s2637_s25 = sld [smem:[#allocation12 + $0x3]] }
 0x1fa   : > { %1074 = vrot.lane.b32.xlu1 %v1069_v58, %s2971_s18  ;;  %1072 = vrot.lane.b32.xlu0 %v1068_v59, %s2971_s18 }
 0x1fb   : > { %v602_v7 = vadd.f32 %v600_v3, %v594_v1  ;;  %v601_v8 = vadd.f32 %v599_v6, %v593_v2  ;;  %v728_v1 = vmul.f32 %v726_v54, %v3260_v60  ;;  %v727_v2 = vmul.f32 %v726_v54, %v3262_v62 }
 0x1fc   : > { %v612_v9 = vpop.permute.xlu1 %611  ;;  %v610_v10 = vpop.permute.xlu0 %609 }
 0x1fd   : > { %v616_v22 = vadd.f32 %v612_v9, %v602_v7  ;;  %v615_v23 = vadd.f32 %v610_v10, %v601_v8 }
 0x1fe   : > { %1088 = vrot.lane.b32.xlu1 %v1083_v11, %s2970_s17  ;;  %1086 = vrot.lane.b32.xlu0 %v1082_v12, %s2970_s17 }
 0x200   : > { %v626_v14 = vpop.permute.xlu1 %625  ;;  %v624_v15 = vpop.permute.xlu0 %623 }
 0x201   : > { %v630_v27 = vadd.f32 %v626_v14, %v616_v22  ;;  %v629_v28 = vadd.f32 %v624_v15, %v615_v23  ;;  %v788_v22 = vstv %s787_s26  ;;  %s2638_s26 = sld [smem:[#allocation12 + $0x4]] }
 0x202   : > { %1102 = vrot.lane.b32.xlu1 %v1097_v16, %s2974_s19  ;;  %1100 = vrot.lane.b32.xlu0 %v1096_v18, %s2974_s19 }
 0x204   : > { %v640_v24 = vpop.permute.xlu1 %639  ;;  %v638_v25 = vpop.permute.xlu0 %637 }
 0x205   : > { %v644_v30 = vadd.f32 %v640_v24, %v630_v27  ;;  %v643_v31 = vadd.f32 %v638_v25, %v629_v28 }
 0x206   : > { %1116 = vrot.lane.b32.xlu1 %v1111_v26, %s2975_s21  ;;  %1114 = vrot.lane.b32.xlu0 %v1110_v21, %s2975_s21 }
 0x208   : > { %v654_v33 = vpop.permute.xlu1 %653  ;;  %v652_v35 = vpop.permute.xlu0 %651 }
 0x209   : > { %v658_v36 = vadd.f32 %v654_v33, %v644_v30  ;;  %v657_v37 = vadd.f32 %v652_v35, %v643_v31  ;;  %v805_v30 = vstv %s2609_s27  ;;  %s2639_s27 = sld [smem:[#allocation12 + $0x5]] }
 0x20a   : > { %v807_v35 = vmul.f32 %v805_v30, %v3182_v4 }
 0x20b   : > { %v666_v40 = vadd.f32 %v664_v38, %v658_v36  ;;  %v665_v41 = vadd.f32 %v663_v39, %v657_v37  ;;  %v806_v36 = vmul.f32 %v805_v30, %v3184_v5 }
 0x20c   : > { %v676_v42 = vpop.permute.xlu1 %675  ;;  %v674_v43 = vpop.permute.xlu0 %673 }
 0x20d   : > { %v680_v47 = vadd.f32 %v676_v42, %v666_v40  ;;  %v679_v49 = vadd.f32 %v674_v43, %v665_v41  ;;  %v869_v43 = vstv %s2614_s10  ;;  %s2642_s10 = sld [smem:[#allocation12 + $0x8]] }
 0x210   : > { %v690_v44 = vpop.permute.xlu1 %689  ;;  %v688_v45 = vpop.permute.xlu0 %687 }
 0x211   : > { %v694_v52 = vadd.f32 %v690_v44, %v680_v47  ;;  %v693_v53 = vadd.f32 %v688_v45, %v679_v49 }
 0x214   : > { %v704_v50 = vpop.permute.xlu1 %703  ;;  %v702_v51 = vpop.permute.xlu0 %701 }
 0x215   : > { %v708_v55 = vadd.f32 %v704_v50, %v694_v52  ;;  %v707_v56 = vadd.f32 %v702_v51, %v693_v53  ;;  %v871_v52 = vmul.f32 %v869_v43, %v3200_v17  ;;  %v870_v53 = vmul.f32 %v869_v43, %v3202_v19 }
 0x218   : > { %v718_v57 = vpop.permute.xlu1 %717  ;;  %v716_v58 = vpop.permute.xlu0 %715 }
 0x219   : > { %v722_v59 = vadd.f32 %v718_v57, %v708_v55  ;;  %v721_v61 = vadd.f32 %v716_v58, %v707_v56 }
 0x21b   : > { %v730_v3 = vadd.f32 %v728_v1, %v722_v59  ;;  %v729_v6 = vadd.f32 %v727_v2, %v721_v61 }
 0x21c   : > { %v740_v7 = vpop.permute.xlu1 %739  ;;  %v738_v8 = vpop.permute.xlu0 %737 }
 0x21d   : > { %v744_v11 = vadd.f32 %v740_v7, %v730_v3  ;;  %v743_v12 = vadd.f32 %v738_v8, %v729_v6  ;;  %v933_v6 = vstv %s2619_s16  ;;  %s2643_s16 = sld [smem:[#allocation12 + $0x9]] }
 0x220   : > { %v754_v9 = vpop.permute.xlu1 %753  ;;  %v752_v10 = vpop.permute.xlu0 %751 }
 0x221   : > { %v758_v15 = vadd.f32 %v754_v9, %v744_v11  ;;  %v757_v16 = vadd.f32 %v752_v10, %v743_v12  ;;  %v935_v11 = vmul.f32 %v933_v6, %v3220_v32  ;;  %v934_v12 = vmul.f32 %v933_v6, %v3222_v34 }
 0x224   : > { %v768_v13 = vpop.permute.xlu1 %767  ;;  %v766_v14 = vpop.permute.xlu0 %765 }
 0x225   : > { %v772_v18 = vadd.f32 %v768_v13, %v758_v15  ;;  %v771_v20 = vadd.f32 %v766_v14, %v757_v16 }
 0x228   : > { %v782_v23 = vpop.permute.xlu1 %781  ;;  %v780_v24 = vpop.permute.xlu0 %779 }
 0x229   : > { %v786_v25 = vadd.f32 %v782_v23, %v772_v18  ;;  %v785_v26 = vadd.f32 %v780_v24, %v771_v20 }
 0x22b   : > { %v790_v21 = vadd.f32 %v788_v22, %v786_v25  ;;  %v789_v27 = vadd.f32 %v788_v22, %v785_v26 }
 0x22c   : > { %v819_v28 = vpop.permute.xlu1 %818  ;;  %v817_v29 = vpop.permute.xlu0 %816 }
 0x22d   : > { %795 = vrot.lane.b32.xlu1 %v790_v21, %s2976_s6  ;;  %793 = vrot.lane.b32.xlu0 %v789_v27, %s2976_s6  ;;  %v823_v37 = vadd.f32 %v819_v28, %v807_v35  ;;  %v822_v38 = vadd.f32 %v817_v29, %v806_v36  ;;  %v997_v27 = vstv %s2624_s20  ;;  %s2977_s20 = smov 123  }
 0x22e   : > { %v998_v35 = vmul.f32 %v997_v27, %v3242_v48 }
 0x230   : > { %v833_v31 = vpop.permute.xlu1 %832  ;;  %v831_v33 = vpop.permute.xlu0 %830 }
 0x231   : > { %v837_v41 = vadd.f32 %v833_v31, %v823_v37  ;;  %v836_v42 = vadd.f32 %v831_v33, %v822_v38  ;;  %v999_v33 = vmul.f32 %v997_v27, %v3240_v46 }
 0x234   : > { %v847_v39 = vpop.permute.xlu1 %846  ;;  %v845_v40 = vpop.permute.xlu0 %844 }
 0x235   : > { %v851_v44 = vadd.f32 %v847_v39, %v837_v41  ;;  %v850_v45 = vadd.f32 %v845_v40, %v836_v42 }
 0x238   : > { %v861_v47 = vpop.permute.xlu1 %860  ;;  %v859_v49 = vpop.permute.xlu0 %858 }
 0x239   : > { %v865_v50 = vadd.f32 %v861_v47, %v851_v44  ;;  %v864_v51 = vadd.f32 %v859_v49, %v850_v45 }
 0x23b   : > { %v873_v4 = vadd.f32 %v871_v52, %v865_v50  ;;  %v872_v54 = vadd.f32 %v870_v53, %v864_v51  ;;  %v1061_v50 = vstv %s2629_s23  ;;  %s2644_s23 = sld [smem:[#allocation12 + $0xa]] }
 0x23c   : > { %v883_v5 = vpop.permute.xlu1 %882  ;;  %v881_v55 = vpop.permute.xlu0 %880 }
 0x23d   : > { %v887_v58 = vadd.f32 %v883_v5, %v873_v4  ;;  %v886_v59 = vadd.f32 %v881_v55, %v872_v54  ;;  %v1063_v54 = vmul.f32 %v1061_v50, %v3260_v60  ;;  %v1062_v5 = vmul.f32 %v1061_v50, %v3262_v62 }
 0x240   : > { %v897_v56 = vpop.permute.xlu1 %896  ;;  %v895_v57 = vpop.permute.xlu0 %894 }
 0x241   : > { %v901_v2 = vadd.f32 %v897_v56, %v887_v58  ;;  %v900_v3 = vadd.f32 %v895_v57, %v886_v59 }
 0x244   : > { %v911_v61 = vpop.permute.xlu1 %910  ;;  %v909_v1 = vpop.permute.xlu0 %908 }
 0x245   : > { %v915_v7 = vadd.f32 %v911_v61, %v901_v2  ;;  %v914_v8 = vadd.f32 %v909_v1, %v900_v3 }
 0x248   : > { %v925_v9 = vpop.permute.xlu1 %924  ;;  %v923_v17 = vpop.permute.xlu0 %922 }
 0x249   : > { %v929_v10 = vadd.f32 %v925_v9, %v915_v7  ;;  %v928_v19 = vadd.f32 %v923_v17, %v914_v8 }
 0x24b   : > { %v937_v13 = vadd.f32 %v935_v11, %v929_v10  ;;  %v936_v14 = vadd.f32 %v934_v12, %v928_v19  ;;  %v1123_v10 = vstv %s2634_s24  ;;  %s2978_s24 = smov 122  }
 0x24c   : > { %v947_v15 = vpop.permute.xlu1 %946  ;;  %v945_v16 = vpop.permute.xlu0 %944 }
 0x24d   : > { %v951_v22 = vadd.f32 %v947_v15, %v937_v13  ;;  %v950_v23 = vadd.f32 %v945_v16, %v936_v14  ;;  %v1146_v16 = vstv %s2635_s15  ;;  %s2645_s15 = sld [smem:[#allocation12 + $0xb]] }
 0x250   : > { %v961_v18 = vpop.permute.xlu1 %960  ;;  %v959_v20 = vpop.permute.xlu0 %958 }
 0x251   : > { %v965_v26 = vadd.f32 %v961_v18, %v951_v22  ;;  %v964_v21 = vadd.f32 %v959_v20, %v950_v23 }
 0x254   : > { %v975_v24 = vpop.permute.xlu1 %974  ;;  %v973_v25 = vpop.permute.xlu0 %972 }
 0x255   : > { %v979_v28 = vadd.f32 %v975_v24, %v965_v26  ;;  %v978_v29 = vadd.f32 %v973_v25, %v964_v21  ;;  %v1160_v24 = vstv %s2636_s22  ;;  %v1174_v21 = vstv %s2637_s25  ;;  %s2646_s22 = sld [smem:[#allocation12 + $0xc]]  ;;  %s2647_s25 = sld [smem:[#allocation12 + $0xd]] }
 0x258   : > { %v989_v30 = vpop.permute.xlu1 %988  ;;  %v987_v32 = vpop.permute.xlu0 %986 }
 0x259   : > { %v993_v31 = vadd.f32 %v989_v30, %v979_v28  ;;  %v992_v34 = vadd.f32 %v987_v32, %v978_v29  ;;  %v1188_v29 = vstv %s2638_s26  ;;  %s2649_s26 = sld [smem:[#allocation12 + $0xf]] }
 0x25b   : > { %v1001_v36 = vadd.f32 %v999_v33, %v993_v31  ;;  %v1000_v37 = vadd.f32 %v998_v35, %v992_v34  ;;  %v1202_v31 = vstv %s2639_s27  ;;  %s2650_s27 = sld [smem:[#allocation12 + $0x10]] }
 0x25c   : > { %v1011_v38 = vpop.permute.xlu1 %1010  ;;  %v1009_v39 = vpop.permute.xlu0 %1008 }
 0x25d   : > { %v1015_v42 = vadd.f32 %v1011_v38, %v1001_v36  ;;  %v1014_v43 = vadd.f32 %v1009_v39, %v1000_v37  ;;  %v1238_v39 = vstv %s2642_s10  ;;  %s2652_s10 = sld [smem:[#allocation12 + $0x12]] }
 0x260   : > { %v1025_v40 = vpop.permute.xlu1 %1024  ;;  %v1023_v41 = vpop.permute.xlu0 %1022 }
 0x261   : > { %v1029_v47 = vadd.f32 %v1025_v40, %v1015_v42  ;;  %v1028_v49 = vadd.f32 %v1023_v41, %v1014_v43  ;;  %v1252_v43 = vstv %s2643_s16  ;;  %s2653_s16 = sld [smem:[#allocation12 + $0x13]] }
 0x264   : > { %v1039_v44 = vpop.permute.xlu1 %1038  ;;  %v1037_v45 = vpop.permute.xlu0 %1036 }
 0x265   : > { %v1043_v51 = vadd.f32 %v1039_v44, %v1029_v47  ;;  %v1042_v52 = vadd.f32 %v1037_v45, %v1028_v49  ;;  %v1266_v47 = vstv %s2644_s23  ;;  %s2654_s23 = sld [smem:[#allocation12 + $0x14]] }
 0x268   : > { %v1053_v53 = vpop.permute.xlu1 %1052  ;;  %v1051_v46 = vpop.permute.xlu0 %1050 }
 0x269   : > { %v1057_v4 = vadd.f32 %v1053_v53, %v1043_v51  ;;  %v1056_v48 = vadd.f32 %v1051_v46, %v1042_v52  ;;  %v1280_v51 = vstv %s2645_s15  ;;  %v1294_v46 = vstv %s2646_s22  ;;  %s2656_s15 = sld [smem:[#allocation12 + $0x16]]  ;;  %s2657_s22 = sld [smem:[#allocation12 + $0x17]] }
 0x26b   : > { %v1065_v55 = vadd.f32 %v1063_v54, %v1057_v4  ;;  %v1064_v56 = vadd.f32 %v1062_v5, %v1056_v48  ;;  %v1308_v54 = vstv %s2647_s25  ;;  %s2658_s25 = sld [smem:[#allocation12 + $0x18]] }
 0x26c   : > { %v1075_v57 = vpop.permute.xlu1 %1074  ;;  %v1073_v58 = vpop.permute.xlu0 %1072 }
 0x26d   : > { %v1079_v1 = vadd.f32 %v1075_v57, %v1065_v55  ;;  %v1078_v2 = vadd.f32 %v1073_v58, %v1064_v56  ;;  %v1330_v57 = vstv %s2649_s26  ;;  %s2659_s26 = sld [smem:[#allocation12 + $0x19]] }
 0x270   : > { %v1089_v59 = vpop.permute.xlu1 %1088  ;;  %v1087_v61 = vpop.permute.xlu0 %1086 }
 0x271   : > { %v1093_v7 = vadd.f32 %v1089_v59, %v1079_v1  ;;  %v1092_v8 = vadd.f32 %v1087_v61, %v1078_v2  ;;  %v1344_v1 = vstv %s2650_s27  ;;  %s2660_s27 = sld [smem:[#allocation12 + $0x1a]] }
 0x274   : > { %v1103_v3 = vpop.permute.xlu1 %1102  ;;  %v1101_v6 = vpop.permute.xlu0 %1100 }
 0x275   : > { %v1107_v9 = vadd.f32 %v1103_v3, %v1093_v7  ;;  %v1106_v17 = vadd.f32 %v1101_v6, %v1092_v8 }
 0x278   : > { %v1117_v19 = vpop.permute.xlu1 %1116  ;;  %v1115_v60 = vpop.permute.xlu0 %1114 }
 0x279   : > { %v1121_v11 = vadd.f32 %v1117_v19, %v1107_v9  ;;  %v1120_v62 = vadd.f32 %v1115_v60, %v1106_v17  ;;  %v1372_v9 = vstv %s2652_s10  ;;  %v1386_v19 = vstv %s2653_s16  ;;  %s2663_s10 = sld [smem:[#allocation12 + $0x1d]]  ;;  %s2664_s16 = sld [smem:[#allocation12 + $0x1e]] }
 0x27b   : > { %v1125_v12 = vadd.f32 %v1123_v10, %v1121_v11  ;;  %v1124_v13 = vadd.f32 %v1123_v10, %v1120_v62  ;;  %v1400_v62 = vstv %s2654_s23  ;;  %s2665_s23 = sld [smem:[#allocation12 + $0x1f]] }
 0x27d   : > { %1130 = vrot.lane.b32.xlu1 %v1125_v12, %s2976_s6  ;;  %1128 = vrot.lane.b32.xlu0 %v1124_v13, %s2976_s6  ;;  %s2640_s6 = sld [smem:[#allocation12 + $0x6]] }
 0x283   : > { %v1216_v35 = vstv %s2640_s6  ;;  %s2651_s6 = sld [smem:[#allocation12 + $0x11]] }
 0x289   : > { %v1358_v6 = vstv %s2651_s6  ;;  %s2661_s6 = sld [smem:[#allocation12 + $0x1b]] }
 0x29f   : > { %v796_v14 = vpop.permute.xlu1 %795  ;;  %v794_v15 = vpop.permute.xlu0 %793 }
 0x2a0   : > { %801 = vst.msk [vmem:[#allocation3 + $0xb] sm:$0xff] %vm799_vm5, %v796_v14  ;;  %800 = vst.msk [vmem:[#allocation3 + $0x3] sm:$0xff] %vm799_vm5, %v794_v15  ;;  %v1422_v15 = vstv %s2656_s15  ;;  %s2666_s15 = sld [smem:[#allocation12 + $0x20]] }
 0x2a7   : > { %v3421_v18 = vld [vmem:[#allocation3] sm:$0xff]  ;;  %v3423_v20 = vld [vmem:[#allocation3 + $0x8] sm:$0xff] }
 0x2a8   : > { %v1148_v22 = vmul.f32 %v1146_v16, %v3423_v20  ;;  %v1147_v23 = vmul.f32 %v1146_v16, %v3421_v18  ;;  %v1162_v25 = vmul.f32 %v1160_v24, %v3423_v20  ;;  %v1161_v26 = vmul.f32 %v1160_v24, %v3421_v18  ;;  %v3446_v37 = vld [vmem:[#allocation3 + $0x9] sm:$0xff]  ;;  %v3449_v40 = vld [vmem:[#allocation3 + $0x1] sm:$0xff] }
 0x2a9   : > { %v1176_v27 = vmul.f32 %v1174_v21, %v3423_v20  ;;  %v1175_v28 = vmul.f32 %v1174_v21, %v3421_v18  ;;  %v1190_v30 = vmul.f32 %v1188_v29, %v3423_v20  ;;  %v1189_v32 = vmul.f32 %v1188_v29, %v3421_v18  ;;  %v3474_v55 = vld [vmem:[#allocation3 + $0xa] sm:$0xff]  ;;  %v3477_v58 = vld [vmem:[#allocation3 + $0x2] sm:$0xff] }
 0x2aa   : > { %1153 = vrot.lane.b32.xlu1 %v1148_v22, %s2971_s18  ;;  %1151 = vrot.lane.b32.xlu0 %v1147_v23, %s2971_s18  ;;  %v1204_v34 = vmul.f32 %v1202_v31, %v3423_v20  ;;  %v1203_v33 = vmul.f32 %v1202_v31, %v3421_v18  ;;  %v1218_v36 = vmul.f32 %v1216_v35, %v3423_v20  ;;  %v3502_v13 = vld [vmem:[#allocation3 + $0xb] sm:$0xff]  ;;  %v3505_v16 = vld [vmem:[#allocation3 + $0x3] sm:$0xff] }
 0x2ab   : > { %v1217_v38 = vmul.f32 %v1216_v35, %v3421_v18  ;;  %v1240_v41 = vmul.f32 %v1238_v39, %v3446_v37  ;;  %v1239_v42 = vmul.f32 %v1238_v39, %v3449_v40  ;;  %v1254_v44 = vmul.f32 %v1252_v43, %v3446_v37 }
 0x2ac   : > { %v1253_v45 = vmul.f32 %v1252_v43, %v3449_v40  ;;  %v1268_v49 = vmul.f32 %v1266_v47, %v3446_v37  ;;  %v1267_v50 = vmul.f32 %v1266_v47, %v3449_v40  ;;  %v1282_v52 = vmul.f32 %v1280_v51, %v3446_v37 }
 0x2ad   : > { %v1281_v53 = vmul.f32 %v1280_v51, %v3449_v40  ;;  %v1296_v4 = vmul.f32 %v1294_v46, %v3446_v37  ;;  %v1295_v48 = vmul.f32 %v1294_v46, %v3449_v40  ;;  %v1310_v5 = vmul.f32 %v1308_v54, %v3446_v37 }
 0x2ae   : > { %1167 = vrot.lane.b32.xlu1 %v1162_v25, %s2970_s17  ;;  %1165 = vrot.lane.b32.xlu0 %v1161_v26, %s2970_s17  ;;  %v1309_v56 = vmul.f32 %v1308_v54, %v3449_v40  ;;  %v1332_v59 = vmul.f32 %v1330_v57, %v3474_v55  ;;  %v1331_v61 = vmul.f32 %v1330_v57, %v3477_v58  ;;  %v1436_v26 = vstv %s2657_s22  ;;  %s2667_s22 = sld [smem:[#allocation12 + $0x21]] }
 0x2af   : > { %v1346_v2 = vmul.f32 %v1344_v1, %v3474_v55  ;;  %v1345_v3 = vmul.f32 %v1344_v1, %v3477_v58  ;;  %v1360_v7 = vmul.f32 %v1358_v6, %v3474_v55  ;;  %v1359_v8 = vmul.f32 %v1358_v6, %v3477_v58 }
 0x2b0   : > { %v1374_v17 = vmul.f32 %v1372_v9, %v3474_v55  ;;  %v1373_v10 = vmul.f32 %v1372_v9, %v3477_v58  ;;  %v1388_v60 = vmul.f32 %v1386_v19, %v3474_v55  ;;  %v1387_v11 = vmul.f32 %v1386_v19, %v3477_v58 }
 0x2b1   : > { %v1402_v12 = vmul.f32 %v1400_v62, %v3474_v55  ;;  %v1401_v14 = vmul.f32 %v1400_v62, %v3477_v58  ;;  %v1424_v24 = vmul.f32 %v1422_v15, %v3502_v13  ;;  %v1423_v25 = vmul.f32 %v1422_v15, %v3505_v16 }
 0x2b2   : > { %1181 = vrot.lane.b32.xlu1 %v1176_v27, %s2974_s19  ;;  %1179 = vrot.lane.b32.xlu0 %v1175_v28, %s2974_s19  ;;  %v1438_v21 = vmul.f32 %v1436_v26, %v3502_v13  ;;  %v1437_v27 = vmul.f32 %v1436_v26, %v3505_v16  ;;  %v1450_v28 = vstv %s2658_s25  ;;  %v1514_v43 = vstv %s2663_s10  ;;  %s2668_s25 = sld [smem:[#allocation12 + $0x22]]  ;;  %s2672_s10 = sld [smem:[#allocation12 + $0x26]] }
 0x2b3   : > { %v1452_v29 = vmul.f32 %v1450_v28, %v3502_v13 }
 0x2b6   : > { %1195 = vrot.lane.b32.xlu1 %v1190_v30, %s2975_s21  ;;  %1193 = vrot.lane.b32.xlu0 %v1189_v32, %s2975_s21  ;;  %v1451_v30 = vmul.f32 %v1450_v28, %v3505_v16  ;;  %v1464_v32 = vstv %s2659_s26  ;;  %s2670_s26 = sld [smem:[#allocation12 + $0x24]] }
 0x2b7   : > { %v1466_v31 = vmul.f32 %v1464_v32, %v3502_v13 }
 0x2ba   : > { %1209 = vrot.lane.b32.xlu1 %v1204_v34, %s2977_s20  ;;  %1207 = vrot.lane.b32.xlu0 %v1203_v33, %s2977_s20  ;;  %v1465_v34 = vmul.f32 %v1464_v32, %v3505_v16  ;;  %v1478_v33 = vstv %s2660_s27  ;;  %s2671_s27 = sld [smem:[#allocation12 + $0x25]] }
 0x2bb   : > { %v1480_v35 = vmul.f32 %v1478_v33, %v3502_v13 }
 0x2be   : > { %1223 = vrot.lane.b32.xlu1 %v1218_v36, %s2978_s24  ;;  %1221 = vrot.lane.b32.xlu0 %v1217_v38, %s2978_s24  ;;  %v1479_v36 = vmul.f32 %v1478_v33, %v3505_v16  ;;  %v1492_v38 = vstv %s2661_s6  ;;  %s1137_s6 = sld [smem:[#allocation12]] }
 0x2bf   : > { %v1494_v39 = vmul.f32 %v1492_v38, %v3502_v13 }
 0x2c2   : > { %1245 = vrot.lane.b32.xlu1 %v1240_v41, %s2971_s18  ;;  %1243 = vrot.lane.b32.xlu0 %v1239_v42, %s2971_s18  ;;  %v3532_v41 = vld [vmem:[#allocation3 + $0xc] sm:$0xff]  ;;  %v1493_v42 = vmul.f32 %v1492_v38, %v3505_v16 }
 0x2c6   : > { %1259 = vrot.lane.b32.xlu1 %v1254_v44, %s2970_s17  ;;  %1257 = vrot.lane.b32.xlu0 %v1253_v45, %s2970_s17  ;;  %v3535_v44 = vld [vmem:[#allocation3 + $0x4] sm:$0xff]  ;;  %v1516_v45 = vmul.f32 %v1514_v43, %v3532_v41 }
 0x2c7   : > { %v1515_v47 = vmul.f32 %v1514_v43, %v3535_v44 }
 0x2ca   : > { %1273 = vrot.lane.b32.xlu1 %v1268_v49, %s2974_s19  ;;  %1271 = vrot.lane.b32.xlu0 %v1267_v50, %s2974_s19  ;;  %v1528_v49 = vstv %s2664_s16  ;;  %s3569_s16 = sld [smem:[#allocation12 + $0x27]] }
 0x2cb   : > { %v1530_v50 = vmul.f32 %v1528_v49, %v3532_v41  ;;  %v1529_v51 = vmul.f32 %v1528_v49, %v3535_v44 }
 0x2ce   : > { %1287 = vrot.lane.b32.xlu1 %v1282_v52, %s2975_s21  ;;  %1285 = vrot.lane.b32.xlu0 %v1281_v53, %s2975_s21  ;;  %v1542_v52 = vstv %s2665_s23  ;;  %s3576_s23 = sld [smem:[#allocation12 + $0x28]] }
 0x2cf   : > { %v1544_v53 = vmul.f32 %v1542_v52, %v3532_v41  ;;  %v1543_v46 = vmul.f32 %v1542_v52, %v3535_v44 }
 0x2d2   : > { %1301 = vrot.lane.b32.xlu1 %v1296_v4, %s2977_s20  ;;  %1299 = vrot.lane.b32.xlu0 %v1295_v48, %s2977_s20  ;;  %v1556_v4 = vstv %s2666_s15  ;;  %s3578_s15 = sld [smem:[#allocation12 + $0x7]] }
 0x2d3   : > { %v1558_v48 = vmul.f32 %v1556_v4, %v3532_v41  ;;  %v1557_v54 = vmul.f32 %v1556_v4, %v3535_v44 }
 0x2d6   : > { %1315 = vrot.lane.b32.xlu1 %v1310_v5, %s2978_s24  ;;  %1313 = vrot.lane.b32.xlu0 %v1309_v56, %s2978_s24  ;;  %v1570_v5 = vstv %s2667_s22  ;;  %s3586_s22 = sld [smem:[#allocation12 + $0x29]] }
 0x2d7   : > { %v1572_v56 = vmul.f32 %v1570_v5, %v3532_v41  ;;  %v1571_v57 = vmul.f32 %v1570_v5, %v3535_v44 }
 0x2da   : > { %1337 = vrot.lane.b32.xlu1 %v1332_v59, %s2971_s18  ;;  %1335 = vrot.lane.b32.xlu0 %v1331_v61, %s2971_s18  ;;  %v1584_v59 = vstv %s2668_s25  ;;  %s3593_s25 = sld [smem:[#allocation12 + $0x2b]] }
 0x2db   : > { %v1586_v1 = vmul.f32 %v1584_v59, %v3532_v41  ;;  %v1585_v6 = vmul.f32 %v1584_v59, %v3535_v44 }
 0x2dc   : > { %v1676_v4 = vstv %s3586_s22  ;;  %s2685_s22 = sld [smem:[#allocation12 + $0x33]] }
 0x2de   : > { %1351 = vrot.lane.b32.xlu1 %v1346_v2, %s2970_s17  ;;  %1349 = vrot.lane.b32.xlu0 %v1345_v3, %s2970_s17  ;;  %v3560_v2 = vld [vmem:[#allocation3 + $0xd] sm:$0xff] }
 0x2df   : > { %v1678_v59 = vmul.f32 %v1676_v4, %v3560_v2 }
 0x2e2   : > { %1365 = vrot.lane.b32.xlu1 %v1360_v7, %s2974_s19  ;;  %1363 = vrot.lane.b32.xlu0 %v1359_v8, %s2974_s19  ;;  %v1606_v7 = vstv %s2670_s26  ;;  %v3563_v8 = vld [vmem:[#allocation3 + $0x5] sm:$0xff]  ;;  %s2678_s26 = sld [smem:[#allocation12 + $0x2c]] }
 0x2e3   : > { %v1607_v19 = vmul.f32 %v1606_v7, %v3563_v8 }
 0x2e6   : > { %1379 = vrot.lane.b32.xlu1 %v1374_v17, %s2975_s21  ;;  %1377 = vrot.lane.b32.xlu0 %v1373_v10, %s2975_s21  ;;  %v1608_v17 = vmul.f32 %v1606_v7, %v3560_v2 }
 0x2ea   : > { %1393 = vrot.lane.b32.xlu1 %v1388_v60, %s2977_s20  ;;  %1391 = vrot.lane.b32.xlu0 %v1387_v11, %s2977_s20  ;;  %v1620_v60 = vstv %s2671_s27  ;;  %v1140_v11 = vstv %s1137_s6  ;;  %s2679_s27 = sld [smem:[#allocation12 + $0x2d]]  ;;  %s2680_s6 = sld [smem:[#allocation12 + $0x2e]] }
 0x2ee   : > { %1407 = vrot.lane.b32.xlu1 %v1402_v12, %s2978_s24  ;;  %1405 = vrot.lane.b32.xlu0 %v1401_v14, %s2978_s24  ;;  %v1622_v12 = vmul.f32 %v1620_v60, %v3560_v2  ;;  %v1142_v14 = vmul.f32 %v1140_v11, %v3423_v20 }
 0x2ef   : > { %v1131_v22 = vpop.permute.xlu1 %1130  ;;  %v1129_v23 = vpop.permute.xlu0 %1128 }
 0x2f0   : > { %1136 = vst.msk [vmem:[#allocation3 + $0x23] sm:$0xff] %vm799_vm5, %v1131_v22  ;;  %1135 = vst.msk [vmem:[#allocation3 + $0x1b] sm:$0xff] %vm799_vm5, %v1129_v23  ;;  %v1621_v22 = vmul.f32 %v1620_v60, %v3563_v8  ;;  %v1634_v23 = vstv %s2672_s10  ;;  %s3620_s10 = sld [smem:[#allocation12 + $0x2f]] }
 0x2f1   : > { %v1636_v20 = vmul.f32 %v1634_v23, %v3560_v2 }
 0x2f2   : > { %1429 = vrot.lane.b32.xlu1 %v1424_v24, %s2971_s18  ;;  %1427 = vrot.lane.b32.xlu0 %v1423_v25, %s2971_s18  ;;  %v1141_v24 = vmul.f32 %v1140_v11, %v3421_v18 }
 0x2f6   : > { %1443 = vrot.lane.b32.xlu1 %v1438_v21, %s2970_s17  ;;  %1441 = vrot.lane.b32.xlu0 %v1437_v27, %s2970_s17 }
 0x2fa   : > { %1457 = vrot.lane.b32.xlu1 %v1452_v29, %s2974_s19  ;;  %1455 = vrot.lane.b32.xlu0 %v1451_v30, %s2974_s19  ;;  %v1635_v29 = vmul.f32 %v1634_v23, %v3563_v8  ;;  %v1648_v30 = vstv %s3569_s16  ;;  %s3622_s16 = sld [smem:[#allocation12 + $0xe]] }
 0x2fb   : > { %v1650_v33 = vmul.f32 %v1648_v30, %v3560_v2  ;;  %v1649_v38 = vmul.f32 %v1648_v30, %v3563_v8 }
 0x2fe   : > { %1471 = vrot.lane.b32.xlu1 %v1466_v31, %s2975_s21  ;;  %1469 = vrot.lane.b32.xlu0 %v1465_v34, %s2975_s21 }
 0x302   : > { %1485 = vrot.lane.b32.xlu1 %v1480_v35, %s2977_s20  ;;  %1483 = vrot.lane.b32.xlu0 %v1479_v36, %s2977_s20 }
 0x306   : > { %1499 = vrot.lane.b32.xlu1 %v1494_v39, %s2978_s24  ;;  %1497 = vrot.lane.b32.xlu0 %v1493_v42, %s2978_s24  ;;  %v1662_v39 = vstv %s3576_s23  ;;  %v1232_v42 = vstv %s3578_s15  ;;  %s3628_s23 = sld [smem:[#allocation12 + $0x30]]  ;;  %s3635_s15 = sld [smem:[#allocation12 + $0x32]] }
 0x30a   : > { %1521 = vrot.lane.b32.xlu1 %v1516_v45, %s2971_s18  ;;  %1519 = vrot.lane.b32.xlu0 %v1515_v47, %s2971_s18 }
 0x30e   : > { %1535 = vrot.lane.b32.xlu1 %v1530_v50, %s2970_s17  ;;  %1533 = vrot.lane.b32.xlu0 %v1529_v51, %s2970_s17  ;;  %v1664_v50 = vmul.f32 %v1662_v39, %v3560_v2  ;;  %v1234_v51 = vmul.f32 %v1232_v42, %v3446_v37  ;;  %v3606_v37 = vld [vmem:[#allocation3 + $0xe] sm:$0xff] }
 0x312   : > { %1549 = vrot.lane.b32.xlu1 %v1544_v53, %s2974_s19  ;;  %1547 = vrot.lane.b32.xlu0 %v1543_v46, %s2974_s19  ;;  %v1663_v46 = vmul.f32 %v1662_v39, %v3563_v8 }
 0x316   : > { %1563 = vrot.lane.b32.xlu1 %v1558_v48, %s2975_s21  ;;  %1561 = vrot.lane.b32.xlu0 %v1557_v54, %s2975_s21  ;;  %v1233_v48 = vmul.f32 %v1232_v42, %v3449_v40 }
 0x31a   : > { %1577 = vrot.lane.b32.xlu1 %v1572_v56, %s2977_s20  ;;  %1575 = vrot.lane.b32.xlu0 %v1571_v57, %s2977_s20 }
 0x31c   : > { %v1154_v61 = vpop.permute.xlu1 %1153  ;;  %v1152_v3 = vpop.permute.xlu0 %1151 }
 0x31d   : > { %v1158_v25 = vadd.f32 %v1154_v61, %v1142_v14  ;;  %v1157_v26 = vadd.f32 %v1152_v3, %v1141_v24  ;;  %v1698_v3 = vstv %s3593_s25  ;;  %s2686_s25 = sld [smem:[#allocation12 + $0x34]] }
 0x31e   : > { %1591 = vrot.lane.b32.xlu1 %v1586_v1, %s2978_s24  ;;  %1589 = vrot.lane.b32.xlu0 %v1585_v6, %s2978_s24  ;;  %v1677_v1 = vmul.f32 %v1676_v4, %v3563_v8  ;;  %v3610_v6 = vld [vmem:[#allocation3 + $0x6] sm:$0xff]  ;;  %v1700_v7 = vmul.f32 %v1698_v3, %v3606_v37 }
 0x320   : > { %v1168_v9 = vpop.permute.xlu1 %1167  ;;  %v1166_v10 = vpop.permute.xlu0 %1165 }
 0x321   : > { %v1172_v27 = vadd.f32 %v1168_v9, %v1158_v25  ;;  %v1171_v32 = vadd.f32 %v1166_v10, %v1157_v26  ;;  %v1712_v10 = vstv %s2678_s26  ;;  %s2687_s26 = sld [smem:[#allocation12 + $0x35]] }
 0x322   : > { %1613 = vrot.lane.b32.xlu1 %v1608_v17, %s2971_s18  ;;  %1611 = vrot.lane.b32.xlu0 %v1607_v19, %s2971_s18  ;;  %v1699_v17 = vmul.f32 %v1698_v3, %v3610_v6  ;;  %v1714_v60 = vmul.f32 %v1712_v10, %v3606_v37  ;;  %v1804_v3 = vstv %s2685_s22  ;;  %s2694_s22 = sld [smem:[#allocation12 + $0x3c]] }
 0x324   : > { %v1182_v62 = vpop.permute.xlu1 %1181  ;;  %v1180_v15 = vpop.permute.xlu0 %1179 }
 0x325   : > { %v1186_v18 = vadd.f32 %v1182_v62, %v1172_v27  ;;  %v1185_v31 = vadd.f32 %v1180_v15, %v1171_v32  ;;  %v1713_v62 = vmul.f32 %v1712_v10, %v3610_v6  ;;  %v1818_v10 = vstv %s2686_s25  ;;  %s3704_s25 = sld [smem:[#allocation12 + $0x3d]] }
 0x326   : > { %1627 = vrot.lane.b32.xlu1 %v1622_v12, %s2970_s17  ;;  %1625 = vrot.lane.b32.xlu0 %v1621_v22, %s2970_s17  ;;  %v1726_v12 = vstv %s2679_s27  ;;  %s3662_s27 = sld [smem:[#allocation12 + $0x36]] }
 0x327   : > { %v1728_v23 = vmul.f32 %v1726_v12, %v3606_v37  ;;  %v1727_v26 = vmul.f32 %v1726_v12, %v3610_v6 }
 0x328   : > { %v1196_v21 = vpop.permute.xlu1 %1195  ;;  %v1194_v28 = vpop.permute.xlu0 %1193 }
 0x329   : > { %v1200_v35 = vadd.f32 %v1196_v21, %v1186_v18  ;;  %v1199_v43 = vadd.f32 %v1194_v28, %v1185_v31  ;;  %v1740_v21 = vstv %s2680_s6  ;;  %s3664_s6 = sld [smem:[#allocation12 + $0x15]] }
 0x32a   : > { %1641 = vrot.lane.b32.xlu1 %v1636_v20, %s2974_s19  ;;  %1639 = vrot.lane.b32.xlu0 %v1635_v29, %s2974_s19  ;;  %v1742_v30 = vmul.f32 %v1740_v21, %v3606_v37  ;;  %v1741_v31 = vmul.f32 %v1740_v21, %v3610_v6 }
 0x32c   : > { %v1210_v34 = vpop.permute.xlu1 %1209  ;;  %v1208_v36 = vpop.permute.xlu0 %1207 }
 0x32d   : > { %v1214_v45 = vadd.f32 %v1210_v34, %v1200_v35  ;;  %v1213_v47 = vadd.f32 %v1208_v36, %v1199_v43  ;;  %v1754_v34 = vstv %s3620_s10  ;;  %s3670_s10 = sld [smem:[#allocation12 + $0x37]] }
 0x32e   : > { %1655 = vrot.lane.b32.xlu1 %v1650_v33, %s2975_s21  ;;  %1653 = vrot.lane.b32.xlu0 %v1649_v38, %s2975_s21  ;;  %v1324_v33 = vstv %s3622_s16  ;;  %v1756_v42 = vmul.f32 %v1754_v34, %v3606_v37  ;;  %s3677_s16 = sld [smem:[#allocation12 + $0x39]] }
 0x32f   : > { %v1326_v43 = vmul.f32 %v1324_v33, %v3474_v55 }
 0x330   : > { %v1224_v49 = vpop.permute.xlu1 %1223  ;;  %v1222_v53 = vpop.permute.xlu0 %1221 }
 0x331   : > { %v1228_v52 = vadd.f32 %v1224_v49, %v1214_v45  ;;  %v1227_v54 = vadd.f32 %v1222_v53, %v1213_v47  ;;  %v1755_v49 = vmul.f32 %v1754_v34, %v3610_v6 }
 0x332   : > { %1669 = vrot.lane.b32.xlu1 %v1664_v50, %s2977_s20  ;;  %1667 = vrot.lane.b32.xlu0 %v1663_v46, %s2977_s20  ;;  %v1768_v50 = vstv %s3628_s23  ;;  %s2692_s23 = sld [smem:[#allocation12 + $0x3a]] }
 0x333   : > { %v1236_v5 = vadd.f32 %v1234_v51, %v1228_v52  ;;  %v1235_v56 = vadd.f32 %v1233_v48, %v1227_v54  ;;  %v1325_v51 = vmul.f32 %v1324_v33, %v3477_v58  ;;  %v1770_v48 = vmul.f32 %v1768_v50, %v3606_v37  ;;  %v3653_v58 = vld [vmem:[#allocation3 + $0x18] sm:$0xff] }
 0x334   : > { %v1246_v57 = vpop.permute.xlu1 %1245  ;;  %v1244_v61 = vpop.permute.xlu0 %1243  ;;  %v1769_v54 = vmul.f32 %v1768_v50, %v3610_v6 }
 0x335   : > { %v1250_v14 = vadd.f32 %v1246_v57, %v1236_v5  ;;  %v1249_v15 = vadd.f32 %v1244_v61, %v1235_v56  ;;  %v3649_v5 = vld [vmem:[#allocation3 + $0x20] sm:$0xff]  ;;  %v1790_v56 = vstv %s3635_s15  ;;  %s2693_s15 = sld [smem:[#allocation12 + $0x3b]] }
 0x336   : > { %1683 = vrot.lane.b32.xlu1 %v1678_v59, %s2978_s24  ;;  %1681 = vrot.lane.b32.xlu0 %v1677_v1, %s2978_s24  ;;  %v1792_v59 = vmul.f32 %v1790_v56, %v3649_v5  ;;  %v1791_v1 = vmul.f32 %v1790_v56, %v3653_v58 }
 0x338   : > { %v1260_v40 = vpop.permute.xlu1 %1259  ;;  %v1258_v9 = vpop.permute.xlu0 %1257  ;;  %v1896_v56 = vstv %s2692_s23  ;;  %s2701_s23 = sld [smem:[#allocation12 + $0x43]] }
 0x339   : > { %v1264_v24 = vadd.f32 %v1260_v40, %v1250_v14  ;;  %v1263_v20 = vadd.f32 %v1258_v9, %v1249_v15  ;;  %v1819_v15 = vmul.f32 %v1818_v10, %v3653_v58 }
 0x33a   : > { %1705 = vrot.lane.b32.xlu1 %v1700_v7, %s2971_s18  ;;  %1703 = vrot.lane.b32.xlu0 %v1699_v17, %s2971_s18  ;;  %v1806_v7 = vmul.f32 %v1804_v3, %v3649_v5  ;;  %v1805_v17 = vmul.f32 %v1804_v3, %v3653_v58 }
 0x33b   : > { %v1910_v3 = vstv %s2693_s15  ;;  %s3746_s15 = sld [smem:[#allocation12 + $0x44]] }
 0x33c   : > { %v1274_v19 = vpop.permute.xlu1 %1273  ;;  %v1272_v11 = vpop.permute.xlu0 %1271 }
 0x33d   : > { %v1278_v27 = vadd.f32 %v1274_v19, %v1264_v24  ;;  %v1277_v28 = vadd.f32 %v1272_v11, %v1263_v20 }
 0x33e   : > { %1719 = vrot.lane.b32.xlu1 %v1714_v60, %s2970_s17  ;;  %1717 = vrot.lane.b32.xlu0 %v1713_v62, %s2970_s17  ;;  %v1820_v62 = vmul.f32 %v1818_v10, %v3649_v5 }
 0x340   : > { %v1288_v22 = vpop.permute.xlu1 %1287  ;;  %v1286_v25 = vpop.permute.xlu0 %1285 }
 0x341   : > { %v1292_v32 = vadd.f32 %v1288_v22, %v1278_v27  ;;  %v1291_v35 = vadd.f32 %v1286_v25, %v1277_v28  ;;  %v1832_v22 = vstv %s2687_s26  ;;  %s3706_s26 = sld [smem:[#allocation12 + $0x1c]] }
 0x342   : > { %1733 = vrot.lane.b32.xlu1 %v1728_v23, %s2974_s19  ;;  %1731 = vrot.lane.b32.xlu0 %v1727_v26, %s2974_s19  ;;  %v1834_v21 = vmul.f32 %v1832_v22, %v3649_v5  ;;  %v1833_v28 = vmul.f32 %v1832_v22, %v3653_v58 }
 0x344   : > { %v1302_v29 = vpop.permute.xlu1 %1301  ;;  %v1300_v18 = vpop.permute.xlu0 %1299 }
 0x345   : > { %v1306_v36 = vadd.f32 %v1302_v29, %v1292_v32  ;;  %v1305_v38 = vadd.f32 %v1300_v18, %v1291_v35  ;;  %v1846_v29 = vstv %s3662_s27  ;;  %s3712_s27 = sld [smem:[#allocation12 + $0x3e]] }
 0x346   : > { %1747 = vrot.lane.b32.xlu1 %v1742_v30, %s2975_s21  ;;  %1745 = vrot.lane.b32.xlu0 %v1741_v31, %s2975_s21  ;;  %v1416_v30 = vstv %s3664_s6  ;;  %v1848_v33 = vmul.f32 %v1846_v29, %v3649_v5  ;;  %s3719_s6 = sld [smem:[#allocation12 + $0x40]] }
 0x347   : > { %v1418_v35 = vmul.f32 %v1416_v30, %v3502_v13 }
 0x348   : > { %v1316_v39 = vpop.permute.xlu1 %1315  ;;  %v1314_v47 = vpop.permute.xlu0 %1313 }
 0x349   : > { %v1320_v45 = vadd.f32 %v1316_v39, %v1306_v36  ;;  %v1319_v52 = vadd.f32 %v1314_v47, %v1305_v38  ;;  %v1847_v39 = vmul.f32 %v1846_v29, %v3653_v58 }
 0x34a   : > { %1761 = vrot.lane.b32.xlu1 %v1756_v42, %s2977_s20  ;;  %1759 = vrot.lane.b32.xlu0 %v1755_v49, %s2977_s20  ;;  %v1860_v42 = vstv %s3670_s10  ;;  %s2699_s10 = sld [smem:[#allocation12 + $0x41]] }
 0x34b   : > { %v1328_v53 = vadd.f32 %v1326_v43, %v1320_v45  ;;  %v1327_v46 = vadd.f32 %v1325_v51, %v1319_v52  ;;  %v1417_v43 = vmul.f32 %v1416_v30, %v3505_v16  ;;  %v1862_v51 = vmul.f32 %v1860_v42, %v3649_v5  ;;  %v3695_v16 = vld [vmem:[#allocation3 + $0x19] sm:$0xff] }
 0x34c   : > { %v1338_v4 = vpop.permute.xlu1 %1337  ;;  %v1336_v55 = vpop.permute.xlu0 %1335  ;;  %v1861_v52 = vmul.f32 %v1860_v42, %v3653_v58 }
 0x34d   : > { %v1342_v19 = vadd.f32 %v1338_v4, %v1328_v53  ;;  %v1341_v60 = vadd.f32 %v1336_v55, %v1327_v46  ;;  %v3691_v53 = vld [vmem:[#allocation3 + $0x21] sm:$0xff]  ;;  %v1882_v46 = vstv %s3677_s16  ;;  %s2700_s16 = sld [smem:[#allocation12 + $0x42]] }
 0x34e   : > { %1775 = vrot.lane.b32.xlu1 %v1770_v48, %s2978_s24  ;;  %1773 = vrot.lane.b32.xlu0 %v1769_v54, %s2978_s24  ;;  %v1884_v48 = vmul.f32 %v1882_v46, %v3691_v53  ;;  %v1883_v54 = vmul.f32 %v1882_v46, %v3695_v16 }
 0x350   : > { %v1352_v57 = vpop.permute.xlu1 %1351  ;;  %v1350_v61 = vpop.permute.xlu0 %1349  ;;  %v1988_v46 = vstv %s2699_s10  ;;  %s2708_s10 = sld [smem:[#allocation12 + $0x4a]] }
 0x351   : > { %v1356_v12 = vadd.f32 %v1352_v57, %v1342_v19  ;;  %v1355_v23 = vadd.f32 %v1350_v61, %v1341_v60  ;;  %v1911_v60 = vmul.f32 %v1910_v3, %v3695_v16 }
 0x352   : > { %1797 = vrot.lane.b32.xlu1 %v1792_v59, %s2971_s18  ;;  %1795 = vrot.lane.b32.xlu0 %v1791_v1, %s2971_s18  ;;  %v1898_v59 = vmul.f32 %v1896_v56, %v3691_v53  ;;  %v1897_v1 = vmul.f32 %v1896_v56, %v3695_v16 }
 0x353   : > { %v2002_v56 = vstv %s2700_s16  ;;  %s3788_s16 = sld [smem:[#allocation12 + $0x4b]] }
 0x354   : > { %v1366_v40 = vpop.permute.xlu1 %1365  ;;  %v1364_v9 = vpop.permute.xlu0 %1363 }
 0x355   : > { %v1370_v24 = vadd.f32 %v1366_v40, %v1356_v12  ;;  %v1369_v25 = vadd.f32 %v1364_v9, %v1355_v23 }
 0x356   : > { %1811 = vrot.lane.b32.xlu1 %v1806_v7, %s2970_s17  ;;  %1809 = vrot.lane.b32.xlu0 %v1805_v17, %s2970_s17  ;;  %v1912_v17 = vmul.f32 %v1910_v3, %v3691_v53 }
 0x358   : > { %v1380_v11 = vpop.permute.xlu1 %1379  ;;  %v1378_v14 = vpop.permute.xlu0 %1377 }
 0x359   : > { %v1384_v20 = vadd.f32 %v1380_v11, %v1370_v24  ;;  %v1383_v32 = vadd.f32 %v1378_v14, %v1369_v25  ;;  %v1924_v11 = vstv %s2694_s22  ;;  %s3748_s22 = sld [smem:[#allocation12 + $0x23]] }
 0x35a   : > { %1825 = vrot.lane.b32.xlu1 %v1820_v62, %s2974_s19  ;;  %1823 = vrot.lane.b32.xlu0 %v1819_v15, %s2974_s19  ;;  %v1926_v22 = vmul.f32 %v1924_v11, %v3691_v53  ;;  %v1925_v25 = vmul.f32 %v1924_v11, %v3695_v16 }
 0x35c   : > { %v1394_v26 = vpop.permute.xlu1 %1393  ;;  %v1392_v27 = vpop.permute.xlu0 %1391 }
 0x35d   : > { %v1398_v18 = vadd.f32 %v1394_v26, %v1384_v20  ;;  %v1397_v31 = vadd.f32 %v1392_v27, %v1383_v32  ;;  %v1938_v26 = vstv %s3704_s25  ;;  %s3754_s25 = sld [smem:[#allocation12 + $0x45]] }
 0x35e   : > { %1839 = vrot.lane.b32.xlu1 %v1834_v21, %s2975_s21  ;;  %1837 = vrot.lane.b32.xlu0 %v1833_v28, %s2975_s21  ;;  %v1508_v21 = vstv %s3706_s26  ;;  %v1940_v30 = vmul.f32 %v1938_v26, %v3691_v53  ;;  %s3761_s26 = sld [smem:[#allocation12 + $0x47]] }
 0x35f   : > { %v1510_v32 = vmul.f32 %v1508_v21, %v3532_v41 }
 0x360   : > { %v1408_v34 = vpop.permute.xlu1 %1407  ;;  %v1406_v38 = vpop.permute.xlu0 %1405 }
 0x361   : > { %v1412_v36 = vadd.f32 %v1408_v34, %v1398_v18  ;;  %v1411_v45 = vadd.f32 %v1406_v38, %v1397_v31  ;;  %v1939_v34 = vmul.f32 %v1938_v26, %v3695_v16 }
 0x362   : > { %1853 = vrot.lane.b32.xlu1 %v1848_v33, %s2977_s20  ;;  %1851 = vrot.lane.b32.xlu0 %v1847_v39, %s2977_s20  ;;  %v1952_v33 = vstv %s3712_s27  ;;  %s2706_s27 = sld [smem:[#allocation12 + $0x48]] }
 0x363   : > { %v1420_v47 = vadd.f32 %v1418_v35, %v1412_v36  ;;  %v1419_v49 = vadd.f32 %v1417_v43, %v1411_v45  ;;  %v1509_v35 = vmul.f32 %v1508_v21, %v3535_v44  ;;  %v1954_v43 = vmul.f32 %v1952_v33, %v3691_v53  ;;  %v3737_v44 = vld [vmem:[#allocation3 + $0x1a] sm:$0xff] }
 0x364   : > { %v1430_v50 = vpop.permute.xlu1 %1429  ;;  %v1428_v13 = vpop.permute.xlu0 %1427  ;;  %v1953_v45 = vmul.f32 %v1952_v33, %v3695_v16 }
 0x365   : > { %v1434_v40 = vadd.f32 %v1430_v50, %v1420_v47  ;;  %v1433_v7 = vadd.f32 %v1428_v13, %v1419_v49  ;;  %v3733_v47 = vld [vmem:[#allocation3 + $0x22] sm:$0xff]  ;;  %v1974_v49 = vstv %s3719_s6  ;;  %s2707_s6 = sld [smem:[#allocation12 + $0x49]] }
 0x366   : > { %1867 = vrot.lane.b32.xlu1 %v1862_v51, %s2978_s24  ;;  %1865 = vrot.lane.b32.xlu0 %v1861_v52, %s2978_s24  ;;  %v1976_v51 = vmul.f32 %v1974_v49, %v3733_v47  ;;  %v1975_v52 = vmul.f32 %v1974_v49, %v3737_v44 }
 0x368   : > { %v1444_v4 = vpop.permute.xlu1 %1443  ;;  %v1442_v55 = vpop.permute.xlu0 %1441  ;;  %v2080_v49 = vstv %s2706_s27  ;;  %s2715_s27 = sld [smem:[#allocation12 + $0x51]] }
 0x369   : > { %v1448_v10 = vadd.f32 %v1444_v4, %v1434_v40  ;;  %v1447_v62 = vadd.f32 %v1442_v55, %v1433_v7  ;;  %v2003_v7 = vmul.f32 %v2002_v56, %v3737_v44 }
 0x36a   : > { %1889 = vrot.lane.b32.xlu1 %v1884_v48, %s2971_s18  ;;  %1887 = vrot.lane.b32.xlu0 %v1883_v54, %s2971_s18  ;;  %v1990_v48 = vmul.f32 %v1988_v46, %v3733_v47  ;;  %v1989_v54 = vmul.f32 %v1988_v46, %v3737_v44 }
 0x36b   : > { %v2094_v46 = vstv %s2707_s6  ;;  %s3833_s6 = sld [smem:[#allocation12 + $0x52]] }
 0x36c   : > { %v1458_v57 = vpop.permute.xlu1 %1457  ;;  %v1456_v61 = vpop.permute.xlu0 %1455 }
 0x36d   : > { %v1462_v12 = vadd.f32 %v1458_v57, %v1448_v10  ;;  %v1461_v14 = vadd.f32 %v1456_v61, %v1447_v62 }
 0x36e   : > { %1903 = vrot.lane.b32.xlu1 %v1898_v59, %s2970_s17  ;;  %1901 = vrot.lane.b32.xlu0 %v1897_v1, %s2970_s17  ;;  %v2004_v1 = vmul.f32 %v2002_v56, %v3733_v47 }
 0x370   : > { %v1472_v9 = vpop.permute.xlu1 %1471  ;;  %v1470_v19 = vpop.permute.xlu0 %1469 }
 0x371   : > { %v1476_v23 = vadd.f32 %v1472_v9, %v1462_v12  ;;  %v1475_v20 = vadd.f32 %v1470_v19, %v1461_v14  ;;  %v2016_v9 = vstv %s2701_s23  ;;  %s3790_s23 = sld [smem:[#allocation12 + $0x2a]] }
 0x372   : > { %1917 = vrot.lane.b32.xlu1 %v1912_v17, %s2974_s19  ;;  %1915 = vrot.lane.b32.xlu0 %v1911_v60, %s2974_s19  ;;  %v2018_v11 = vmul.f32 %v2016_v9, %v3733_v47  ;;  %v2017_v14 = vmul.f32 %v2016_v9, %v3737_v44 }
 0x374   : > { %v1486_v15 = vpop.permute.xlu1 %1485  ;;  %v1484_v24 = vpop.permute.xlu0 %1483 }
 0x375   : > { %v1490_v27 = vadd.f32 %v1486_v15, %v1476_v23  ;;  %v1489_v28 = vadd.f32 %v1484_v24, %v1475_v20  ;;  %v2030_v15 = vstv %s3746_s15  ;;  %s3796_s15 = sld [smem:[#allocation12 + $0x4c]] }
 0x376   : > { %1931 = vrot.lane.b32.xlu1 %v1926_v22, %s2975_s21  ;;  %1929 = vrot.lane.b32.xlu0 %v1925_v25, %s2975_s21  ;;  %v1600_v22 = vstv %s3748_s22  ;;  %v2032_v21 = vmul.f32 %v2030_v15, %v3733_v47  ;;  %s3803_s22 = sld [smem:[#allocation12 + $0x4e]] }
 0x377   : > { %v1602_v20 = vmul.f32 %v1600_v22, %v3560_v2 }
 0x378   : > { %v1500_v29 = vpop.permute.xlu1 %1499  ;;  %v1498_v31 = vpop.permute.xlu0 %1497 }
 0x379   : > { %v1504_v18 = vadd.f32 %v1500_v29, %v1490_v27  ;;  %v1503_v36 = vadd.f32 %v1498_v31, %v1489_v28  ;;  %v2031_v29 = vmul.f32 %v2030_v15, %v3737_v44 }
 0x37a   : > { %1945 = vrot.lane.b32.xlu1 %v1940_v30, %s2977_s20  ;;  %1943 = vrot.lane.b32.xlu0 %v1939_v34, %s2977_s20  ;;  %v2044_v30 = vstv %s3754_s25  ;;  %s3812_s25 = sld [smem:[#allocation12 + $0x4f]] }
 0x37b   : > { %v1512_v38 = vadd.f32 %v1510_v32, %v1504_v18  ;;  %v1511_v39 = vadd.f32 %v1509_v35, %v1503_v36  ;;  %v1601_v32 = vmul.f32 %v1600_v22, %v3563_v8  ;;  %v2046_v35 = vmul.f32 %v2044_v30, %v3733_v47  ;;  %v3779_v8 = vld [vmem:[#allocation3 + $0x1b] sm:$0xff] }
 0x37c   : > { %v1522_v42 = vpop.permute.xlu1 %1521  ;;  %v1520_v41 = vpop.permute.xlu0 %1519  ;;  %v2045_v36 = vmul.f32 %v2044_v30, %v3737_v44 }
 0x37d   : > { %v1526_v57 = vadd.f32 %v1522_v42, %v1512_v38  ;;  %v1525_v59 = vadd.f32 %v1520_v41, %v1511_v39  ;;  %v3775_v38 = vld [vmem:[#allocation3 + $0x23] sm:$0xff]  ;;  %v2066_v39 = vstv %s3761_s26  ;;  %s2714_s26 = sld [smem:[#allocation12 + $0x50]] }
 0x37e   : > { %1959 = vrot.lane.b32.xlu1 %v1954_v43, %s2978_s24  ;;  %1957 = vrot.lane.b32.xlu0 %v1953_v45, %s2978_s24  ;;  %v2068_v43 = vmul.f32 %v2066_v39, %v3775_v38  ;;  %v2067_v45 = vmul.f32 %v2066_v39, %v3779_v8 }
 0x380   : > { %v1536_v50 = vpop.permute.xlu1 %1535  ;;  %v1534_v13 = vpop.permute.xlu0 %1533 }
 0x381   : > { %v1540_v3 = vadd.f32 %v1536_v50, %v1526_v57  ;;  %v1539_v17 = vadd.f32 %v1534_v13, %v1525_v59  ;;  %v2095_v59 = vmul.f32 %v2094_v46, %v3779_v8 }
 0x382   : > { %1981 = vrot.lane.b32.xlu1 %v1976_v51, %s2971_s18  ;;  %1979 = vrot.lane.b32.xlu0 %v1975_v52, %s2971_s18  ;;  %v2082_v51 = vmul.f32 %v2080_v49, %v3775_v38  ;;  %v2081_v52 = vmul.f32 %v2080_v49, %v3779_v8 }
 0x384   : > { %v1550_v4 = vpop.permute.xlu1 %1549  ;;  %v1548_v55 = vpop.permute.xlu0 %1547 }
 0x385   : > { %v1554_v10 = vadd.f32 %v1550_v4, %v1540_v3  ;;  %v1553_v19 = vadd.f32 %v1548_v55, %v1539_v17 }
 0x386   : > { %1995 = vrot.lane.b32.xlu1 %v1990_v48, %s2970_s17  ;;  %1993 = vrot.lane.b32.xlu0 %v1989_v54, %s2970_s17  ;;  %v2096_v54 = vmul.f32 %v2094_v46, %v3775_v38  ;;  %v2186_v46 = vstv %s2714_s26  ;;  %s3878_s26 = sld [smem:[#allocation12 + $0x59]] }
 0x388   : > { %v1564_v61 = vpop.permute.xlu1 %1563  ;;  %v1562_v40 = vpop.permute.xlu0 %1561 }
 0x389   : > { %v1568_v62 = vadd.f32 %v1564_v61, %v1554_v10  ;;  %v1567_v23 = vadd.f32 %v1562_v40, %v1553_v19  ;;  %v2108_v61 = vstv %s2708_s10  ;;  %s3836_s10 = sld [smem:[#allocation12 + $0x31]] }
 0x38a   : > { %2009 = vrot.lane.b32.xlu1 %v2004_v1, %s2974_s19  ;;  %2007 = vrot.lane.b32.xlu0 %v2003_v7, %s2974_s19  ;;  %v2110_v9 = vmul.f32 %v2108_v61, %v3775_v38  ;;  %v2109_v19 = vmul.f32 %v2108_v61, %v3779_v8 }
 0x38c   : > { %v1578_v60 = vpop.permute.xlu1 %1577  ;;  %v1576_v12 = vpop.permute.xlu0 %1575 }
 0x38d   : > { %v1582_v24 = vadd.f32 %v1578_v60, %v1568_v62  ;;  %v1581_v25 = vadd.f32 %v1576_v12, %v1567_v23  ;;  %v2122_v60 = vstv %s3788_s16  ;;  %s3841_s16 = sld [smem:[#allocation12 + $0x53]] }
 0x38e   : > { %2023 = vrot.lane.b32.xlu1 %v2018_v11, %s2975_s21  ;;  %2021 = vrot.lane.b32.xlu0 %v2017_v14, %s2975_s21  ;;  %v1692_v11 = vstv %s3790_s23  ;;  %v2124_v22 = vmul.f32 %v2122_v60, %v3775_v38  ;;  %s3848_s23 = sld [smem:[#allocation12 + $0x55]] }
 0x38f   : > { %v1694_v23 = vmul.f32 %v1692_v11, %v3606_v37 }
 0x390   : > { %v1592_v26 = vpop.permute.xlu1 %1591  ;;  %v1590_v28 = vpop.permute.xlu0 %1589 }
 0x391   : > { %v1596_v27 = vadd.f32 %v1592_v26, %v1582_v24  ;;  %v1595_v18 = vadd.f32 %v1590_v28, %v1581_v25  ;;  %v2123_v26 = vmul.f32 %v2122_v60, %v3779_v8 }
 0x392   : > { %2037 = vrot.lane.b32.xlu1 %v2032_v21, %s2977_s20  ;;  %2035 = vrot.lane.b32.xlu0 %v2031_v29, %s2977_s20  ;;  %v2136_v21 = vstv %s3796_s15  ;;  %s3857_s15 = sld [smem:[#allocation12 + $0x56]] }
 0x393   : > { %v1604_v31 = vadd.f32 %v1602_v20, %v1596_v27  ;;  %v1603_v34 = vadd.f32 %v1601_v32, %v1595_v18  ;;  %v1693_v20 = vmul.f32 %v1692_v11, %v3610_v6  ;;  %v2138_v37 = vmul.f32 %v2136_v21, %v3775_v38 }
 0x394   : > { %v1614_v33 = vpop.permute.xlu1 %1613  ;;  %v1612_v2 = vpop.permute.xlu0 %1611 }
 0x395   : > { %v1618_v4 = vadd.f32 %v1614_v33, %v1604_v31  ;;  %v1617_v48 = vadd.f32 %v1612_v2, %v1603_v34  ;;  %v2137_v31 = vmul.f32 %v2136_v21, %v3779_v8  ;;  %v3819_v34 = vld [vmem:[#allocation3 + $0x24] sm:$0xff]  ;;  %v2158_v33 = vstv %s3803_s22  ;;  %s2721_s22 = sld [smem:[#allocation12 + $0x57]] }
 0x396   : > { %2051 = vrot.lane.b32.xlu1 %v2046_v35, %s2978_s24  ;;  %2049 = vrot.lane.b32.xlu0 %v2045_v36, %s2978_s24  ;;  %v3823_v35 = vld [vmem:[#allocation3 + $0x1c] sm:$0xff]  ;;  %v2160_v36 = vmul.f32 %v2158_v33, %v3819_v34 }
 0x398   : > { %v1628_v42 = vpop.permute.xlu1 %1627  ;;  %v1626_v41 = vpop.permute.xlu0 %1625 }
 0x399   : > { %v1632_v56 = vadd.f32 %v1628_v42, %v1618_v4  ;;  %v1631_v1 = vadd.f32 %v1626_v41, %v1617_v48  ;;  %v2172_v41 = vstv %s3812_s25  ;;  %s2722_s25 = sld [smem:[#allocation12 + $0x58]] }
 0x39a   : > { %2073 = vrot.lane.b32.xlu1 %v2068_v43, %s2971_s18  ;;  %2071 = vrot.lane.b32.xlu0 %v2067_v45, %s2971_s18  ;;  %v2159_v43 = vmul.f32 %v2158_v33, %v3823_v35 }
 0x39c   : > { %v1642_v50 = vpop.permute.xlu1 %1641  ;;  %v1640_v13 = vpop.permute.xlu0 %1639 }
 0x39d   : > { %v1646_v3 = vadd.f32 %v1642_v50, %v1632_v56  ;;  %v1645_v40 = vadd.f32 %v1640_v13, %v1631_v1  ;;  %v2174_v50 = vmul.f32 %v2172_v41, %v3819_v34 }
 0x39e   : > { %2087 = vrot.lane.b32.xlu1 %v2082_v51, %s2970_s17  ;;  %2085 = vrot.lane.b32.xlu0 %v2081_v52, %s2970_s17  ;;  %v2173_v52 = vmul.f32 %v2172_v41, %v3823_v35 }
 0x3a0   : > { %v1656_v55 = vpop.permute.xlu1 %1655  ;;  %v1654_v57 = vpop.permute.xlu0 %1653 }
 0x3a1   : > { %v1660_v17 = vadd.f32 %v1656_v55, %v1646_v3  ;;  %v1659_v62 = vadd.f32 %v1654_v57, %v1645_v40  ;;  %v2188_v55 = vmul.f32 %v2186_v46, %v3819_v34  ;;  %v2187_v57 = vmul.f32 %v2186_v46, %v3823_v35 }
 0x3a2   : > { %2101 = vrot.lane.b32.xlu1 %v2096_v54, %s2974_s19  ;;  %2099 = vrot.lane.b32.xlu0 %v2095_v59, %s2974_s19  ;;  %v2200_v59 = vstv %s2715_s27  ;;  %s3881_s27 = sld [smem:[#allocation12 + $0x38]] }
 0x3a3   : > { %v2202_v3 = vmul.f32 %v2200_v59, %v3819_v34 }
 0x3a4   : > { %v1670_v7 = vpop.permute.xlu1 %1669  ;;  %v1668_v10 = vpop.permute.xlu0 %1667 }
 0x3a5   : > { %v1674_v12 = vadd.f32 %v1670_v7, %v1660_v17  ;;  %v1673_v14 = vadd.f32 %v1668_v10, %v1659_v62  ;;  %v2214_v17 = vstv %s3833_s6  ;;  %s3886_s6 = sld [smem:[#allocation12 + $0x5a]] }
 0x3a6   : > { %2115 = vrot.lane.b32.xlu1 %v2110_v9, %s2975_s21  ;;  %2113 = vrot.lane.b32.xlu0 %v2109_v19, %s2975_s21  ;;  %v2201_v9 = vmul.f32 %v2200_v59, %v3823_v35  ;;  %v1784_v19 = vstv %s3836_s10  ;;  %v2216_v11 = vmul.f32 %v2214_v17, %v3819_v34  ;;  %s3893_s10 = sld [smem:[#allocation12 + $0x5c]] }
 0x3a8   : > { %v1684_v15 = vpop.permute.xlu1 %1683  ;;  %v1682_v25 = vpop.permute.xlu0 %1681 }
 0x3a9   : > { %v1688_v24 = vadd.f32 %v1684_v15, %v1674_v12  ;;  %v1687_v27 = vadd.f32 %v1682_v25, %v1673_v14  ;;  %v1786_v12 = vmul.f32 %v1784_v19, %v3649_v5  ;;  %v2215_v15 = vmul.f32 %v2214_v17, %v3823_v35 }
 0x3aa   : > { %2129 = vrot.lane.b32.xlu1 %v2124_v22, %s2977_s20  ;;  %2127 = vrot.lane.b32.xlu0 %v2123_v26, %s2977_s20  ;;  %v2228_v22 = vstv %s3841_s16  ;;  %s2727_s16 = sld [smem:[#allocation12 + $0x5d]] }
 0x3ab   : > { %v1696_v28 = vadd.f32 %v1694_v23, %v1688_v24  ;;  %v1695_v29 = vadd.f32 %v1693_v20, %v1687_v27  ;;  %v1785_v23 = vmul.f32 %v1784_v19, %v3653_v58  ;;  %v2230_v20 = vmul.f32 %v2228_v22, %v3819_v34 }
 0x3ac   : > { %v1706_v30 = vpop.permute.xlu1 %1705  ;;  %v1704_v18 = vpop.permute.xlu0 %1703 }
 0x3ad   : > { %v1710_v32 = vadd.f32 %v1706_v30, %v1696_v28  ;;  %v1709_v6 = vadd.f32 %v1704_v18, %v1695_v29  ;;  %v2229_v28 = vmul.f32 %v2228_v22, %v3823_v35  ;;  %v3864_v29 = vld [vmem:[#allocation3 + $0x25] sm:$0xff]  ;;  %v2250_v30 = vstv %s3848_s23  ;;  %s2728_s23 = sld [smem:[#allocation12 + $0x5e]] }
 0x3ae   : > { %2143 = vrot.lane.b32.xlu1 %v2138_v37, %s2978_s24  ;;  %2141 = vrot.lane.b32.xlu0 %v2137_v31, %s2978_s24  ;;  %v3868_v37 = vld [vmem:[#allocation3 + $0x1d] sm:$0xff]  ;;  %v2252_v18 = vmul.f32 %v2250_v30, %v3864_v29 }
 0x3b0   : > { %v1720_v2 = vpop.permute.xlu1 %1719  ;;  %v1718_v42 = vpop.permute.xlu0 %1717 }
 0x3b1   : > { %v1724_v39 = vadd.f32 %v1720_v2, %v1710_v32  ;;  %v1723_v45 = vadd.f32 %v1718_v42, %v1709_v6  ;;  %v2251_v6 = vmul.f32 %v2250_v30, %v3868_v37  ;;  %v2264_v2 = vstv %s3857_s15  ;;  %s2729_s15 = sld [smem:[#allocation12 + $0x5f]] }
 0x3b2   : > { %2165 = vrot.lane.b32.xlu1 %v2160_v36, %s2971_s18  ;;  %2163 = vrot.lane.b32.xlu0 %v2159_v43, %s2971_s18  ;;  %v2266_v42 = vmul.f32 %v2264_v2, %v3864_v29 }
 0x3b4   : > { %v1734_v49 = vpop.permute.xlu1 %1733  ;;  %v1732_v13 = vpop.permute.xlu0 %1731 }
 0x3b5   : > { %v1738_v51 = vadd.f32 %v1734_v49, %v1724_v39  ;;  %v1737_v4 = vadd.f32 %v1732_v13, %v1723_v45  ;;  %v2265_v45 = vmul.f32 %v2264_v2, %v3868_v37  ;;  %v2278_v49 = vstv %s2721_s22  ;;  %s3920_s22 = sld [smem:[#allocation12 + $0x60]] }
 0x3b6   : > { %2179 = vrot.lane.b32.xlu1 %v2174_v50, %s2970_s17  ;;  %2177 = vrot.lane.b32.xlu0 %v2173_v52, %s2970_s17  ;;  %v2280_v13 = vmul.f32 %v2278_v49, %v3864_v29 }
 0x3b8   : > { %v1748_v48 = vpop.permute.xlu1 %1747  ;;  %v1746_v56 = vpop.permute.xlu0 %1745 }
 0x3b9   : > { %v1752_v54 = vadd.f32 %v1748_v48, %v1738_v51  ;;  %v1751_v61 = vadd.f32 %v1746_v56, %v1737_v4  ;;  %v2279_v4 = vmul.f32 %v2278_v49, %v3868_v37  ;;  %v2292_v48 = vstv %s2722_s25  ;;  %s3923_s25 = sld [smem:[#allocation12 + $0x3f]] }
 0x3ba   : > { %2193 = vrot.lane.b32.xlu1 %v2188_v55, %s2974_s19  ;;  %2191 = vrot.lane.b32.xlu0 %v2187_v57, %s2974_s19  ;;  %v2294_v56 = vmul.f32 %v2292_v48, %v3864_v29  ;;  %v2293_v59 = vmul.f32 %v2292_v48, %v3868_v37 }
 0x3bb   : > { %v2398_v48 = vstv %s3920_s22 }
 0x3bc   : > { %v1762_v1 = vpop.permute.xlu1 %1761  ;;  %v1760_v7 = vpop.permute.xlu0 %1759 }
 0x3bd   : > { %v1766_v40 = vadd.f32 %v1762_v1, %v1752_v54  ;;  %v1765_v10 = vadd.f32 %v1760_v7, %v1751_v61  ;;  %v2306_v61 = vstv %s3878_s26  ;;  %v1876_v1 = vstv %s3881_s27  ;;  %s3928_s26 = sld [smem:[#allocation12 + $0x61]] }
 0x3be   : > { %2207 = vrot.lane.b32.xlu1 %v2202_v3, %s2975_s21  ;;  %2205 = vrot.lane.b32.xlu0 %v2201_v9, %s2975_s21  ;;  %v2308_v9 = vmul.f32 %v2306_v61, %v3864_v29  ;;  %v1878_v17 = vmul.f32 %v1876_v1, %v3691_v53 }
 0x3c0   : > { %v1776_v60 = vpop.permute.xlu1 %1775  ;;  %v1774_v14 = vpop.permute.xlu0 %1773 }
 0x3c1   : > { %v1780_v62 = vadd.f32 %v1776_v60, %v1766_v40  ;;  %v1779_v24 = vadd.f32 %v1774_v14, %v1765_v10  ;;  %v2307_v60 = vmul.f32 %v2306_v61, %v3868_v37 }
 0x3c2   : > { %2221 = vrot.lane.b32.xlu1 %v2216_v11, %s2977_s20  ;;  %2219 = vrot.lane.b32.xlu0 %v2215_v15, %s2977_s20  ;;  %v2320_v11 = vstv %s3886_s6 }
 0x3c3   : > { %v1788_v25 = vadd.f32 %v1786_v12, %v1780_v62  ;;  %v1787_v26 = vadd.f32 %v1785_v23, %v1779_v24  ;;  %v1877_v62 = vmul.f32 %v1876_v1, %v3695_v16  ;;  %v2322_v23 = vmul.f32 %v2320_v11, %v3864_v29  ;;  %v3911_v16 = vld [vmem:[#allocation3 + $0x1e] sm:$0xff] }
 0x3c4   : > { %v1798_v21 = vpop.permute.xlu1 %1797  ;;  %v1796_v27 = vpop.permute.xlu0 %1795  ;;  %v2321_v24 = vmul.f32 %v2320_v11, %v3868_v37 }
 0x3c5   : > { %v1802_v5 = vadd.f32 %v1798_v21, %v1788_v25  ;;  %v1801_v58 = vadd.f32 %v1796_v27, %v1787_v26  ;;  %v3907_v25 = vld [vmem:[#allocation3 + $0x26] sm:$0xff]  ;;  %v2342_v26 = vstv %s3893_s10  ;;  %s2737_s10 = sshll.u32 %s3049_s2, 8 }
 0x3c6   : > { %2235 = vrot.lane.b32.xlu1 %v2230_v20, %s2978_s24  ;;  %2233 = vrot.lane.b32.xlu0 %v2229_v28, %s2978_s24  ;;  %v2344_v20 = vmul.f32 %v2342_v26, %v3907_v25  ;;  %v2343_v27 = vmul.f32 %v2342_v26, %v3911_v16  ;;  %v2356_v28 = vstv %s2727_s16  ;;  %v2400_v61 = vmul.f32 %v2398_v48, %v3907_v25 }
 0x3c8   : > { %v1812_v32 = vpop.permute.xlu1 %1811  ;;  %v1810_v33 = vpop.permute.xlu0 %1809 }
 0x3c9   : > { %v1816_v31 = vadd.f32 %v1812_v32, %v1802_v5  ;;  %v1815_v36 = vadd.f32 %v1810_v33, %v1801_v58  ;;  %v2358_v58 = vmul.f32 %v2356_v28, %v3907_v25 }
 0x3ca   : > { %2257 = vrot.lane.b32.xlu1 %v2252_v18, %s2971_s18  ;;  %2255 = vrot.lane.b32.xlu0 %v2251_v6, %s2971_s18  ;;  %v2357_v18 = vmul.f32 %v2356_v28, %v3911_v16 }
 0x3cc   : > { %v1826_v39 = vpop.permute.xlu1 %1825  ;;  %v1824_v41 = vpop.permute.xlu0 %1823 }
 0x3cd   : > { %v1830_v43 = vadd.f32 %v1826_v39, %v1816_v31  ;;  %v1829_v50 = vadd.f32 %v1824_v41, %v1815_v36  ;;  %v2370_v31 = vstv %s2728_s23  ;;  %v2384_v41 = vstv %s2729_s15  ;;  %s3972_s15 = scalar_lea.hbm %s4024_s7, %s2737_s10 }
 0x3ce   : > { %2271 = vrot.lane.b32.xlu1 %v2266_v42, %s2970_s17  ;;  %2269 = vrot.lane.b32.xlu0 %v2265_v45, %s2970_s17  ;;  %v2372_v36 = vmul.f32 %v2370_v31, %v3907_v25 }
 0x3d0   : > { %v1840_v51 = vpop.permute.xlu1 %1839  ;;  %v1838_v46 = vpop.permute.xlu0 %1837 }
 0x3d1   : > { %v1844_v52 = vadd.f32 %v1840_v51, %v1830_v43  ;;  %v1843_v55 = vadd.f32 %v1838_v46, %v1829_v50  ;;  %v2371_v43 = vmul.f32 %v2370_v31, %v3911_v16 }
 0x3d2   : > { %2285 = vrot.lane.b32.xlu1 %v2280_v13, %s2974_s19  ;;  %2283 = vrot.lane.b32.xlu0 %v2279_v4, %s2974_s19  ;;  %v2386_v13 = vmul.f32 %v2384_v41, %v3907_v25  ;;  %v2385_v4 = vmul.f32 %v2384_v41, %v3911_v16 }
 0x3d4   : > { %v1854_v54 = vpop.permute.xlu1 %1853  ;;  %v1852_v57 = vpop.permute.xlu0 %1851 }
 0x3d5   : > { %v1858_v3 = vadd.f32 %v1854_v54, %v1844_v52  ;;  %v1857_v40 = vadd.f32 %v1852_v57, %v1843_v55  ;;  %v1968_v54 = vstv %s3923_s25  ;;  %s2979_s25 = smov [#allocation14]  }
 0x3d6   : > { %2299 = vrot.lane.b32.xlu1 %v2294_v56, %s2975_s21  ;;  %2297 = vrot.lane.b32.xlu0 %v2293_v59, %s2975_s21  ;;  %v1970_v1 = vmul.f32 %v1968_v54, %v3733_v47 }
 0x3d8   : > { %v1868_v7 = vpop.permute.xlu1 %1867  ;;  %v1866_v19 = vpop.permute.xlu0 %1865 }
 0x3d9   : > { %v1872_v10 = vadd.f32 %v1868_v7, %v1858_v3  ;;  %v1871_v12 = vadd.f32 %v1866_v19, %v1857_v40  ;;  %v2399_v7 = vmul.f32 %v2398_v48, %v3911_v16 }
 0x3da   : > { %2313 = vrot.lane.b32.xlu1 %v2308_v9, %s2977_s20  ;;  %2311 = vrot.lane.b32.xlu0 %v2307_v60, %s2977_s20  ;;  %v2412_v9 = vstv %s3928_s26  ;;  %s2894_s26 = sshll.u32 %s2979_s25, 4  ;;  %s2895_s26 = int_to_ptr.vmem [resolvable:$false] %s2894_s26 }
 0x3db   : > { %v1880_v14 = vadd.f32 %v1878_v17, %v1872_v10  ;;  %v1879_v15 = vadd.f32 %v1877_v62, %v1871_v12  ;;  %v1969_v17 = vmul.f32 %v1968_v54, %v3737_v44  ;;  %v2414_v62 = vmul.f32 %v2412_v9, %v3907_v25  ;;  %v2429_v44 = vld [vmem:[%s3153_s11 + $0x1] sm:$0xff] }
 0x3dc   : > { %v1890_v22 = vpop.permute.xlu1 %1889  ;;  %v1888_v53 = vpop.permute.xlu0 %1887  ;;  %v2413_v12 = vmul.f32 %v2412_v9, %v3911_v16 }
 0x3dd   : > { %v1894_v33 = vadd.f32 %v1890_v22, %v1880_v14  ;;  %v1893_v6 = vadd.f32 %v1888_v53, %v1879_v15  ;;  %v2430_v14 = vld [vmem:[%s3153_s11 + $0x9] sm:$0xff]  ;;  %s2711_s11 = sld [smem:[#allocation12 + $0x4d]] }
 0x3de   : > { %2327 = vrot.lane.b32.xlu1 %v2322_v23, %s2978_s24  ;;  %2325 = vrot.lane.b32.xlu0 %v2321_v24, %s2978_s24 }
 0x3e0   : > { %v1904_v21 = vpop.permute.xlu1 %1903  ;;  %v1902_v5 = vpop.permute.xlu0 %1901 }
 0x3e1   : > { %v1908_v39 = vadd.f32 %v1904_v21, %v1894_v33  ;;  %v1907_v45 = vadd.f32 %v1902_v5, %v1893_v6 }
 0x3e2   : > { %2349 = vrot.lane.b32.xlu1 %v2344_v20, %s2971_s18  ;;  %2347 = vrot.lane.b32.xlu0 %v2343_v27, %s2971_s18 }
 0x3e3   : > { %v2152_v9 = vstv %s2711_s11 }
 0x3e4   : > { %v1918_v30 = vpop.permute.xlu1 %1917  ;;  %v1916_v32 = vpop.permute.xlu0 %1915 }
 0x3e5   : > { %v1922_v49 = vadd.f32 %v1918_v30, %v1908_v39  ;;  %v1921_v50 = vadd.f32 %v1916_v32, %v1907_v45 }
 0x3e6   : > { %2363 = vrot.lane.b32.xlu1 %v2358_v58, %s2970_s17  ;;  %2361 = vrot.lane.b32.xlu0 %v2357_v18, %s2970_s17  ;;  %s2704_s17 = sld [smem:[#allocation12 + $0x46]] }
 0x3e8   : > { %v1932_v2 = vpop.permute.xlu1 %1931  ;;  %v1930_v42 = vpop.permute.xlu0 %1929 }
 0x3e9   : > { %v1936_v52 = vadd.f32 %v1932_v2, %v1922_v49  ;;  %v1935_v55 = vadd.f32 %v1930_v42, %v1921_v50 }
 0x3ea   : > { %2377 = vrot.lane.b32.xlu1 %v2372_v36, %s2974_s19  ;;  %2375 = vrot.lane.b32.xlu0 %v2371_v43, %s2974_s19  ;;  %s2725_s19 = sld [smem:[#allocation12 + $0x5b]] }
 0x3ec   : > { %v1946_v51 = vpop.permute.xlu1 %1945  ;;  %v1944_v46 = vpop.permute.xlu0 %1943  ;;  %v2060_v33 = vstv %s2704_s17  ;;  %s2896_s17 = scalar_lea.vmem %s2895_s26, 512 }
 0x3ed   : > { %v1950_v56 = vadd.f32 %v1946_v51, %v1936_v52  ;;  %v1949_v57 = vadd.f32 %v1944_v46, %v1935_v55  ;;  %v2062_v43 = vmul.f32 %v2060_v33, %v3775_v38  ;;  %v2061_v45 = vmul.f32 %v2060_v33, %v3779_v8 }
 0x3ee   : > { %2391 = vrot.lane.b32.xlu1 %v2386_v13, %s2975_s21  ;;  %2389 = vrot.lane.b32.xlu0 %v2385_v4, %s2975_s21  ;;  %s2425_s21 = sld [smem:[#allocation5]] }
 0x3f0   : > { %v1960_v59 = vpop.permute.xlu1 %1959  ;;  %v1958_v40 = vpop.permute.xlu0 %1957 }
 0x3f1   : > { %v1964_v3 = vadd.f32 %v1960_v59, %v1950_v56  ;;  %v1963_v10 = vadd.f32 %v1958_v40, %v1949_v57 }
 0x3f2   : > { %2405 = vrot.lane.b32.xlu1 %v2400_v61, %s2977_s20  ;;  %2403 = vrot.lane.b32.xlu0 %v2399_v7, %s2977_s20  ;;  %s323_s20 = sand.u32 1, %s2956_s29  }
 0x3f3   : > { %v1972_v19 = vadd.f32 %v1970_v1, %v1964_v3  ;;  %v1971_v60 = vadd.f32 %v1969_v17, %v1963_v10  ;;  %s3976_s2 = scalar_lea.sflag [#allocation7], %s323_s20 }
 0x3f4   : > { %v1982_v11 = vpop.permute.xlu1 %1981  ;;  %v1980_v47 = vpop.permute.xlu0 %1979 }
 0x3f5   : > { %v1986_v24 = vadd.f32 %v1982_v11, %v1972_v19  ;;  %v1985_v26 = vadd.f32 %v1980_v47, %v1971_v60 }
 0x3f6   : > { %2419 = vrot.lane.b32.xlu1 %v2414_v62, %s2978_s24  ;;  %2417 = vrot.lane.b32.xlu0 %v2413_v12, %s2978_s24  ;;  %v2154_v62 = vmul.f32 %v2152_v9, %v3819_v34  ;;  %v2153_v12 = vmul.f32 %v2152_v9, %v3823_v35  ;;  %s2575_s24 = sshll.u32 %s323_s20, 4 }
 0x3f7   : > { %s325_s27 = scalar_lea.vmem [#allocation14], %s2575_s24 }
 0x3f8   : > { %v1996_v15 = vpop.permute.xlu1 %1995  ;;  %v1994_v22 = vpop.permute.xlu0 %1993  ;;  %s2460_s6 = sshll.u32 %s325_s27, 4  ;;  %s3967_s6 = int_to_ptr.vmem [resolvable:$true] %s2460_s6 }
 0x3f9   : > { %v2000_v20 = vadd.f32 %v1996_v15, %v1986_v24  ;;  %v1999_v27 = vadd.f32 %v1994_v22, %v1985_v26  ;;  %s2890_s22 = scalar_lea.vmem %s3967_s6, 256  ;;  %p2897_p2 = scmp.lt.s32.totalorder %s3967_s6, %s2895_s26 }
 0x3fa   : > { %2437 = vrot.lane.b32.xlu1 %v2430_v14, %s2971_s18  ;;  %2435 = vrot.lane.b32.xlu0 %v2429_v44, %s2971_s18  ;;  %s2718_s18 = sld [smem:[#allocation12 + $0x54]]  ;;  %p2891_p8 = scmp.ne.s32.totalorder %s3967_s6, %s2890_s22 }
 0x3fb   : > { %p2898_p3 = scmp.lt.s32.totalorder %s2896_s17, %s2890_s22 }
 0x3fc   : > { %v2010_v23 = vpop.permute.xlu1 %2009  ;;  %v2008_v53 = vpop.permute.xlu0 %2007  ;;  %p2892_p13 = pnand %p2891_p8, %p4039_p11 }
 0x3fd   : > { %v2014_v28 = vadd.f32 %v2010_v23, %v2000_v20  ;;  %v2013_v30 = vadd.f32 %v2008_v53, %v1999_v27  ;;  %p2899_p4 = por %p2898_p3, %p2897_p2 }
 0x3fe   : > { %p2893_p1 = pneg %p2892_p13 }
 0x400   : > { %v2024_v21 = vpop.permute.xlu1 %2023  ;;  %v2022_v5 = vpop.permute.xlu0 %2021  ;;  %v2244_v33 = vstv %s2718_s18  ;;  %p2900_p9 = pnand %p2899_p4, %p2893_p1 }
 0x401   : > { %v2028_v32 = vadd.f32 %v2024_v21, %v2014_v28  ;;  %v2027_v31 = vadd.f32 %v2022_v5, %v2013_v30 }
 0x404   : > { %v2038_v58 = vpop.permute.xlu1 %2037  ;;  %v2036_v18 = vpop.permute.xlu0 %2035 }
 0x405   : > { %v2042_v6 = vadd.f32 %v2038_v58, %v2028_v32  ;;  %v2041_v2 = vadd.f32 %v2036_v18, %v2027_v31 }
 0x408   : > { %v2052_v36 = vpop.permute.xlu1 %2051  ;;  %v2050_v42 = vpop.permute.xlu0 %2049 }
 0x409   : > { %v2056_v39 = vadd.f32 %v2052_v36, %v2042_v6  ;;  %v2055_v41 = vadd.f32 %v2050_v42, %v2041_v2 }
 0x40b   : > { %v2064_v49 = vadd.f32 %v2062_v43, %v2056_v39  ;;  %v2063_v51 = vadd.f32 %v2061_v45, %v2055_v41  ;;  %v2246_v43 = vmul.f32 %v2244_v33, %v3864_v29  ;;  %v2245_v45 = vmul.f32 %v2244_v33, %v3868_v37 }
 0x40c   : > { %v2074_v50 = vpop.permute.xlu1 %2073  ;;  %v2072_v13 = vpop.permute.xlu0 %2071 }
 0x40d   : > { %v2078_v55 = vadd.f32 %v2074_v50, %v2064_v49  ;;  %v2077_v54 = vadd.f32 %v2072_v13, %v2063_v51 }
 0x410   : > { %v2088_v52 = vpop.permute.xlu1 %2087  ;;  %v2086_v46 = vpop.permute.xlu0 %2085 }
 0x411   : > { %v2092_v57 = vadd.f32 %v2088_v52, %v2078_v55  ;;  %v2091_v61 = vadd.f32 %v2086_v46, %v2077_v54 }
 0x414   : > { %v2102_v4 = vpop.permute.xlu1 %2101  ;;  %v2100_v48 = vpop.permute.xlu0 %2099 }
 0x415   : > { %v2106_v1 = vadd.f32 %v2102_v4, %v2092_v57  ;;  %v2105_v38 = vadd.f32 %v2100_v48, %v2091_v61 }
 0x418   : > { %v2116_v56 = vpop.permute.xlu1 %2115  ;;  %v2114_v59 = vpop.permute.xlu0 %2113 }
 0x419   : > { %v2120_v40 = vadd.f32 %v2116_v56, %v2106_v1  ;;  %v2119_v7 = vadd.f32 %v2114_v59, %v2105_v38 }
 0x41c   : > { %v2130_v3 = vpop.permute.xlu1 %2129  ;;  %v2128_v8 = vpop.permute.xlu0 %2127 }
 0x41d   : > { %v2134_v17 = vadd.f32 %v2130_v3, %v2120_v40  ;;  %v2133_v10 = vadd.f32 %v2128_v8, %v2119_v7  ;;  %v2336_v8 = vstv %s2725_s19 }
 0x420   : > { %v2144_v19 = vpop.permute.xlu1 %2143  ;;  %v2142_v11 = vpop.permute.xlu0 %2141 }
 0x421   : > { %v2148_v60 = vadd.f32 %v2144_v19, %v2134_v17  ;;  %v2147_v47 = vadd.f32 %v2142_v11, %v2133_v10 }
 0x423   : > { %v2156_v14 = vadd.f32 %v2154_v62, %v2148_v60  ;;  %v2155_v44 = vadd.f32 %v2153_v12, %v2147_v47  ;;  %v2338_v60 = vmul.f32 %v2336_v8, %v3907_v25  ;;  %v2337_v62 = vmul.f32 %v2336_v8, %v3911_v16 }
 0x424   : > { %v2166_v15 = vpop.permute.xlu1 %2165  ;;  %v2164_v22 = vpop.permute.xlu0 %2163 }
 0x425   : > { %v2170_v21 = vadd.f32 %v2166_v15, %v2156_v14  ;;  %v2169_v20 = vadd.f32 %v2164_v22, %v2155_v44 }
 0x428   : > { %v2180_v23 = vpop.permute.xlu1 %2179  ;;  %v2178_v53 = vpop.permute.xlu0 %2177 }
 0x429   : > { %v2184_v27 = vadd.f32 %v2180_v23, %v2170_v21  ;;  %v2183_v30 = vadd.f32 %v2178_v53, %v2169_v20 }
 0x42c   : > { %v2194_v24 = vpop.permute.xlu1 %2193  ;;  %v2192_v26 = vpop.permute.xlu0 %2191 }
 0x42d   : > { %v2198_v58 = vadd.f32 %v2194_v24, %v2184_v27  ;;  %v2197_v34 = vadd.f32 %v2192_v26, %v2183_v30 }
 0x430   : > { %v2208_v5 = vpop.permute.xlu1 %2207  ;;  %v2206_v28 = vpop.permute.xlu0 %2205 }
 0x431   : > { %v2212_v18 = vadd.f32 %v2208_v5, %v2198_v58  ;;  %v2211_v31 = vadd.f32 %v2206_v28, %v2197_v34 }
 0x434   : > { %v2222_v32 = vpop.permute.xlu1 %2221  ;;  %v2220_v35 = vpop.permute.xlu0 %2219 }
 0x435   : > { %v2226_v6 = vadd.f32 %v2222_v32, %v2212_v18  ;;  %v2225_v2 = vadd.f32 %v2220_v35, %v2211_v31  ;;  %v2426_v35 = vstv %s2425_s21 }
 0x438   : > { %v2236_v36 = vpop.permute.xlu1 %2235  ;;  %v2234_v42 = vpop.permute.xlu0 %2233 }
 0x439   : > { %v2240_v39 = vadd.f32 %v2236_v36, %v2226_v6  ;;  %v2239_v41 = vadd.f32 %v2234_v42, %v2225_v2 }
 0x43b   : > { %v2248_v49 = vadd.f32 %v2246_v43, %v2240_v39  ;;  %v2247_v51 = vadd.f32 %v2245_v45, %v2239_v41 }
 0x43c   : > { %v2258_v50 = vpop.permute.xlu1 %2257  ;;  %v2256_v13 = vpop.permute.xlu0 %2255 }
 0x43d   : > { %v2262_v55 = vadd.f32 %v2258_v50, %v2248_v49  ;;  %v2261_v54 = vadd.f32 %v2256_v13, %v2247_v51 }
 0x440   : > { %v2272_v52 = vpop.permute.xlu1 %2271  ;;  %v2270_v46 = vpop.permute.xlu0 %2269 }
 0x441   : > { %v2276_v57 = vadd.f32 %v2272_v52, %v2262_v55  ;;  %v2275_v61 = vadd.f32 %v2270_v46, %v2261_v54 }
 0x444   : > { %v2286_v4 = vpop.permute.xlu1 %2285  ;;  %v2284_v48 = vpop.permute.xlu0 %2283 }
 0x445   : > { %v2290_v1 = vadd.f32 %v2286_v4, %v2276_v57  ;;  %v2289_v29 = vadd.f32 %v2284_v48, %v2275_v61 }
 0x448   : > { %v2300_v56 = vpop.permute.xlu1 %2299  ;;  %v2298_v59 = vpop.permute.xlu0 %2297 }
 0x449   : > { %v2304_v3 = vadd.f32 %v2300_v56, %v2290_v1  ;;  %v2303_v40 = vadd.f32 %v2298_v59, %v2289_v29 }
 0x44c   : > { %v2314_v38 = vpop.permute.xlu1 %2313  ;;  %v2312_v37 = vpop.permute.xlu0 %2311 }
 0x44d   : > { %v2318_v7 = vadd.f32 %v2314_v38, %v2304_v3  ;;  %v2317_v9 = vadd.f32 %v2312_v37, %v2303_v40 }
 0x450   : > { %v2328_v17 = vpop.permute.xlu1 %2327  ;;  %v2326_v19 = vpop.permute.xlu0 %2325 }
 0x451   : > { %v2332_v10 = vadd.f32 %v2328_v17, %v2318_v7  ;;  %v2331_v11 = vadd.f32 %v2326_v19, %v2317_v9 }
 0x453   : > { %v2340_v47 = vadd.f32 %v2338_v60, %v2332_v10  ;;  %v2339_v14 = vadd.f32 %v2337_v62, %v2331_v11 }
 0x454   : > { %v2350_v12 = vpop.permute.xlu1 %2349  ;;  %v2348_v15 = vpop.permute.xlu0 %2347 }
 0x455   : > { %v2354_v24 = vadd.f32 %v2350_v12, %v2340_v47  ;;  %v2353_v26 = vadd.f32 %v2348_v15, %v2339_v14 }
 0x458   : > { %v2364_v44 = vpop.permute.xlu1 %2363  ;;  %v2362_v22 = vpop.permute.xlu0 %2361 }
 0x459   : > { %v2368_v20 = vadd.f32 %v2364_v44, %v2354_v24  ;;  %v2367_v25 = vadd.f32 %v2362_v22, %v2353_v26 }
 0x45c   : > { %v2378_v23 = vpop.permute.xlu1 %2377  ;;  %v2376_v53 = vpop.permute.xlu0 %2375 }
 0x45d   : > { %v2382_v27 = vadd.f32 %v2378_v23, %v2368_v20  ;;  %v2381_v16 = vadd.f32 %v2376_v53, %v2367_v25 }
 0x460   : > { %v2392_v21 = vpop.permute.xlu1 %2391  ;;  %v2390_v5 = vpop.permute.xlu0 %2389 }
 0x461   : > { %v2396_v30 = vadd.f32 %v2392_v21, %v2382_v27  ;;  %v2395_v34 = vadd.f32 %v2390_v5, %v2381_v16 }
 0x464   : > { %v2406_v28 = vpop.permute.xlu1 %2405  ;;  %v2404_v58 = vpop.permute.xlu0 %2403 }
 0x465   : > { %v2410_v32 = vadd.f32 %v2406_v28, %v2396_v30  ;;  %v2409_v18 = vadd.f32 %v2404_v58, %v2395_v34 }
 0x468   : > { %v2420_v31 = vpop.permute.xlu1 %2419  ;;  %v2418_v6 = vpop.permute.xlu0 %2417 }
 0x469   : > { %v2424_v33 = vadd.f32 %v2420_v31, %v2410_v32  ;;  %v2423_v2 = vadd.f32 %v2418_v6, %v2409_v18 }
 0x46b   : > { %v2428_v36 = vadd.f32 %v2426_v35, %v2424_v33  ;;  %v2427_v39 = vadd.f32 %v2426_v35, %v2423_v2 }
 0x46c   : > { %v2438_v42 = vpop.permute.xlu1 %2437  ;;  %v2436_v41 = vpop.permute.xlu0 %2435 }
 0x46d   : > { %v2432_v43 = vmul.f32 %v2428_v36, %v3176_v63  ;;  %v2431_v45 = vmul.f32 %v2427_v39, %v3178_v0 }
 0x46f   : > { %v2442_v49 = vadd.f32 %v2438_v42, %v2432_v43  ;;  %v2441_v50 = vadd.f32 %v2436_v41, %v2431_v45 }
 0x471   : > { %2445 = vst.msk [vmem:[%s325_s27 + $0x8] sm:$0xff] %vm2443_vm6, %v2442_v49  ;;  %2444 = vst.msk [vmem:[%s325_s27] sm:$0xff] %vm2443_vm6, %v2441_v50 }
 0x472   : > { %2903 = shalt.err (!%p2900_p9)
}
 0x473   : > { %s2904_s11 = scalar_lea.hbm %s3972_s15, 256  ;;  %s2908_s21 = scalar_lea.hbm %s4024_s7, 512 }
 0x474   : > { %p2905_p7 = scmp.ne.s32.totalorder %s3972_s15, %s2904_s11  ;;  %p2909_p6 = scmp.lt.u32.totalorder %s3972_s15, %s4024_s7 }
 0x475   : > { %p2910_p12 = scmp.lt.u32.totalorder %s2908_s21, %s2904_s11  ;;  %p2912_p8 = scmp.lt.u32.totalorder %s2904_s11, %s3972_s15 }
 0x476   : > { %p2906_p0 = pnand %p2905_p7, %p4039_p11 }
 0x477   : > { %p2911_p10 = por %p2910_p12, %p2909_p6 }
 0x478   : > { %p2907_p5 = pneg %p2906_p0 }
 0x479   : > { %p2913_p13 = por %p2912_p8, %p2911_p10 }
 0x47b   : > { %p2914_p1 = pnand %p2913_p13, %p2907_p5 }
 0x47d   : > { %2917 = shalt.err (!%p2914_p1)
}
 0x47e   : > { %s2980_s27 = smov 128   ;;  %s2981_s10 = smov 8  }
 0x47f   : > { %2755 = dma.vmem_to_hbm [thread:$0]  (%p4039_p11), %s3967_s6, 256, %s3972_s15, %s3976_s2, %s2980_s27, %s2980_s27, %s2981_s10  }
 0x480 PF: > { %p2782_p2 = scmp.ge.s32.totalorder %s2964_s8, 2  ;;  %s2475_s16 = sand.u32 1, %s2952_s28  }
 0x481   : > { %p4040_p3 = scmp.ne.s32.totalorder %s4029_s14, 0  ;;  %s2476_s23 = scalar_lea.sflag [#allocation7], %s2475_s16 }
 0x483   : > { %p2771_p4 = pnand %p2782_p2, %p4040_p3 }
 0x485   : > { %2947 = dma.done.wait (!%p2771_p4), %s2476_s23, 256  }
 0x486   : > { %2949 = vsyncadd (!%p2771_p4), %s2476_s23, 4294967040  ;;  %p22_p9 = scmp.ge.s32.totalorder %s3053_s9, 4   ;;  %s4041_s28 = smov %s2956_s29 }
 0x487   : > { %s4042_s29 = smov %s2960_s30  ;;  %s4043_s30 = smov %s3064_s12 }
 0x488   : > { %s4044_s8 = smov %s3053_s9  ;;  %24 = sbr.rel (!%p22_p9) target bundleno = 9 (0x9), region = 101 }
 0x48f   :  { %2481 = vsyncpa [#allocation7], 1 }
 0x490   :  { %2483 = vsyncpa [#allocation7 + $0x1], 1 }
 0x491   :  { %2484 = vsyncpa [#allocation8], 1 }
 0x492   :  { %2486 = vsyncpa [#allocation8 + $0x1], 1 }
 0x493   :  { %2487 = vsyncpa [#allocation10], 1 }
 0x494   :  { %2488 = vsyncpa [#allocation13], 1 }

</bundles_post_ra>
